<compile_context>
chip_gen: v7x
topology: tpu7x:2x2x1
jax: 0.10.0
libtpu: 0.0.40
codegen_flags: <defaults>
</compile_context>

<pallas_src>
import numpy as np
import jax
import jax.numpy as jnp
from jax import lax
from jax.experimental import pallas as pl
from jax.experimental.pallas import tpu as pltpu

# pywt 'db4' decomposition (analysis) filters.
DEC_LO = (-0.010597401785069032, 0.0328830116668852, 0.030841381835560764,
          -0.18703481171909309, -0.027983769416859854, 0.6308807679298589,
          0.7148465705529157, 0.2303778133088965)
DEC_HI = (-0.2303778133088965, 0.7148465705529157, -0.6308807679298589,
          -0.027983769416859854, 0.18703481171909309, 0.030841381835560764,
          -0.0328830116668852, -0.010597401785069032)
# pytorch_wavelets (prep_filt_afb1d) reverses the filters and then uses conv2d
# (= correlation), i.e. out[n] = sum_k x_pad[2n + k] * h_rev[k].
H0R = tuple(reversed(DEC_LO))
H1R = tuple(reversed(DEC_HI))
FILT_LEN = len(DEC_LO)

_LANE = 128      # lane width  (minor dim granularity)
_SUBLANE = 8     # sublane width (second-minor dim granularity)


def _rup(x, m):
    return (x + m - 1) // m * m


def _level_operator(t_in, t_in_pad):
    """Dense banded analysis operator for one DWT level (pytorch_wavelets AFB1D,
    mode='zero'), with zero-padding and stride-2 decimation folded in.

    Returns g (float64) of shape (t_in_pad, 2 * t_out_pad) such that, for a signal s
    of logical length t_in laid out (zero-padded) along the lane axis:
        (s @ g)[:, :t_out]                      == lo
        (s @ g)[:, t_out_pad : t_out_pad+t_out] == hi
    Rows / columns in the padded region are exactly zero, so padded lanes propagate
    zeros and the lo half can be composed directly with the next level's operator.
    """
    L = FILT_LEN
    t_out = (t_in + L - 1) // 2
    p = 2 * (t_out - 1) - t_in + L          # total zero padding (pytorch_wavelets)
    left = p // 2
    t_out_pad = _rup(t_out, _LANE)
    g = np.zeros((t_in_pad, 2 * t_out_pad), np.float64)
    for n in range(t_out):
        for k in range(L):
            t = 2 * n + k - left            # index into the *unpadded* signal
            if 0 <= t < t_in:               # taps hitting the zero pad contribute 0
                g[t, n] = H0R[k]
                g[t, t_out_pad + n] = H1R[k]
    return g, t_out, t_out_pad


def _vmem_limit_bytes():
    """Per-generation VMEM budget: 3/4 of physical VMEM (48 MiB on v7x's 64 MiB,
    ~96 MiB on v5e/v6e's 128 MiB). Conservative 48 MiB fallback if the query fails."""
    try:
        cap = getattr(pltpu.get_tpu_info(), "vmem_capacity_bytes", None)
        if cap:
            return int(cap) * 3 // 4
    except Exception:
        pass
    return 48 * 1024 * 1024


def _choose_row_tile(n_rows, vmem_limit):
    """Pick (row_tile, padded_row_count).

    Rows are padded UP to a multiple of the tile (never degrade to tiny tiles for
    awkward B*node), and for >=16 rows the grid always has >=2 steps so the
    "parallel" grid axis keeps both v7x TensorCores busy."""
    n_rows8 = _rup(max(n_rows, _SUBLANE), _SUBLANE)
    target = 512 if vmem_limit >= 80 * 1024 * 1024 else 256
    if n_rows8 >= 2 * target:
        row_tile = target
    elif n_rows8 >= 2 * _SUBLANE:
        row_tile = _rup(-(-n_rows8 // 2), _SUBLANE)   # split into 2 parallel tiles
    else:
        row_tile = n_rows8
    return row_tile, _rup(n_rows8, row_tile)


def _fused_dwt3_kernel(x_ref, g1_ref, g12_ref, g123_ref, o1_ref, o2_ref, o3_ref):
    """Fused 3-level DWT for one tile of (batch*node) rows.

    x_ref  : (rows, Tp)          time on the lane axis, zero-padded
    g*_ref : (Tp, 2*T_jp)        constant (composed) analysis operators
    oJ_ref : (rows, 2*T_jp)      [lo_J | hi_J] slab for level J

    The three dots are independent (composed operators), so the MXU can pipeline
    them; f32 accumulation in all cases, outputs stored in the I/O dtype.
    """
    f32 = jnp.float32
    # bf16 inputs: native bf16 MXU (1 pass, f32 accumulate).
    # f32 inputs: HIGHEST (full f32 emulation) keeps the validated 1e-4 tolerance;
    # use lax.Precision.HIGH (3-pass) if ~1e-6 relative error is acceptable.
    prec = lax.Precision.HIGHEST if x_ref.dtype == jnp.float32 else lax.Precision.DEFAULT
    x = x_ref[...]                                    # no up-cast of x
    o1_ref[...] = jnp.dot(x, g1_ref[...], preferred_element_type=f32,
                          precision=prec).astype(o1_ref.dtype)
    o2_ref[...] = jnp.dot(x, g12_ref[...], preferred_element_type=f32,
                          precision=prec).astype(o2_ref.dtype)
    o3_ref[...] = jnp.dot(x, g123_ref[...], preferred_element_type=f32,
                          precision=prec).astype(o3_ref.dtype)


def dwt_compose(x):
    """Equivalent of DWTCompose.forward. x: (B, T, node). Returns
    [(lo1, hi1), (lo2, hi2), (lo3, hi3)] each of shape (B, T_j, node)."""
    B, T, C = x.shape
    n_rows = B * C
    vlim = _vmem_limit_bytes()
    row_tile, n_rows_pad = _choose_row_tile(n_rows, vlim)
    t_pad = _rup(T, _LANE)

    # channel-last -> channel-first (the torch permute), fold (B, node) onto the
    # sublane axis, keep TIME on the lane axis, pad to tile multiples.
    # TODO(synk): if downstream can consume channel-first (B, node, T_j) directly,
    # this transpose and the three output transposes in _split can be dropped,
    # roughly halving wrapper-side HBM traffic.
    xt = jnp.transpose(x, (0, 2, 1)).reshape(n_rows, T)
    xt = jnp.pad(xt, ((0, n_rows_pad - n_rows), (0, t_pad - T)))

    # Constant analysis operators, built once at trace time in float64 and COMPOSED
    # so levels 2/3 are computed directly from x (no serial chain in-kernel).
    # TODO(synk): these dense operators are O(T^2) in bytes and FLOPs; above
    # T ~ 2k (v7x VMEM) switch to band-aware output-time tiling of level 1.
    g1_np, t1, t1p = _level_operator(T, t_pad)
    g2_np, t2, t2p = _level_operator(t1, t1p)
    g3_np, t3, t3p = _level_operator(t2, t2p)
    g12_np = g1_np[:, :t1p] @ g2_np            # (t_pad, 2*t2p): lo/hi level 2 from x
    g123_np = g12_np[:, :t2p] @ g3_np          # (t_pad, 2*t3p): lo/hi level 3 from x

    # Operators in x.dtype: bf16 inputs get bf16 operators (halves operator DMA and
    # VMEM, native bf16 MXU); f32 inputs keep f32 operators for the 1e-4 tolerance.
    op_dtype = jnp.bfloat16 if x.dtype == jnp.bfloat16 else jnp.float32
    g1 = jnp.asarray(g1_np, dtype=op_dtype)
    g12 = jnp.asarray(g12_np, dtype=op_dtype)
    g123 = jnp.asarray(g123_np, dtype=op_dtype)

    grid = (n_rows_pad // row_tile,)
    out_shape = tuple(jax.ShapeDtypeStruct((n_rows_pad, 2 * tp), x.dtype)
                      for tp in (t1p, t2p, t3p))
    out_specs = tuple(pl.BlockSpec((row_tile, 2 * tp), lambda r: (r, 0))
                      for tp in (t1p, t2p, t3p))

    def _call(single_buffer_ops):
        # Operator block index is constant across the grid -> single-buffer it so the
        # pipeline doesn't allocate a second (useless) VMEM copy of each operator.
        op_kw = {"pipeline_mode": pl.Buffered(1)} if single_buffer_ops else {}
        in_specs = [
            pl.BlockSpec((row_tile, t_pad), lambda r: (r, 0)),
            pl.BlockSpec((t_pad, 2 * t1p), lambda r: (0, 0), **op_kw),
            pl.BlockSpec((t_pad, 2 * t2p), lambda r: (0, 0), **op_kw),
            pl.BlockSpec((t_pad, 2 * t3p), lambda r: (0, 0), **op_kw),
        ]
        return pl.pallas_call(
            _fused_dwt3_kernel,
            out_shape=out_shape,
            grid=grid,
            in_specs=in_specs,
            out_specs=out_specs,
            compiler_params=pltpu.CompilerParams(
                dimension_semantics=("parallel",),   # shards row tiles across v7x TCs
                vmem_limit_bytes=vlim,
            ),
        )(xt, g1, g12, g123)

    try:
        y1, y2, y3 = _call(single_buffer_ops=True)
    except Exception:
        # Fallback for jax versions where BlockSpec.pipeline_mode is unsupported.
        y1, y2, y3 = _call(single_buffer_ops=False)

    def _split(y, t_log, tp):
        y = y[:n_rows]
        lo = y[:, :t_log].reshape(B, C, t_log).transpose(0, 2, 1)
        hi = y[:, tp:tp + t_log].reshape(B, C, t_log).transpose(0, 2, 1)
        return lo, hi

    # TODO(synk): self.bn (BatchNorm1d) and self.act (LeakyReLU) are defined in
    # __init__ but never applied in forward, so they are intentionally omitted.
    return [_split(y1, t1, t1p), _split(y2, t2, t2p), _split(y3, t3, t3p)]


# ---------------- pure NumPy reference (same math, scalar loops) ----------------
def _dwt_level_ref(x):
    x = np.asarray(x, np.float64)
    B, T, C = x.shape
    L = FILT_LEN
    outsize = (T + L - 1) // 2
    p = 2 * (outsize - 1) - T + L
    left, right = p // 2, p - p // 2
    xp = np.pad(x, ((0, 0), (left, right), (0, 0)))
    lo = np.zeros((B, outsize, C), np.float64)
    hi = np.zeros((B, outsize, C), np.float64)
    for n in range(outsize):
        for k in range(L):
            lo[:, n, :] += H0R[k] * xp[:, 2 * n + k, :]
            hi[:, n, :] += H1R[k] * xp[:, 2 * n + k, :]
    return lo.astype(np.float32), hi.astype(np.float32)


def _dwt_compose_ref(x):
    lo1, hi1 = _dwt_level_ref(x)
    lo2, hi2 = _dwt_level_ref(lo1)
    lo3, hi3 = _dwt_level_ref(lo2)
    return [(lo1, hi1), (lo2, hi2), (lo3, hi3)]


if __name__ == "__main__":
    B, T, NODE = 2, 16, 4          # small shapes: batch=2, seq=16, node=4
    key = jax.random.PRNGKey(0)
    x = jax.random.normal(key, (B, T, NODE), dtype=jnp.float32)

    out = jax.block_until_ready(dwt_compose(x))

    ref = _dwt_compose_ref(np.asarray(x))
    for (lo, hi), (rlo, rhi) in zip(out, ref):
        assert lo.shape == rlo.shape and hi.shape == rhi.shape
        np.testing.assert_allclose(np.asarray(lo), rlo, atol=1e-4, rtol=1e-4)
        np.testing.assert_allclose(np.asarray(hi), rhi, atol=1e-4, rtol=1e-4)

    print("KERNEL_OK")
</pallas_src>

<mosaic_0001>
module attributes {stable_mosaic.version = 11 : i64} {
  func.func @_fused_dwt3_kernel(%arg0: i32, %arg1: memref<8x128xf32, #tpu.memory_space<vmem>>, %arg2: memref<128x256xf32, #tpu.memory_space<vmem>>, %arg3: memref<128x256xf32, #tpu.memory_space<vmem>>, %arg4: memref<128x256xf32, #tpu.memory_space<vmem>>, %arg5: memref<8x256xf32, #tpu.memory_space<vmem>>, %arg6: memref<8x256xf32, #tpu.memory_space<vmem>>, %arg7: memref<8x256xf32, #tpu.memory_space<vmem>>) attributes {dimension_semantics = [#tpu.dimension_semantics<parallel>], iteration_bounds = array<i64: 1>, scalar_prefetch = 0 : i64, scratch_operands = 0 : i64, tpu.core_type = #tpu.core_type<tc>, window_params = [{transform_indices = @transform_0, window_bounds = array<i64: 8, 128>}, {pipeline_mode = #tpu.pipeline_mode<synchronous>, transform_indices = @transform_1, window_bounds = array<i64: 128, 256>}, {pipeline_mode = #tpu.pipeline_mode<synchronous>, transform_indices = @transform_2, window_bounds = array<i64: 128, 256>}, {pipeline_mode = #tpu.pipeline_mode<synchronous>, transform_indices = @transform_3, window_bounds = array<i64: 128, 256>}, {transform_indices = @transform_4, window_bounds = array<i64: 8, 256>}, {transform_indices = @transform_5, window_bounds = array<i64: 8, 256>}, {transform_indices = @transform_6, window_bounds = array<i64: 8, 256>}]} {
    %c0 = arith.constant 0 : index
    %c0_0 = arith.constant 0 : index
    %0 = vector.load %arg1[%c0, %c0_0] : memref<8x128xf32, #tpu.memory_space<vmem>>, vector<8x128xf32>
    %c0_1 = arith.constant 0 : index
    %c0_2 = arith.constant 0 : index
    %1 = vector.load %arg2[%c0_1, %c0_2] : memref<128x256xf32, #tpu.memory_space<vmem>>, vector<128x256xf32>
    %cst = arith.constant dense<0.000000e+00> : vector<8x256xf32>
    %2 = tpu.matmul %0, %1, %cst {dimension_numbers = #tpu.dot_dimension_numbers<[1], [0], [0], [1], [0, 0, 1, 1], [], []>, precision = #tpu.contract_precision<fp32>} : vector<8x128xf32>, vector<128x256xf32>, vector<8x256xf32> -> vector<8x256xf32>
    %c0_3 = arith.constant 0 : index
    %c0_4 = arith.constant 0 : index
    %3 = vector.load %arg5[%c0_3, %c0_4] : memref<8x256xf32, #tpu.memory_space<vmem>>, vector<8x256xf32>
    tpu.vector_store %arg5[%c0_3, %c0_4], %2 {strides = array<i32>} : memref<8x256xf32, #tpu.memory_space<vmem>>, vector<8x256xf32>,
    %c0_5 = arith.constant 0 : index
    %c0_6 = arith.constant 0 : index
    %4 = vector.load %arg3[%c0_5, %c0_6] : memref<128x256xf32, #tpu.memory_space<vmem>>, vector<128x256xf32>
    %cst_7 = arith.constant dense<0.000000e+00> : vector<8x256xf32>
    %5 = tpu.matmul %0, %4, %cst_7 {dimension_numbers = #tpu.dot_dimension_numbers<[1], [0], [0], [1], [0, 0, 1, 1], [], []>, precision = #tpu.contract_precision<fp32>} : vector<8x128xf32>, vector<128x256xf32>, vector<8x256xf32> -> vector<8x256xf32>
    %c0_8 = arith.constant 0 : index
    %c0_9 = arith.constant 0 : index
    %6 = vector.load %arg6[%c0_8, %c0_9] : memref<8x256xf32, #tpu.memory_space<vmem>>, vector<8x256xf32>
    tpu.vector_store %arg6[%c0_8, %c0_9], %5 {strides = array<i32>} : memref<8x256xf32, #tpu.memory_space<vmem>>, vector<8x256xf32>,
    %c0_10 = arith.constant 0 : index
    %c0_11 = arith.constant 0 : index
    %7 = vector.load %arg4[%c0_10, %c0_11] : memref<128x256xf32, #tpu.memory_space<vmem>>, vector<128x256xf32>
    %cst_12 = arith.constant dense<0.000000e+00> : vector<8x256xf32>
    %8 = tpu.matmul %0, %7, %cst_12 {dimension_numbers = #tpu.dot_dimension_numbers<[1], [0], [0], [1], [0, 0, 1, 1], [], []>, precision = #tpu.contract_precision<fp32>} : vector<8x128xf32>, vector<128x256xf32>, vector<8x256xf32> -> vector<8x256xf32>
    %c0_13 = arith.constant 0 : index
    %c0_14 = arith.constant 0 : index
    %9 = vector.load %arg7[%c0_13, %c0_14] : memref<8x256xf32, #tpu.memory_space<vmem>>, vector<8x256xf32>
    tpu.vector_store %arg7[%c0_13, %c0_14], %8 {strides = array<i32>} : memref<8x256xf32, #tpu.memory_space<vmem>>, vector<8x256xf32>,
    return
  }
  func.func @transform_0(%arg0: i32) -> (i32, i32) {
    %c0_i32 = arith.constant 0 : i32
    %c0_i32_0 = arith.constant 0 : i32
    return %arg0, %c0_i32 : i32, i32
  }
  func.func @transform_1(%arg0: i32) -> (i32, i32) {
    %c0_i32 = arith.constant 0 : i32
    %c0_i32_0 = arith.constant 0 : i32
    %c0_i32_1 = arith.constant 0 : i32
    return %c0_i32, %c0_i32_0 : i32, i32
  }
  func.func @transform_2(%arg0: i32) -> (i32, i32) {
    %c0_i32 = arith.constant 0 : i32
    %c0_i32_0 = arith.constant 0 : i32
    %c0_i32_1 = arith.constant 0 : i32
    return %c0_i32, %c0_i32_0 : i32, i32
  }
  func.func @transform_3(%arg0: i32) -> (i32, i32) {
    %c0_i32 = arith.constant 0 : i32
    %c0_i32_0 = arith.constant 0 : i32
    %c0_i32_1 = arith.constant 0 : i32
    return %c0_i32, %c0_i32_0 : i32, i32
  }
  func.func @transform_4(%arg0: i32) -> (i32, i32) {
    %c0_i32 = arith.constant 0 : i32
    %c0_i32_0 = arith.constant 0 : i32
    return %arg0, %c0_i32 : i32, i32
  }
  func.func @transform_5(%arg0: i32) -> (i32, i32) {
    %c0_i32 = arith.constant 0 : i32
    %c0_i32_0 = arith.constant 0 : i32
    return %arg0, %c0_i32 : i32, i32
  }
  func.func @transform_6(%arg0: i32) -> (i32, i32) {
    %c0_i32 = arith.constant 0 : i32
    %c0_i32_0 = arith.constant 0 : i32
    return %arg0, %c0_i32 : i32, i32
  }
}

module attributes {stable_mosaic.version = 11 : i64} {
  func.func @_fused_dwt3_kernel(%arg0: i32, %arg1: memref<8x128xf32, #tpu.memory_space<vmem>>, %arg2: memref<128x256xf32, #tpu.memory_space<vmem>>, %arg3: memref<128x256xf32, #tpu.memory_space<vmem>>, %arg4: memref<128x256xf32, #tpu.memory_space<vmem>>, %arg5: memref<8x256xf32, #tpu.memory_space<vmem>>, %arg6: memref<8x256xf32, #tpu.memory_space<vmem>>, %arg7: memref<8x256xf32, #tpu.memory_space<vmem>>) attributes {dimension_semantics = [#tpu.dimension_semantics<parallel>], iteration_bounds = array<i64: 1>, scalar_prefetch = 0 : i64, scratch_operands = 0 : i64, tpu.core_type = #tpu.core_type<tc>, window_params = [{transform_indices = @transform_0, window_bounds = array<i64: 8, 128>}, {pipeline_mode = #tpu.pipeline_mode<synchronous>, transform_indices = @transform_1, window_bounds = array<i64: 128, 256>}, {pipeline_mode = #tpu.pipeline_mode<synchronous>, transform_indices = @transform_2, window_bounds = array<i64: 128, 256>}, {pipeline_mode = #tpu.pipeline_mode<synchronous>, transform_indices = @transform_3, window_bounds = array<i64: 128, 256>}, {transform_indices = @transform_4, window_bounds = array<i64: 8, 256>}, {transform_indices = @transform_5, window_bounds = array<i64: 8, 256>}, {transform_indices = @transform_6, window_bounds = array<i64: 8, 256>}]} {
    %c0 = arith.constant 0 : index
    %c0_0 = arith.constant 0 : index
    %0 = vector.load %arg1[%c0, %c0_0] : memref<8x128xf32, #tpu.memory_space<vmem>>, vector<8x128xf32>
    %c0_1 = arith.constant 0 : index
    %c0_2 = arith.constant 0 : index
    %1 = vector.load %arg2[%c0_1, %c0_2] : memref<128x256xf32, #tpu.memory_space<vmem>>, vector<128x256xf32>
    %cst = arith.constant dense<0.000000e+00> : vector<8x256xf32>
    %2 = tpu.matmul %0, %1, %cst {dimension_numbers = #tpu.dot_dimension_numbers<[1], [0], [0], [1], [0, 0, 1, 1], [], []>, precision = #tpu.contract_precision<fp32>} : vector<8x128xf32>, vector<128x256xf32>, vector<8x256xf32> -> vector<8x256xf32>
    %c0_3 = arith.constant 0 : index
    %c0_4 = arith.constant 0 : index
    %3 = vector.load %arg5[%c0_3, %c0_4] : memref<8x256xf32, #tpu.memory_space<vmem>>, vector<8x256xf32>
    tpu.vector_store %arg5[%c0_3, %c0_4], %2 {strides = array<i32>} : memref<8x256xf32, #tpu.memory_space<vmem>>, vector<8x256xf32>,
    %c0_5 = arith.constant 0 : index
    %c0_6 = arith.constant 0 : index
    %4 = vector.load %arg3[%c0_5, %c0_6] : memref<128x256xf32, #tpu.memory_space<vmem>>, vector<128x256xf32>
    %cst_7 = arith.constant dense<0.000000e+00> : vector<8x256xf32>
    %5 = tpu.matmul %0, %4, %cst_7 {dimension_numbers = #tpu.dot_dimension_numbers<[1], [0], [0], [1], [0, 0, 1, 1], [], []>, precision = #tpu.contract_precision<fp32>} : vector<8x128xf32>, vector<128x256xf32>, vector<8x256xf32> -> vector<8x256xf32>
    %c0_8 = arith.constant 0 : index
    %c0_9 = arith.constant 0 : index
    %6 = vector.load %arg6[%c0_8, %c0_9] : memref<8x256xf32, #tpu.memory_space<vmem>>, vector<8x256xf32>
    tpu.vector_store %arg6[%c0_8, %c0_9], %5 {strides = array<i32>} : memref<8x256xf32, #tpu.memory_space<vmem>>, vector<8x256xf32>,
    %c0_10 = arith.constant 0 : index
    %c0_11 = arith.constant 0 : index
    %7 = vector.load %arg4[%c0_10, %c0_11] : memref<128x256xf32, #tpu.memory_space<vmem>>, vector<128x256xf32>
    %cst_12 = arith.constant dense<0.000000e+00> : vector<8x256xf32>
    %8 = tpu.matmul %0, %7, %cst_12 {dimension_numbers = #tpu.dot_dimension_numbers<[1], [0], [0], [1], [0, 0, 1, 1], [], []>, precision = #tpu.contract_precision<fp32>} : vector<8x128xf32>, vector<128x256xf32>, vector<8x256xf32> -> vector<8x256xf32>
    %c0_13 = arith.constant 0 : index
    %c0_14 = arith.constant 0 : index
    %9 = vector.load %arg7[%c0_13, %c0_14] : memref<8x256xf32, #tpu.memory_space<vmem>>, vector<8x256xf32>
    tpu.vector_store %arg7[%c0_13, %c0_14], %8 {strides = array<i32>} : memref<8x256xf32, #tpu.memory_space<vmem>>, vector<8x256xf32>,
    return
  }
  func.func @transform_0(%arg0: i32) -> (i32, i32) {
    %c0_i32 = arith.constant 0 : i32
    %c0_i32_0 = arith.constant 0 : i32
    return %arg0, %c0_i32 : i32, i32
  }
  func.func @transform_1(%arg0: i32) -> (i32, i32) {
    %c0_i32 = arith.constant 0 : i32
    %c0_i32_0 = arith.constant 0 : i32
    %c0_i32_1 = arith.constant 0 : i32
    return %c0_i32, %c0_i32_0 : i32, i32
  }
  func.func @transform_2(%arg0: i32) -> (i32, i32) {
    %c0_i32 = arith.constant 0 : i32
    %c0_i32_0 = arith.constant 0 : i32
    %c0_i32_1 = arith.constant 0 : i32
    return %c0_i32, %c0_i32_0 : i32, i32
  }
  func.func @transform_3(%arg0: i32) -> (i32, i32) {
    %c0_i32 = arith.constant 0 : i32
    %c0_i32_0 = arith.constant 0 : i32
    %c0_i32_1 = arith.constant 0 : i32
    return %c0_i32, %c0_i32_0 : i32, i32
  }
  func.func @transform_4(%arg0: i32) -> (i32, i32) {
    %c0_i32 = arith.constant 0 : i32
    %c0_i32_0 = arith.constant 0 : i32
    return %arg0, %c0_i32 : i32, i32
  }
  func.func @transform_5(%arg0: i32) -> (i32, i32) {
    %c0_i32 = arith.constant 0 : i32
    %c0_i32_0 = arith.constant 0 : i32
    return %arg0, %c0_i32 : i32, i32
  }
  func.func @transform_6(%arg0: i32) -> (i32, i32) {
    %c0_i32 = arith.constant 0 : i32
    %c0_i32_0 = arith.constant 0 : i32
    return %arg0, %c0_i32 : i32, i32
  }
}

</mosaic_0001>

<bundles_post_ra>
// kernel: tpu_custom_call.1
= control target key start
LH: loop header
LB: loop body
LE: loop exit
PB: predicated region body
PF: predicated region fallthrough
CT: control target
= control target key end

     0   :  { %12 = vsyncpa [#allocation3], 0  ;;  %s4933_s0 = inlined_call_operand.hbm [shape: f32[8,128], index: 0, kind: input, shape index: {}]   ;;  %s4934_s1 = inlined_call_operand.hbm [shape: f32[128,256], index: 1, kind: input, shape index: {}]   ;;  %s4935_s2 = inlined_call_operand.hbm [shape: f32[128,256], index: 2, kind: input, shape index: {}]   ;;  %s4936_s3 = inlined_call_operand.hbm [shape: f32[128,256], index: 3, kind: input, shape index: {}]   ;;  %s4937_s4 = inlined_call_operand.hbm [shape: f32[8,256], index: 4, kind: output, shape index: {0}]   ;;  %s4938_s5 = inlined_call_operand.hbm [shape: f32[8,256], index: 5, kind: output, shape index: {1}]   ;;  %s4939_s6 = inlined_call_operand.hbm [shape: f32[8,256], index: 6, kind: output, shape index: {2}]  }
   0x1   :  { %13 = vsyncpa [#allocation6], 0 }
   0x2   :  { %14 = vsyncpa [#allocation9], 0 }
   0x3   :  { %15 = vsyncpa [#allocation4], 0 }
   0x4   :  { %16 = vsyncpa [#allocation12], 0  ;;  %s3567_s21 = smov [#allocation5]   ;;  %s3403_s25 = scalar_lea.hbm %s4934_s1, 4096 }
   0x5   :  { %s32_s22 = sshll.u32 %s3567_s21, 4  ;;  %p3404_p0 = scmp.ne.s32.totalorder %s4934_s1, %s3403_s25  ;;  %s33_s22 = int_to_ptr.vmem [resolvable:$true] %s32_s22 }
   0x6   :  { %p3407_p1 = scmp.lt.u32.totalorder %s3403_s25, %s4934_s1 }
   0x8   :  { %p3409_p2 = pnand %p3407_p1, %p3404_p0 }
   0xa   :  { %3412 = shalt.err (!%p3409_p2)
}
   0xb   :  { %s3413_s30 = scalar_lea.vmem %s33_s22, 4096  ;;  %p3418_p4 = scmp.lt.s32.totalorder %s33_s22, %s33_s22 }
   0xc   :  { %p3414_p3 = scmp.ne.s32.totalorder %s33_s22, %s3413_s30  ;;  %p3419_p5 = scmp.lt.s32.totalorder %s3413_s30, %s3413_s30 }
   0xe   :  { %p3420_p6 = por %p3419_p5, %p3418_p4 }
  0x10   :  { %p3421_p7 = pnand %p3420_p6, %p3414_p3 }
  0x12   :  { %3424 = shalt.err (!%p3421_p7)
}
  0x13   :  { %s3568_s7 = smov 256   ;;  %s3569_s8 = smov 16  }
  0x14   :  { %38 = dma.hbm_to_vmem [thread:$0]  %s4934_s1, 4096, %s33_s22, [#allocation6], %s3568_s7, %s3568_s7, %s3569_s8  }
  0x15   :  { %s3570_s11 = smov [#allocation2]   ;;  %s3571_s13 = smov [#allocation7]  }
  0x16   :  { %s23_s12 = sshll.u32 %s3570_s11, 4  ;;  %s44_s14 = sshll.u32 %s3571_s13, 4  ;;  %s24_s12 = int_to_ptr.vmem [resolvable:$true] %s23_s12  ;;  %s45_s14 = int_to_ptr.vmem [resolvable:$true] %s44_s14 }
  0x17   :  { %s3425_s17 = scalar_lea.hbm %s4933_s0, 128 }
  0x18   :  { %p3426_p8 = scmp.ne.s32.totalorder %s4933_s0, %s3425_s17  ;;  %p3429_p9 = scmp.lt.u32.totalorder %s3425_s17, %s4933_s0 }
  0x1a   :  { %p3431_p10 = pnand %p3429_p9, %p3426_p8 }
  0x1c   :  { %3434 = shalt.err (!%p3431_p10)
}
  0x1d   :  { %s3435_s1 = scalar_lea.vmem %s24_s12, 128  ;;  %p3440_p12 = scmp.lt.s32.totalorder %s24_s12, %s24_s12 }
  0x1e   :  { %p3436_p11 = scmp.ne.s32.totalorder %s24_s12, %s3435_s1  ;;  %p3441_p13 = scmp.lt.s32.totalorder %s3435_s1, %s3435_s1 }
  0x20   :  { %p3442_p0 = por %p3441_p13, %p3440_p12 }
  0x22   :  { %p3443_p1 = pnand %p3442_p0, %p3436_p11 }
  0x24   :  { %3446 = shalt.err (!%p3443_p1)
}
  0x25   :  { %26 = dma.hbm_to_vmem [thread:$0]  %s4933_s0, 128, %s24_s12, [#allocation3]  }
  0x26   :  { %s3447_s26 = scalar_lea.hbm %s4935_s2, 4096 }
  0x27   :  { %p3448_p2 = scmp.ne.s32.totalorder %s4935_s2, %s3447_s26  ;;  %p3451_p3 = scmp.lt.u32.totalorder %s3447_s26, %s4935_s2 }
  0x29   :  { %p3453_p4 = pnand %p3451_p3, %p3448_p2 }
  0x2b   :  { %3456 = shalt.err (!%p3453_p4)
}
  0x2c   :  { %s3457_s9 = scalar_lea.vmem %s45_s14, 4096  ;;  %p3462_p6 = scmp.lt.s32.totalorder %s45_s14, %s45_s14 }
  0x2d   :  { %p3458_p5 = scmp.ne.s32.totalorder %s45_s14, %s3457_s9  ;;  %p3463_p7 = scmp.lt.s32.totalorder %s3457_s9, %s3457_s9 }
  0x2f   :  { %p3464_p8 = por %p3463_p7, %p3462_p6 }
  0x31   :  { %p3465_p9 = pnand %p3464_p8, %p3458_p5 }
  0x33   :  { %3468 = shalt.err (!%p3465_p9)
}
  0x34   :  { %50 = dma.hbm_to_vmem [thread:$0]  %s4935_s2, 4096, %s45_s14, [#allocation6], %s3568_s7, %s3568_s7, %s3569_s8  }
  0x35   :  { %s3572_s11 = smov [#allocation8]   ;;  %s3469_s16 = scalar_lea.hbm %s4936_s3, 4096 }
  0x36   :  { %s56_s12 = sshll.u32 %s3572_s11, 4  ;;  %p3470_p10 = scmp.ne.s32.totalorder %s4936_s3, %s3469_s16  ;;  %s57_s12 = int_to_ptr.vmem [resolvable:$true] %s56_s12 }
  0x37   :  { %p3473_p11 = scmp.lt.u32.totalorder %s3469_s16, %s4936_s3 }
  0x39   :  { %p3475_p12 = pnand %p3473_p11, %p3470_p10 }
  0x3b   :  { %3478 = shalt.err (!%p3475_p12)
}
  0x3c   :  { %s3479_s21 = scalar_lea.vmem %s57_s12, 4096  ;;  %p3484_p0 = scmp.lt.s32.totalorder %s57_s12, %s57_s12 }
  0x3d   :  { %p3480_p13 = scmp.ne.s32.totalorder %s57_s12, %s3479_s21  ;;  %p3485_p1 = scmp.lt.s32.totalorder %s3479_s21, %s3479_s21 }
  0x3f   :  { %p3486_p2 = por %p3485_p1, %p3484_p0 }
  0x41   :  { %p3487_p3 = pnand %p3486_p2, %p3480_p13 }
  0x43   :  { %3490 = shalt.err (!%p3487_p3)
}
  0x44   :  { %62 = dma.hbm_to_vmem [thread:$0]  %s4936_s3, 4096, %s57_s12, [#allocation9], %s3568_s7, %s3568_s7, %s3569_s8  }
  0x45   :  { %3557 = dma.done.wait [#allocation3], 128  }
  0x46   :  { %3558 = vsyncadd [#allocation3], 4294967168 }
  0x47   :  { %3559 = dma.done.wait [#allocation6], 8192  }
  0x48   :  { %3560 = vsyncadd [#allocation6], 4294959104 }
  0x49   :  { %3561 = dma.done.wait [#allocation9], 4096  }
  0x4a   :  { %3562 = vsyncadd [#allocation9], 4294963200  ;;  %v4940_v0 = vmov 0.0   ;;  %v77_v1 = vld [vmem:[#allocation5 + $0x8] sm:$0xff]  ;;  %v79_v2 = vld [vmem:[#allocation5 + $0x18] sm:$0xff]  ;;  %s3574_s3 = smov [#allocation10]  }
  0x4b   :  { %204 = vmatprep.mubr.f32.mxu1 %v4940_v0  ;;  %681 = vmatprep.mubr.f32.mxu0 %v4940_v0  ;;  %v76_v3 = vld [vmem:[#allocation5] sm:$0xff]  ;;  %v108_v4 = vand.u32 4294901760, %v77_v1  ;;  %v112_v5 = vand.u32 4294901760, %v79_v2  ;;  %v78_v6 = vld [vmem:[#allocation5 + $0x10] sm:$0xff]  ;;  %v81_v8 = vld [vmem:[#allocation5 + $0x28] sm:$0xff]  ;;  %s2749_s7 = sshll.u32 %s3574_s3, 4  ;;  %s2750_s7 = int_to_ptr.vmem [resolvable:$true] %s2749_s7 }
  0x4c   :  { %v110_v7 = vand.u32 4294901760, %v76_v3  ;;  %v83_v9 = vld [vmem:[#allocation5 + $0x38] sm:$0xff]  ;;  %v114_v10 = vand.u32 4294901760, %v78_v6  ;;  %v116_v11 = vand.u32 4294901760, %v81_v8  ;;  %v80_v13 = vld [vmem:[#allocation5 + $0x20] sm:$0xff]  ;;  %v82_v14 = vld [vmem:[#allocation5 + $0x30] sm:$0xff]  ;;  %p3496_p5 = scmp.lt.s32.totalorder %s2750_s7, %s2750_s7 }
  0x4d   :  { %v120_v12 = vand.u32 4294901760, %v83_v9  ;;  %v85_v15 = vld [vmem:[#allocation5 + $0x48] sm:$0xff]  ;;  %v3671_v16 = vpack.c.bf16 %v112_v5, %v108_v4  ;;  %v3673_v17 = vsub.f32 %v77_v1, %v108_v4  ;;  %v3675_v18 = vsub.f32 %v79_v2, %v112_v5  ;;  %v87_v19 = vld [vmem:[#allocation5 + $0x58] sm:$0xff]  ;;  %v84_v20 = vld [vmem:[#allocation5 + $0x40] sm:$0xff]  ;;  %s3491_s8 = scalar_lea.vmem %s2750_s7, 256 }
  0x4e   :  { %v86_v21 = vld [vmem:[#allocation5 + $0x50] sm:$0xff]  ;;  %v3677_v22 = vpack.c.bf16 %v114_v10, %v110_v7  ;;  %v3679_v23 = vsub.f32 %v76_v3, %v110_v7  ;;  %v3681_v24 = vsub.f32 %v78_v6, %v114_v10  ;;  %v89_v26 = vld [vmem:[#allocation5 + $0x68] sm:$0xff]  ;;  %v91_v27 = vld [vmem:[#allocation5 + $0x78] sm:$0xff]  ;;  %v3687_v28 = vsub.f32 %v81_v8, %v116_v11  ;;  %p3492_p4 = scmp.ne.s32.totalorder %s2750_s7, %s3491_s8  ;;  %p3497_p6 = scmp.lt.s32.totalorder %s3491_s8, %s3491_s8 }
  0x4f   :  { %5180 = vst [vmem:[#allocation19_spill] sm:$0xff] %v3671_v16  ;;  %v3683_v25 = vpack.c.bf16 %v120_v12, %v116_v11  ;;  %2788 = vmatprep.subr.bf16.mxu1 %v3671_v16  ;;  %2884 = vmatprep.subr.bf16.mxu0 %v3671_v16  ;;  %v118_v29 = vand.u32 4294901760, %v80_v13  ;;  %v122_v30 = vand.u32 4294901760, %v82_v14  ;;  %v124_v31 = vand.u32 4294901760, %v85_v15  ;;  %v88_v40 = vld [vmem:[#allocation5 + $0x60] sm:$0xff]  ;;  %v90_v41 = vld [vmem:[#allocation5 + $0x70] sm:$0xff] }
  0x50   :  { %5181 = vst [vmem:[#allocation20_spill] sm:$0xff] %v3677_v22  ;;  %2790 = vmatpush1.bf16.msra.mxu1 %v3677_v22  ;;  %2886 = vmatpush1.bf16.msra.mxu0 %v3677_v22  ;;  %v128_v32 = vand.u32 4294901760, %v87_v19  ;;  %v126_v33 = vand.u32 4294901760, %v84_v20  ;;  %v130_v34 = vand.u32 4294901760, %v86_v21  ;;  %v132_v35 = vand.u32 4294901760, %v89_v26  ;;  %v93_v42 = vld [vmem:[#allocation5 + $0x88] sm:$0xff]  ;;  %p3498_p7 = por %p3497_p6, %p3496_p5 }
  0x51   :  { %5182 = vst [vmem:[#allocation21_spill] sm:$0xff] %v3683_v25  ;;  %2792 = vmatprep.subr.bf16.mxu1 %v3683_v25  ;;  %v3692_v36 = vsub.f32 %v83_v9, %v120_v12  ;;  %2888 = vmatprep.subr.bf16.mxu0 %v3683_v25  ;;  %v3695_v37 = vpack.c.bf16 %v122_v30, %v118_v29  ;;  %v136_v39 = vand.u32 4294901760, %v91_v27  ;;  %v95_v47 = vld [vmem:[#allocation5 + $0x98] sm:$0xff]  ;;  %v92_v48 = vld [vmem:[#allocation5 + $0x80] sm:$0xff]  ;;  %v94_v49 = vld [vmem:[#allocation5 + $0x90] sm:$0xff]  ;;  %v134_v56 = vand.u32 4294901760, %v88_v40 }
  0x52   :  { %v3697_v38 = vsub.f32 %v80_v13, %v118_v29  ;;  %v3699_v43 = vsub.f32 %v82_v14, %v122_v30  ;;  %v3701_v44 = vpack.c.bf16 %v128_v32, %v124_v31  ;;  %v3703_v45 = vsub.f32 %v85_v15, %v124_v31  ;;  %v97_v54 = vld [vmem:[#allocation5 + $0xa8] sm:$0xff]  ;;  %v99_v63 = vld [vmem:[#allocation5 + $0xb8] sm:$0xff]  ;;  %v96_v1 = vld [vmem:[#allocation5 + $0xa0] sm:$0xff]  ;;  %p3499_p8 = pnand %p3498_p7, %p3492_p4 }
  0x53   :  { %5183 = vst [vmem:[#allocation22_spill] sm:$0xff] %v3695_v37  ;;  %v3705_v46 = vsub.f32 %v87_v19, %v128_v32  ;;  %v3707_v50 = vpack.c.bf16 %v130_v34, %v126_v33  ;;  %v3709_v51 = vsub.f32 %v84_v20, %v126_v33  ;;  %v3711_v52 = vsub.f32 %v86_v21, %v130_v34  ;;  %v98_v2 = vld [vmem:[#allocation5 + $0xb0] sm:$0xff]  ;;  %v101_v7 = vld [vmem:[#allocation5 + $0xc8] sm:$0xff]  ;;  %v103_v8 = vld [vmem:[#allocation5 + $0xd8] sm:$0xff] }
  0x54   :  { %5184 = vst [vmem:[#allocation23_spill] sm:$0xff] %v3701_v44  ;;  %v3713_v53 = vpack.c.bf16 %v136_v39, %v132_v35  ;;  %2794 = vmatpush1.bf16.msra.mxu1 %v3695_v37  ;;  %2890 = vmatpush1.bf16.msra.mxu0 %v3695_v37  ;;  %v3717_v55 = vsub.f32 %v89_v26, %v132_v35  ;;  %v138_v57 = vand.u32 4294901760, %v90_v41  ;;  %v140_v58 = vand.u32 4294901760, %v93_v42  ;;  %v100_v9 = vld [vmem:[#allocation5 + $0xc0] sm:$0xff]  ;;  %v102_v14 = vld [vmem:[#allocation5 + $0xd0] sm:$0xff]  ;;  %v105_v31 = vld [vmem:[#allocation5 + $0xe8] sm:$0xff] }
  0x55   :  { %5185 = vst [vmem:[#allocation24_spill] sm:$0xff] %v3707_v50  ;;  %2796 = vmatprep.subr.bf16.mxu1 %v3701_v44  ;;  %2892 = vmatprep.subr.bf16.mxu0 %v3701_v44  ;;  %v3721_v59 = vsub.f32 %v91_v27, %v136_v39  ;;  %v144_v60 = vand.u32 4294901760, %v95_v47  ;;  %v142_v61 = vand.u32 4294901760, %v92_v48  ;;  %v146_v62 = vand.u32 4294901760, %v94_v49  ;;  %v107_v39 = vld [vmem:[#allocation5 + $0xf8] sm:$0xff] }
  0x56   :  { %5186 = vst [vmem:[#allocation25_spill] sm:$0xff] %v3713_v53  ;;  %v3723_v3 = vpack.c.bf16 %v138_v57, %v134_v56  ;;  %v3725_v4 = vsub.f32 %v88_v40, %v134_v56  ;;  %v3727_v5 = vsub.f32 %v90_v41, %v138_v57  ;;  %v148_v6 = vand.u32 4294901760, %v97_v54  ;;  %v104_v40 = vld [vmem:[#allocation5 + $0xe0] sm:$0xff]  ;;  %v106_v41 = vld [vmem:[#allocation5 + $0xf0] sm:$0xff]  ;;  %v75_v56 = vld [vmem:[#allocation2] sm:$0xff] }
  0x57   :  { %v3729_v10 = vpack.c.bf16 %v144_v60, %v140_v58  ;;  %v3731_v11 = vsub.f32 %v93_v42, %v140_v58  ;;  %v3733_v12 = vsub.f32 %v95_v47, %v144_v60  ;;  %v3735_v13 = vpack.c.bf16 %v146_v62, %v142_v61 }
  0x58   :  { %5187 = vst [vmem:[#allocation26_spill] sm:$0xff] %v3723_v3  ;;  %2798 = vmatpush1.bf16.msra.mxu1 %v3707_v50  ;;  %2894 = vmatpush1.bf16.msra.mxu0 %v3707_v50  ;;  %v3739_v15 = vsub.f32 %v92_v48, %v142_v61  ;;  %v3741_v19 = vsub.f32 %v94_v49, %v146_v62  ;;  %v152_v20 = vand.u32 4294901760, %v99_v63  ;;  %v150_v21 = vand.u32 4294901760, %v96_v1 }
  0x59   :  { %5188 = vst [vmem:[#allocation27_spill] sm:$0xff] %v3729_v10  ;;  %5189 = vst [vmem:[#allocation28_spill] sm:$0xff] %v3735_v13  ;;  %2800 = vmatprep.subr.bf16.mxu1 %v3713_v53  ;;  %2896 = vmatprep.subr.bf16.mxu0 %v3713_v53  ;;  %v154_v26 = vand.u32 4294901760, %v98_v2  ;;  %v156_v27 = vand.u32 4294901760, %v101_v7  ;;  %v160_v29 = vand.u32 4294901760, %v103_v8  ;;  %v158_v30 = vand.u32 4294901760, %v100_v9 }
  0x5a   :  { %v3745_v32 = vpack.c.bf16 %v152_v20, %v148_v6  ;;  %v3747_v33 = vsub.f32 %v97_v54, %v148_v6  ;;  %v3749_v34 = vsub.f32 %v99_v63, %v152_v20  ;;  %v162_v35 = vand.u32 4294901760, %v102_v14 }
  0x5b   :  { %v3751_v42 = vpack.c.bf16 %v154_v26, %v150_v21  ;;  %v3753_v47 = vsub.f32 %v96_v1, %v150_v21  ;;  %v3755_v48 = vsub.f32 %v98_v2, %v154_v26  ;;  %v3757_v49 = vpack.c.bf16 %v160_v29, %v156_v27 }
  0x5c   :  { %5190 = vst [vmem:[#allocation29_spill] sm:$0xff] %v3745_v32  ;;  %2802 = vmatpush1.bf16.msra.mxu1 %v3723_v3  ;;  %2898 = vmatpush1.bf16.msra.mxu0 %v3723_v3  ;;  %v3761_v54 = vsub.f32 %v101_v7, %v156_v27  ;;  %v3763_v57 = vsub.f32 %v103_v8, %v160_v29  ;;  %v164_v60 = vand.u32 4294901760, %v105_v31  ;;  %v168_v62 = vand.u32 4294901760, %v107_v39 }
  0x5d   :  { %5191 = vst [vmem:[#allocation30_spill] sm:$0xff] %v3751_v42  ;;  %5192 = vst [vmem:[#allocation31_spill] sm:$0xff] %v3757_v49  ;;  %v3765_v58 = vpack.c.bf16 %v162_v35, %v158_v30  ;;  %2804 = vmatprep.subr.bf16.mxu1 %v3729_v10  ;;  %2900 = vmatprep.subr.bf16.mxu0 %v3729_v10  ;;  %v3769_v61 = vsub.f32 %v100_v9, %v158_v30  ;;  %v166_v63 = vand.u32 4294901760, %v104_v40 }
  0x5e   :  { %v170_v1 = vand.u32 4294901760, %v106_v41  ;;  %v3771_v2 = vsub.f32 %v102_v14, %v162_v35  ;;  %v218_v6 = vand.u32 4294901760, %v3673_v17  ;;  %v230_v7 = vand.u32 4294901760, %v3675_v18 }
  0x5f   :  { %5193 = vst [vmem:[#allocation32_spill] sm:$0xff] %v3765_v58  ;;  %v3775_v8 = vand.u32 4294901760, %v75_v56  ;;  %v3777_v20 = vpack.c.bf16 %v168_v62, %v164_v60  ;;  %v3779_v21 = vsub.f32 %v105_v31, %v164_v60  ;;  %v3781_v26 = vsub.f32 %v107_v39, %v168_v62 }
  0x60   :  { %v3783_v27 = vpack.c.bf16 %v170_v1, %v166_v63  ;;  %2806 = vmatpush1.bf16.msra.mxu1 %v3735_v13  ;;  %2902 = vmatpush1.bf16.msra.mxu0 %v3735_v13  ;;  %v3787_v9 = vsub.f32 %v104_v40, %v166_v63  ;;  %v219_v14 = vsub.f32 %v3673_v17, %v218_v6  ;;  %v224_v30 = vand.u32 4294901760, %v3679_v23 }
  0x61   :  { %5194 = vst [vmem:[#allocation33_spill] sm:$0xff] %v3775_v8  ;;  %5195 = vst [vmem:[#allocation34_spill] sm:$0xff] %v3777_v20  ;;  %v231_v29 = vsub.f32 %v3675_v18, %v230_v7  ;;  %2808 = vmatprep.subr.bf16.mxu1 %v3745_v32  ;;  %2904 = vmatprep.subr.bf16.mxu0 %v3745_v32  ;;  %v3794_v31 = vsub.f32 %v106_v41, %v170_v1  ;;  %v236_v39 = vand.u32 4294901760, %v3681_v24 }
  0x62   :  { %5196 = vst [vmem:[#allocation35_spill] sm:$0xff] %v3779_v21  ;;  %5197 = vst [vmem:[#allocation36_spill] sm:$0xff] %v3781_v26  ;;  %v3797_v35 = vsub.f32 %v75_v56, %v3775_v8  ;;  %v242_v40 = vand.u32 4294901760, %v3687_v28  ;;  %v220_v60 = vand.u32 4294901760, %v219_v14  ;;  %v225_v63 = vsub.f32 %v3679_v23, %v224_v30 }
  0x63   :  { %5198 = vst [vmem:[#allocation37_spill] sm:$0xff] %v3783_v27  ;;  %5199 = vst [vmem:[#allocation38_spill] sm:$0xff] %v3787_v9  ;;  %v232_v62 = vand.u32 4294901760, %v231_v29  ;;  %v254_v0 = vand.u32 4294901760, %v3692_v36  ;;  %v2915_v13 = vpack.c.bf16 %v230_v7, %v218_v6  ;;  %v237_v41 = vsub.f32 %v3681_v24, %v236_v39 }
  0x64   :  { %5200 = vst [vmem:[#allocation39_spill] sm:$0xff] %v3794_v31  ;;  %5201 = vst [vmem:[#allocation40_spill] sm:$0xff] %v3797_v35  ;;  %v3804_v10 = vand.u32 4294901760, %v3797_v35  ;;  %v243_v1 = vsub.f32 %v3687_v28, %v242_v40  ;;  %2810 = vmatpush1.bf16.msra.mxu1 %v3751_v42  ;;  %2906 = vmatpush1.bf16.msra.mxu0 %v3751_v42  ;;  %v226_v32 = vand.u32 4294901760, %v225_v63  ;;  %v248_v53 = vand.u32 4294901760, %v3697_v38 }
  0x65   :  { %v2819_v56 = vpack.c.bf16 %v232_v62, %v220_v60  ;;  %v2917_v14 = vpack.c.bf16 %v236_v39, %v224_v30  ;;  %v255_v29 = vsub.f32 %v3692_v36, %v254_v0  ;;  %2812 = vmatprep.subr.bf16.mxu1 %v3757_v49  ;;  %2908 = vmatprep.subr.bf16.mxu0 %v3757_v49  ;;  %v238_v7 = vand.u32 4294901760, %v237_v41 }
  0x66   :  { %5202 = vst [vmem:[#allocation41_spill] sm:$0xff] %v3804_v10  ;;  %v208_v6 = vsub.f32 %v3797_v35, %v3804_v10  ;;  %v244_v3 = vand.u32 4294901760, %v243_v1  ;;  %v260_v44 = vand.u32 4294901760, %v3699_v43  ;;  %v266_v60 = vand.u32 4294901760, %v3703_v45 }
  0x67   :  { %v256_v50 = vand.u32 4294901760, %v255_v29  ;;  %v278_v30 = vand.u32 4294901760, %v3705_v46  ;;  %v2919_v62 = vpack.c.bf16 %v254_v0, %v242_v40  ;;  %v249_v63 = vsub.f32 %v3697_v38, %v248_v53 }
  0x68   :  { %v3819_v39 = vand.u32 4294901760, %v208_v6  ;;  %v272_v49 = vand.u32 4294901760, %v3709_v51  ;;  %2814 = vmatpush1.bf16.msra.mxu1 %v3765_v58  ;;  %2910 = vmatpush1.bf16.msra.mxu0 %v3765_v58  ;;  %v2821_v41 = vpack.c.bf16 %v238_v7, %v226_v32  ;;  %v261_v29 = vsub.f32 %v3699_v43, %v260_v44 }
  0x69   :  { %v2823_v1 = vpack.c.bf16 %v256_v50, %v244_v3  ;;  %v284_v35 = vand.u32 4294901760, %v3711_v52  ;;  %2816 = vmatprep.subr.bf16.mxu1 %v3777_v20  ;;  %2912 = vmatprep.subr.bf16.mxu0 %v3777_v20  ;;  %v250_v6 = vand.u32 4294901760, %v249_v63  ;;  %v2921_v0 = vpack.c.bf16 %v260_v44, %v248_v53 }
  0x6a   :  { %5203 = vst [vmem:[#allocation42_spill] sm:$0xff] %v3819_v39  ;;  %v267_v40 = vsub.f32 %v3703_v45, %v266_v60  ;;  %v279_v42 = vsub.f32 %v3705_v46, %v278_v30  ;;  %v262_v37 = vand.u32 4294901760, %v261_v29  ;;  %v2923_v25 = vpack.c.bf16 %v278_v30, %v266_v60 }
  0x6b   :  { %v273_v58 = vsub.f32 %v3709_v51, %v272_v49  ;;  %v285_v50 = vsub.f32 %v3711_v52, %v284_v35  ;;  %v290_v7 = vand.u32 4294901760, %v3717_v55  ;;  %v302_v22 = vand.u32 4294901760, %v3721_v59 }
  0x6c   :  { %v268_v3 = vand.u32 4294901760, %v267_v40  ;;  %v280_v32 = vand.u32 4294901760, %v279_v42  ;;  %2818 = vmatpush1.bf16.msra.mxu1 %v3783_v27  ;;  %2914 = vmatpush1.bf16.msra.mxu0 %v3783_v27  ;;  %v2925_v63 = vpack.c.bf16 %v284_v35, %v272_v49  ;;  %v296_v29 = vand.u32 4294901760, %v3725_v4 }
  0x6d   :  { %v274_v44 = vand.u32 4294901760, %v273_v58  ;;  %v286_v53 = vand.u32 4294901760, %v285_v50  ;;  %2820 = vmatprep.subr.bf16.mxu1 %v2819_v56  ;;  %2916 = vmatprep.subr.bf16.mxu0 %v2915_v13  ;;  %v2825_v60 = vpack.c.bf16 %v262_v37, %v250_v6  ;;  %v291_v30 = vsub.f32 %v3717_v55, %v290_v7 }
  0x6e   :  { %v303_v42 = vsub.f32 %v3721_v59, %v302_v22  ;;  %v308_v40 = vand.u32 4294901760, %v3727_v5  ;;  %v2827_v20 = vpack.c.bf16 %v280_v32, %v268_v3  ;;  %v297_v16 = vsub.f32 %v3725_v4, %v296_v29 }
  0x6f   :  { %v2829_v8 = vpack.c.bf16 %v286_v53, %v274_v44  ;;  %v314_v27 = vand.u32 4294901760, %v3731_v11  ;;  %210 = vmatmul.mubr.f32.vlgmr.msra.gmra.mrb[0].mxu1 %v3819_v39  ;;  %685 = vmatmul.mubr.f32.vlgmr.msra.gmra.mrb[0].mxu0 %v3804_v10  ;;  %v292_v49 = vand.u32 4294901760, %v291_v30  ;;  %v2927_v13 = vpack.c.bf16 %v302_v22, %v290_v7 }
  0x70   :  { %v304_v58 = vand.u32 4294901760, %v303_v42  ;;  %v309_v37 = vsub.f32 %v3727_v5, %v308_v40  ;;  %2822 = vmatpush1.bf16.msra.mxu1 %v2821_v41  ;;  %2918 = vmatpush1.bf16.msra.mxu0 %v2917_v14  ;;  %v298_v35 = vand.u32 4294901760, %v297_v16  ;;  %v326_v6 = vand.u32 4294901760, %v3733_v12 }
  0x71   :  { %v315_v56 = vsub.f32 %v3731_v11, %v314_v27  ;;  %v320_v50 = vand.u32 4294901760, %v3739_v15  ;;  %2824 = vmatprep.subr.bf16.mxu1 %v2823_v1  ;;  %2920 = vmatprep.subr.bf16.mxu0 %v2919_v62  ;;  %v2929_v32 = vpack.c.bf16 %v308_v40, %v296_v29  ;;  %v332_v44 = vand.u32 4294901760, %v3741_v19 }
  0x72   :  { %v310_v3 = vand.u32 4294901760, %v309_v37  ;;  %v338_v53 = vand.u32 4294901760, %v3747_v33  ;;  %v2831_v22 = vpack.c.bf16 %v304_v58, %v292_v49  ;;  %v327_v41 = vsub.f32 %v3733_v12, %v326_v6 }
  0x73   :  { %v316_v7 = vand.u32 4294901760, %v315_v56  ;;  %v321_v16 = vsub.f32 %v3739_v15, %v320_v50  ;;  %v5204_v14 = vmov 0.0   ;;  %v2931_v42 = vpack.c.bf16 %v326_v6, %v314_v27 }
  0x74   :  { %440 = vmatprep.mubr.f32.mxu1 %v5204_v14  ;;  %851 = vmatprep.mubr.f32.mxu0 %v5204_v14  ;;  %v2833_v30 = vpack.c.bf16 %v310_v3, %v298_v35  ;;  %v333_v62 = vsub.f32 %v3741_v19, %v332_v44  ;;  %v339_v1 = vsub.f32 %v3747_v33, %v338_v53  ;;  %v328_v29 = vand.u32 4294901760, %v327_v41 }
  0x75   :  { %2826 = vmatpush1.bf16.msra.mxu1 %v2825_v60  ;;  %2922 = vmatpush1.bf16.msra.mxu0 %v2921_v0  ;;  %v322_v40 = vand.u32 4294901760, %v321_v16  ;;  %v350_v49 = vand.u32 4294901760, %v3749_v34  ;;  %v344_v58 = vand.u32 4294901760, %v3753_v47  ;;  %v2933_v56 = vpack.c.bf16 %v332_v44, %v320_v50 }
  0x76   :  { %2828 = vmatprep.subr.bf16.mxu1 %v2827_v20  ;;  %2924 = vmatprep.subr.bf16.mxu0 %v2923_v25  ;;  %v334_v37 = vand.u32 4294901760, %v333_v62  ;;  %v356_v10 = vand.u32 4294901760, %v3755_v48  ;;  %v362_v27 = vand.u32 4294901760, %v3761_v54  ;;  %v2835_v35 = vpack.c.bf16 %v328_v29, %v316_v7 }
  0x77   :  { %v340_v6 = vand.u32 4294901760, %v339_v1  ;;  %v351_v3 = vsub.f32 %v3749_v34, %v350_v49  ;;  %v345_v0 = vsub.f32 %v3753_v47, %v344_v58  ;;  %v2935_v41 = vpack.c.bf16 %v350_v49, %v338_v53 }
  0x78   :  { %v2837_v60 = vpack.c.bf16 %v334_v37, %v322_v40  ;;  %v357_v16 = vsub.f32 %v3755_v48, %v356_v10  ;;  %v363_v39 = vsub.f32 %v3761_v54, %v362_v27  ;;  %v374_v50 = vand.u32 4294901760, %v3763_v57 }
  0x79   :  { %2830 = vmatpush1.bf16.msra.mxu1 %v2829_v8  ;;  %2926 = vmatpush1.bf16.msra.mxu0 %v2925_v63  ;;  %v352_v25 = vand.u32 4294901760, %v351_v3  ;;  %v346_v20 = vand.u32 4294901760, %v345_v0  ;;  %v368_v44 = vand.u32 4294901760, %v3769_v61  ;;  %v2937_v62 = vpack.c.bf16 %v356_v10, %v344_v58 }
  0x7a   :  { %2832 = vmatprep.subr.bf16.mxu1 %v2831_v22  ;;  %2928 = vmatprep.subr.bf16.mxu0 %v2927_v13  ;;  %v358_v7 = vand.u32 4294901760, %v357_v16  ;;  %v380_v1 = vand.u32 4294901760, %v3771_v2  ;;  %v386_v53 = vand.u32 4294901760, %v3779_v21  ;;  %v364_v40 = vand.u32 4294901760, %v363_v39 }
  0x7b   :  { %v2839_v29 = vpack.c.bf16 %v352_v25, %v340_v6  ;;  %v375_v49 = vsub.f32 %v3763_v57, %v374_v50  ;;  %v369_v8 = vsub.f32 %v3769_v61, %v368_v44  ;;  %v2939_v37 = vpack.c.bf16 %v374_v50, %v362_v27 }
  0x7c   :  { %v2841_v63 = vpack.c.bf16 %v358_v7, %v346_v20  ;;  %v381_v3 = vsub.f32 %v3771_v2, %v380_v1  ;;  %v387_v0 = vsub.f32 %v3779_v21, %v386_v53  ;;  %v398_v22 = vand.u32 4294901760, %v3781_v26 }
  0x7d   :  { %2834 = vmatpush1.bf16.msra.mxu1 %v2833_v30  ;;  %2930 = vmatpush1.bf16.msra.mxu0 %v2929_v32  ;;  %v376_v13 = vand.u32 4294901760, %v375_v49  ;;  %v370_v10 = vand.u32 4294901760, %v369_v8  ;;  %v392_v58 = vand.u32 4294901760, %v3787_v9  ;;  %v3875_v6 = vpack.c.bf16 %v380_v1, %v368_v44  ;;  %v972_v49 = vld [vmem:[#allocation7 + $0x38] sm:$0xff] }
  0x7e   :  { %2836 = vmatprep.subr.bf16.mxu1 %v2835_v35  ;;  %2932 = vmatprep.subr.bf16.mxu0 %v2931_v42  ;;  %v382_v39 = vand.u32 4294901760, %v381_v3  ;;  %v388_v16 = vand.u32 4294901760, %v387_v0  ;;  %v404_v27 = vand.u32 4294901760, %v3794_v31  ;;  %v399_v20 = vsub.f32 %v3781_v26, %v398_v22  ;;  %v968_v0 = vld [vmem:[#allocation7 + $0x18] sm:$0xff]  ;;  %v970_v3 = vld [vmem:[#allocation7 + $0x28] sm:$0xff]  ;;  %v969_v26 = vld [vmem:[#allocation7 + $0x20] sm:$0xff] }
  0x7f   :  { %v2843_v25 = vpack.c.bf16 %v376_v13, %v364_v40  ;;  %v393_v30 = vsub.f32 %v3787_v9, %v392_v58  ;;  %v3882_v7 = vpack.c.bf16 %v398_v22, %v386_v53  ;;  %v1855_v22 = vld [vmem:[#allocation8 + $0x8] sm:$0xff]  ;;  %v1861_v32 = vld [vmem:[#allocation8 + $0x38] sm:$0xff] }
  0x80   :  { %v2845_v50 = vpack.c.bf16 %v382_v39, %v370_v10  ;;  %v405_v35 = vsub.f32 %v3794_v31, %v404_v27  ;;  %v3885_v42 = vpack.c.bf16 %v404_v27, %v392_v58  ;;  %v400_v44 = vand.u32 4294901760, %v399_v20  ;;  %v1857_v58 = vld [vmem:[#allocation8 + $0x18] sm:$0xff]  ;;  %v965_v39 = vld [vmem:[#allocation7] sm:$0xff]  ;;  %v1856_v10 = vld [vmem:[#allocation8 + $0x10] sm:$0xff] }
  0x81   :  { %2838 = vmatpush1.bf16.msra.mxu1 %v2837_v60  ;;  %2934 = vmatpush1.bf16.msra.mxu0 %v2933_v56  ;;  %v394_v1 = vand.u32 4294901760, %v393_v30  ;;  %v966_v60 = vld [vmem:[#allocation7 + $0x8] sm:$0xff]  ;;  %v1001_v30 = vand.u32 4294901760, %v968_v0  ;;  %v999_v56 = vand.u32 4294901760, %v965_v39  ;;  %v1005_v31 = vand.u32 4294901760, %v970_v3 }
  0x82   :  { %2840 = vmatprep.subr.bf16.mxu1 %v2839_v29  ;;  %2936 = vmatprep.subr.bf16.mxu0 %v2935_v41  ;;  %v406_v8 = vand.u32 4294901760, %v405_v35  ;;  %v2847_v13 = vpack.c.bf16 %v400_v44, %v388_v16  ;;  %v967_v35 = vld [vmem:[#allocation7 + $0x10] sm:$0xff]  ;;  %v1854_v44 = vld [vmem:[#allocation8] sm:$0xff]  ;;  %v997_v20 = vand.u32 4294901760, %v966_v60  ;;  %v1886_v29 = vand.u32 4294901760, %v1855_v22 }
  0x83   :  { %v1890_v16 = vand.u32 4294901760, %v1857_v58  ;;  %v1888_v53 = vand.u32 4294901760, %v1854_v44  ;;  %v1892_v41 = vand.u32 4294901760, %v1856_v10 }
  0x84   :  { %v2849_v27 = vpack.c.bf16 %v406_v8, %v394_v1  ;;  %v3917_v40 = vpack.c.bf16 %v1001_v30, %v997_v20  ;;  %v3919_v1 = vsub.f32 %v966_v60, %v997_v20  ;;  %v3921_v8 = vsub.f32 %v968_v0, %v1001_v30 }
  0x85   :  { %2842 = vmatpush1.bf16.msra.mxu1 %v2841_v63  ;;  %2938 = vmatpush1.bf16.msra.mxu0 %v2937_v62  ;;  %v1003_v63 = vand.u32 4294901760, %v967_v35  ;;  %v3926_v21 = vsub.f32 %v1855_v22, %v1886_v29  ;;  %v3928_v62 = vsub.f32 %v1857_v58, %v1890_v16  ;;  %v3933_v60 = vsub.f32 %v965_v39, %v999_v56  ;;  %v974_v39 = vld [vmem:[#allocation7 + $0x48] sm:$0xff] }
  0x86   :  { %2844 = vmatprep.subr.bf16.mxu1 %v2843_v25  ;;  %2940 = vmatprep.subr.bf16.mxu0 %v2939_v37  ;;  %5205 = vst [vmem:[#allocation43_spill] sm:$0xff] %v3917_v40  ;;  %5206 = vst [vmem:[#allocation44_spill] sm:$0xff] %v3921_v8  ;;  %v3923_v25 = vpack.c.bf16 %v1890_v16, %v1886_v29  ;;  %v1859_v37 = vld [vmem:[#allocation8 + $0x28] sm:$0xff]  ;;  %v971_v40 = vld [vmem:[#allocation7 + $0x30] sm:$0xff]  ;;  %v3937_v20 = vpack.c.bf16 %v1892_v41, %v1888_v53  ;;  %v1898_v30 = vand.u32 4294901760, %v1861_v32 }
  0x87   :  { %5208 = vst [vmem:[#allocation46_spill] sm:$0xff] %v3926_v21  ;;  %5209 = vst [vmem:[#allocation47_spill] sm:$0xff] %v3928_v62  ;;  %v3930_v9 = vpack.c.bf16 %v1003_v63, %v999_v56  ;;  %v3935_v0 = vsub.f32 %v967_v35, %v1003_v63  ;;  %v3939_v29 = vsub.f32 %v1854_v44, %v1888_v53  ;;  %v1894_v58 = vand.u32 4294901760, %v1859_v37  ;;  %v1860_v16 = vld [vmem:[#allocation8 + $0x30] sm:$0xff]  ;;  %v976_v35 = vld [vmem:[#allocation7 + $0x58] sm:$0xff] }
  0x88   :  { %5207 = vst [vmem:[#allocation45_spill] sm:$0xff] %v3923_v25  ;;  %5211 = vst [vmem:[#allocation49_spill] sm:$0xff] %v3933_v60  ;;  %v3941_v22 = vsub.f32 %v1856_v10, %v1892_v41  ;;  %v1011_v56 = vand.u32 4294901760, %v971_v40  ;;  %v1863_v63 = vld [vmem:[#allocation8 + $0x48] sm:$0xff]  ;;  %v1865_v44 = vld [vmem:[#allocation8 + $0x58] sm:$0xff] }
  0x89   :  { %2846 = vmatpush1.bf16.msra.mxu1 %v2845_v50  ;;  %2942 = vmatpush1.bf16.msra.mxu0 %v3875_v6  ;;  %5210 = vst [vmem:[#allocation48_spill] sm:$0xff] %v3930_v9  ;;  %5212 = vst [vmem:[#allocation50_spill] sm:$0xff] %v3937_v20  ;;  %v1009_v50 = vand.u32 4294901760, %v972_v49  ;;  %v1858_v6 = vld [vmem:[#allocation8 + $0x20] sm:$0xff]  ;;  %v3950_v53 = vpack.c.bf16 %v1898_v30, %v1894_v58  ;;  %v3952_v10 = vsub.f32 %v1859_v37, %v1894_v58 }
  0x8a   :  { %2848 = vmatprep.subr.bf16.mxu1 %v2847_v13  ;;  %2944 = vmatprep.subr.bf16.mxu0 %v3882_v7  ;;  %5213 = vst [vmem:[#allocation51_spill] sm:$0xff] %v3941_v22  ;;  %v3945_v13 = vsub.f32 %v970_v3, %v1005_v31  ;;  %v1007_v7 = vand.u32 4294901760, %v969_v26  ;;  %v1896_v41 = vand.u32 4294901760, %v1858_v6  ;;  %v973_v22 = vld [vmem:[#allocation7 + $0x40] sm:$0xff]  ;;  %v5220_v3 = vld [vmem:[#allocation19_spill] sm:$0xff]  ;;  %v1013_v37 = vand.u32 4294901760, %v974_v39 }
  0x8b   :  { %v3943_v9 = vpack.c.bf16 %v1009_v50, %v1005_v31  ;;  %v3948_v20 = vsub.f32 %v972_v49, %v1009_v50  ;;  %5217 = vst [vmem:[#allocation55_spill] sm:$0xff] %v3950_v53  ;;  %5218 = vst [vmem:[#allocation56_spill] sm:$0xff] %v3952_v10  ;;  %v5219_v31 = vpack.c.bf16 %v3675_v18, %v3673_v17  ;;  %v1900_v49 = vand.u32 4294901760, %v1860_v16  ;;  %v975_v50 = vld [vmem:[#allocation7 + $0x50] sm:$0xff]  ;;  %v1862_v53 = vld [vmem:[#allocation8 + $0x40] sm:$0xff] }
  0x8c   :  { %5215 = vst [vmem:[#allocation53_spill] sm:$0xff] %v3945_v13  ;;  %v3958_v13 = vsub.f32 %v1861_v32, %v1898_v30  ;;  %v1017_v58 = vand.u32 4294901760, %v976_v35  ;;  %v1902_v10 = vand.u32 4294901760, %v1863_v63  ;;  %v3970_v18 = vsub.f32 %v1858_v6, %v1896_v41  ;;  %v1867_v6 = vld [vmem:[#allocation8 + $0x68] sm:$0xff] }
  0x8d   :  { %5214 = vst [vmem:[#allocation52_spill] sm:$0xff] %v3943_v9  ;;  %2850 = vmatpush1.bf16.msra.mxu1 %v2849_v27  ;;  %2946 = vmatpush1.bf16.msra.mxu0 %v3885_v42  ;;  %5216 = vst [vmem:[#allocation54_spill] sm:$0xff] %v3948_v20  ;;  %v3960_v27 = vpack.c.bf16 %v1011_v56, %v1007_v7  ;;  %v3962_v42 = vsub.f32 %v969_v26, %v1007_v7  ;;  %v5225_v9 = vld [vmem:[#allocation33_spill] sm:$0xff]  ;;  %v1906_v32 = vand.u32 4294901760, %v1865_v44  ;;  %v1864_v26 = vld [vmem:[#allocation8 + $0x50] sm:$0xff] }
  0x8e   :  { %2852 = vmatprep.subr.bf16.mxu1 %v5219_v31  ;;  %2948 = vmatprep.subr.bf16.mxu0 %v5220_v3  ;;  %5221 = vst [vmem:[#allocation19_spill] sm:$0xff] %v3958_v13  ;;  %v3964_v20 = vsub.f32 %v971_v40, %v1011_v56  ;;  %v3968_v17 = vpack.c.bf16 %v1900_v49, %v1896_v41  ;;  %5227 = vst [vmem:[#allocation61_spill] sm:$0xff] %v3970_v18  ;;  %v1015_v30 = vand.u32 4294901760, %v973_v22  ;;  %v5229_v40 = vld [vmem:[#allocation20_spill] sm:$0xff]  ;;  %v5233_v18 = vld [vmem:[#allocation21_spill] sm:$0xff] }
  0x8f   :  { %5222 = vst [vmem:[#allocation57_spill] sm:$0xff] %v3960_v27  ;;  %5223 = vst [vmem:[#allocation58_spill] sm:$0xff] %v3962_v42  ;;  %v5228_v7 = vpack.c.bf16 %v3681_v24, %v3679_v23  ;;  %v3976_v56 = vsub.f32 %v1860_v16, %v1900_v49  ;;  %v3978_v31 = vpack.c.bf16 %v1017_v58, %v1013_v37  ;;  %v978_v42 = vld [vmem:[#allocation7 + $0x68] sm:$0xff]  ;;  %v980_v13 = vld [vmem:[#allocation7 + $0x78] sm:$0xff]  ;;  %v1904_v49 = vand.u32 4294901760, %v1862_v53 }
  0x90   :  { %5224 = vst [vmem:[#allocation59_spill] sm:$0xff] %v3964_v20  ;;  %442 = vmatmul.mubr.f32.vlgmr.msra.gmra.mrb[0].mxu1 %v5225_v9  ;;  %853 = vmatmul.mubr.f32.vlgmr.msra.gmra.mrb[0].mxu0 %v5225_v9  ;;  %5226 = vst [vmem:[#allocation60_spill] sm:$0xff] %v3968_v17  ;;  %v3980_v3 = vsub.f32 %v974_v39, %v1013_v37  ;;  %v1019_v20 = vand.u32 4294901760, %v975_v50  ;;  %v5232_v41 = vpack.c.bf16 %v3692_v36, %v3687_v28  ;;  %v977_v39 = vld [vmem:[#allocation7 + $0x60] sm:$0xff] }
  0x91   :  { %2854 = vmatpush1.bf16.msra.mxu1 %v5228_v7  ;;  %2950 = vmatpush1.bf16.msra.mxu0 %v5229_v40  ;;  %5230 = vst [vmem:[#allocation20_spill] sm:$0xff] %v3978_v31  ;;  %v3986_v23 = vsub.f32 %v976_v35, %v1017_v58  ;;  %v3988_v24 = vpack.c.bf16 %v1906_v32, %v1902_v10  ;;  %v1869_v7 = vld [vmem:[#allocation8 + $0x78] sm:$0xff]  ;;  %v1908_v36 = vand.u32 4294901760, %v1864_v26  ;;  %v979_v35 = vld [vmem:[#allocation7 + $0x70] sm:$0xff] }
  0x92   :  { %5231 = vst [vmem:[#allocation62_spill] sm:$0xff] %v3980_v3  ;;  %2856 = vmatprep.subr.bf16.mxu1 %v5232_v41  ;;  %2952 = vmatprep.subr.bf16.mxu0 %v5233_v18  ;;  %v3990_v16 = vsub.f32 %v1863_v63, %v1902_v10  ;;  %v3994_v37 = vsub.f32 %v1865_v44, %v1906_v32  ;;  %v1021_v18 = vand.u32 4294901760, %v978_v42  ;;  %v1025_v63 = vand.u32 4294901760, %v980_v13 }
  0x93   :  { %5234 = vst [vmem:[#allocation21_spill] sm:$0xff] %v3986_v23  ;;  %5235 = vst [vmem:[#allocation63_spill] sm:$0xff] %v3988_v24  ;;  %576 = vmatprep.mubr.f32.mxu1 %v5204_v14  ;;  %955 = vmatprep.mubr.f32.mxu0 %v5204_v14  ;;  %v3996_v40 = vpack.c.bf16 %v1019_v20, %v1015_v30  ;;  %v3998_v28 = vsub.f32 %v973_v22, %v1015_v30  ;;  %v1910_v10 = vand.u32 4294901760, %v1867_v6  ;;  %v1866_v30 = vld [vmem:[#allocation8 + $0x60] sm:$0xff] }
  0x94   :  { %5236 = vst [vmem:[#allocation64_spill] sm:$0xff] %v3990_v16  ;;  %5237 = vst [vmem:[#allocation65_spill] sm:$0xff] %v3994_v37  ;;  %v4000_v58 = vsub.f32 %v975_v50, %v1019_v20  ;;  %v5241_v41 = vpack.c.bf16 %v3699_v43, %v3697_v38  ;;  %v5242_v16 = vld [vmem:[#allocation22_spill] sm:$0xff]  ;;  %v4006_v23 = vpack.c.bf16 %v1908_v36, %v1904_v49  ;;  %v1914_v32 = vand.u32 4294901760, %v1869_v7  ;;  %v5246_v50 = vld [vmem:[#allocation23_spill] sm:$0xff] }
  0x95   :  { %5238 = vst [vmem:[#allocation66_spill] sm:$0xff] %v3996_v40  ;;  %5239 = vst [vmem:[#allocation67_spill] sm:$0xff] %v3998_v28  ;;  %2954 = vmatpush1.bf16.msra.mxu0 %v5242_v16  ;;  %v4008_v44 = vsub.f32 %v1862_v53, %v1904_v49  ;;  %v1023_v22 = vand.u32 4294901760, %v977_v39  ;;  %v1868_v28 = vld [vmem:[#allocation8 + $0x70] sm:$0xff]  ;;  %v982_v37 = vld [vmem:[#allocation7 + $0x88] sm:$0xff]  ;;  %v5245_v20 = vpack.c.bf16 %v3705_v46, %v3703_v45  ;;  %v1027_v16 = vand.u32 4294901760, %v979_v35 }
  0x96   :  { %5240 = vst [vmem:[#allocation68_spill] sm:$0xff] %v4000_v58  ;;  %2858 = vmatpush1.bf16.msra.mxu1 %v5241_v41  ;;  %5243 = vst [vmem:[#allocation22_spill] sm:$0xff] %v4006_v23  ;;  %2956 = vmatprep.subr.bf16.mxu0 %v5246_v50  ;;  %v4014_v58 = vsub.f32 %v1864_v26, %v1908_v36  ;;  %v4016_v38 = vpack.c.bf16 %v1025_v63, %v1021_v18  ;;  %v984_v53 = vld [vmem:[#allocation7 + $0x98] sm:$0xff]  ;;  %v1871_v49 = vld [vmem:[#allocation8 + $0x88] sm:$0xff]  ;;  %v1912_v36 = vand.u32 4294901760, %v1866_v30 }
  0x97   :  { %5244 = vst [vmem:[#allocation69_spill] sm:$0xff] %v4008_v44  ;;  %2860 = vmatprep.subr.bf16.mxu1 %v5245_v20  ;;  %v4018_v43 = vsub.f32 %v978_v42, %v1021_v18  ;;  %v1873_v41 = vld [vmem:[#allocation8 + $0x98] sm:$0xff]  ;;  %v4020_v44 = vsub.f32 %v980_v13, %v1025_v63  ;;  %v4022_v23 = vpack.c.bf16 %v1914_v32, %v1910_v10  ;;  %v1916_v20 = vand.u32 4294901760, %v1868_v28  ;;  %v981_v42 = vld [vmem:[#allocation7 + $0x80] sm:$0xff] }
  0x98   :  { %5247 = vst [vmem:[#allocation23_spill] sm:$0xff] %v4014_v58  ;;  %5248 = vst [vmem:[#allocation70_spill] sm:$0xff] %v4016_v38  ;;  %v4024_v40 = vsub.f32 %v1867_v6, %v1910_v10  ;;  %v4026_v45 = vsub.f32 %v1869_v7, %v1914_v32  ;;  %v4028_v46 = vpack.c.bf16 %v1027_v16, %v1023_v22  ;;  %v5257_v50 = vld [vmem:[#allocation24_spill] sm:$0xff]  ;;  %v1029_v13 = vand.u32 4294901760, %v982_v37  ;;  %v983_v10 = vld [vmem:[#allocation7 + $0x90] sm:$0xff] }
  0x99   :  { %5249 = vst [vmem:[#allocation71_spill] sm:$0xff] %v4018_v43  ;;  %5250 = vst [vmem:[#allocation72_spill] sm:$0xff] %v4020_v44  ;;  %v4030_v26 = vsub.f32 %v977_v39, %v1023_v22  ;;  %v5256_v18 = vpack.c.bf16 %v3711_v52, %v3709_v51  ;;  %2958 = vmatpush1.bf16.msra.mxu0 %v5257_v50  ;;  %v1033_v63 = vand.u32 4294901760, %v984_v53  ;;  %v1918_v44 = vand.u32 4294901760, %v1871_v49  ;;  %v1870_v7 = vld [vmem:[#allocation8 + $0x80] sm:$0xff]  ;;  %v1872_v52 = vld [vmem:[#allocation8 + $0x90] sm:$0xff] }
  0x9a   :  { %5251 = vst [vmem:[#allocation73_spill] sm:$0xff] %v4022_v23  ;;  %5252 = vst [vmem:[#allocation74_spill] sm:$0xff] %v4024_v40  ;;  %v1922_v6 = vand.u32 4294901760, %v1873_v41  ;;  %v5258_v32 = vpack.c.bf16 %v3721_v59, %v3717_v55  ;;  %v5259_v39 = vld [vmem:[#allocation25_spill] sm:$0xff]  ;;  %v4040_v22 = vsub.f32 %v979_v35, %v1027_v16  ;;  %v4044_v51 = vsub.f32 %v1866_v30, %v1912_v36  ;;  %v988_v50 = vld [vmem:[#allocation7 + $0xb8] sm:$0xff] }
  0x9b   :  { %5253 = vst [vmem:[#allocation75_spill] sm:$0xff] %v4026_v45  ;;  %5254 = vst [vmem:[#allocation76_spill] sm:$0xff] %v4028_v46  ;;  %2862 = vmatpush1.bf16.msra.mxu1 %v5256_v18  ;;  %2960 = vmatprep.subr.bf16.mxu0 %v5259_v39  ;;  %v986_v18 = vld [vmem:[#allocation7 + $0xa8] sm:$0xff]  ;;  %v4046_v45 = vsub.f32 %v1868_v28, %v1916_v20  ;;  %v4048_v40 = vpack.c.bf16 %v1033_v63, %v1029_v13  ;;  %v1031_v58 = vand.u32 4294901760, %v981_v42  ;;  %v1877_v59 = vld [vmem:[#allocation8 + $0xb8] sm:$0xff] }
  0x9c   :  { %5255 = vst [vmem:[#allocation77_spill] sm:$0xff] %v4030_v26  ;;  %2864 = vmatprep.subr.bf16.mxu1 %v5258_v32  ;;  %5260 = vst [vmem:[#allocation24_spill] sm:$0xff] %v4040_v22  ;;  %v4042_v26 = vpack.c.bf16 %v1916_v20, %v1912_v36  ;;  %v4050_v43 = vsub.f32 %v982_v37, %v1029_v13  ;;  %v1875_v55 = vld [vmem:[#allocation8 + $0xa8] sm:$0xff]  ;;  %v4052_v32 = vsub.f32 %v984_v53, %v1033_v63  ;;  %v5272_v53 = vld [vmem:[#allocation27_spill] sm:$0xff] }
  0x9d   :  { %5262 = vst [vmem:[#allocation78_spill] sm:$0xff] %v4044_v51  ;;  %5263 = vst [vmem:[#allocation79_spill] sm:$0xff] %v4046_v45  ;;  %v4054_v35 = vpack.c.bf16 %v1922_v6, %v1918_v44  ;;  %v4056_v16 = vsub.f32 %v1871_v49, %v1918_v44  ;;  %v1035_v30 = vand.u32 4294901760, %v983_v10  ;;  %v5269_v36 = vpack.c.bf16 %v3727_v5, %v3725_v4  ;;  %v5270_v28 = vld [vmem:[#allocation26_spill] sm:$0xff]  ;;  %v985_v4 = vld [vmem:[#allocation7 + $0xa0] sm:$0xff] }
  0x9e   :  { %5261 = vst [vmem:[#allocation25_spill] sm:$0xff] %v4042_v26  ;;  %5264 = vst [vmem:[#allocation80_spill] sm:$0xff] %v4048_v40  ;;  %2962 = vmatpush1.bf16.msra.mxu0 %v5270_v28  ;;  %v1920_v20 = vand.u32 4294901760, %v1870_v7  ;;  %v1924_v39 = vand.u32 4294901760, %v1872_v52  ;;  %v1037_v37 = vand.u32 4294901760, %v986_v18  ;;  %v1041_v13 = vand.u32 4294901760, %v988_v50 }
  0x9f   :  { %5265 = vst [vmem:[#allocation81_spill] sm:$0xff] %v4050_v43  ;;  %5266 = vst [vmem:[#allocation82_spill] sm:$0xff] %v4052_v32  ;;  %2866 = vmatpush1.bf16.msra.mxu1 %v5269_v36  ;;  %v5271_v43 = vpack.c.bf16 %v3733_v12, %v3731_v11  ;;  %2964 = vmatprep.subr.bf16.mxu0 %v5272_v53  ;;  %v4066_v63 = vsub.f32 %v1873_v41, %v1922_v6  ;;  %v1926_v49 = vand.u32 4294901760, %v1875_v55  ;;  %v987_v5 = vld [vmem:[#allocation7 + $0xb0] sm:$0xff]  ;;  %v1874_v36 = vld [vmem:[#allocation8 + $0xa0] sm:$0xff] }
  0xa0   :  { %5267 = vst [vmem:[#allocation83_spill] sm:$0xff] %v4054_v35  ;;  %5268 = vst [vmem:[#allocation84_spill] sm:$0xff] %v4056_v16  ;;  %v4068_v44 = vsub.f32 %v981_v42, %v1031_v58  ;;  %v1930_v16 = vand.u32 4294901760, %v1877_v59  ;;  %v4070_v28 = vpack.c.bf16 %v1035_v30, %v1031_v58  ;;  %v4072_v32 = vsub.f32 %v983_v10, %v1035_v30  ;;  %v1876_v11 = vld [vmem:[#allocation8 + $0xb0] sm:$0xff]  ;;  %v990_v12 = vld [vmem:[#allocation7 + $0xc8] sm:$0xff] }
  0xa1   :  { %2868 = vmatprep.subr.bf16.mxu1 %v5271_v43  ;;  %v4074_v45 = vpack.c.bf16 %v1924_v39, %v1920_v20  ;;  %v4076_v51 = vsub.f32 %v1870_v7, %v1920_v20  ;;  %v992_v43 = vld [vmem:[#allocation7 + $0xd8] sm:$0xff]  ;;  %v4078_v41 = vsub.f32 %v1872_v52, %v1924_v39  ;;  %v4080_v42 = vpack.c.bf16 %v1041_v13, %v1037_v37 }
  0xa2   :  { %5273 = vst [vmem:[#allocation26_spill] sm:$0xff] %v4068_v44  ;;  %5274 = vst [vmem:[#allocation27_spill] sm:$0xff] %v4070_v28  ;;  %v4082_v6 = vsub.f32 %v986_v18, %v1037_v37  ;;  %v4084_v53 = vsub.f32 %v988_v50, %v1041_v13  ;;  %v1879_v44 = vld [vmem:[#allocation8 + $0xc8] sm:$0xff]  ;;  %v5282_v58 = vpack.c.bf16 %v3741_v19, %v3739_v15  ;;  %v5283_v10 = vld [vmem:[#allocation28_spill] sm:$0xff]  ;;  %v1039_v30 = vand.u32 4294901760, %v985_v4 }
  0xa3   :  { %5275 = vst [vmem:[#allocation85_spill] sm:$0xff] %v4072_v32  ;;  %5276 = vst [vmem:[#allocation86_spill] sm:$0xff] %v4074_v45  ;;  %2966 = vmatpush1.bf16.msra.mxu0 %v5283_v10  ;;  %v4090_v7 = vpack.c.bf16 %v1930_v16, %v1926_v49  ;;  %v1043_v20 = vand.u32 4294901760, %v987_v5  ;;  %v5285_v52 = vpack.c.bf16 %v3749_v34, %v3747_v33  ;;  %v5286_v18 = vld [vmem:[#allocation29_spill] sm:$0xff]  ;;  %v1932_v39 = vand.u32 4294901760, %v1876_v11  ;;  %v1881_v15 = vld [vmem:[#allocation8 + $0xd8] sm:$0xff] }
  0xa4   :  { %5277 = vst [vmem:[#allocation87_spill] sm:$0xff] %v4076_v51  ;;  %5278 = vst [vmem:[#allocation88_spill] sm:$0xff] %v4078_v41  ;;  %2870 = vmatpush1.bf16.msra.mxu1 %v5282_v58  ;;  %v1928_v51 = vand.u32 4294901760, %v1874_v36  ;;  %2968 = vmatprep.subr.bf16.mxu0 %v5286_v18  ;;  %v4096_v50 = vsub.f32 %v1875_v55, %v1926_v49  ;;  %v1045_v37 = vand.u32 4294901760, %v990_v12  ;;  %v1049_v13 = vand.u32 4294901760, %v992_v43  ;;  %v989_v19 = vld [vmem:[#allocation7 + $0xc0] sm:$0xff] }
  0xa5   :  { %5279 = vst [vmem:[#allocation89_spill] sm:$0xff] %v4080_v42  ;;  %5280 = vst [vmem:[#allocation90_spill] sm:$0xff] %v4082_v6  ;;  %2872 = vmatprep.subr.bf16.mxu1 %v5285_v52  ;;  %v991_v58 = vld [vmem:[#allocation7 + $0xd0] sm:$0xff]  ;;  %v4098_v10 = vsub.f32 %v1877_v59, %v1930_v16  ;;  %v4102_v6 = vsub.f32 %v985_v4, %v1039_v30  ;;  %v1934_v41 = vand.u32 4294901760, %v1879_v44  ;;  %v1878_v32 = vld [vmem:[#allocation8 + $0xc0] sm:$0xff] }
  0xa6   :  { %5281 = vst [vmem:[#allocation91_spill] sm:$0xff] %v4084_v53  ;;  %5284 = vst [vmem:[#allocation28_spill] sm:$0xff] %v4090_v7  ;;  %v4100_v53 = vpack.c.bf16 %v1043_v20, %v1039_v30  ;;  %v1880_v33 = vld [vmem:[#allocation8 + $0xd0] sm:$0xff]  ;;  %v994_v34 = vld [vmem:[#allocation7 + $0xe8] sm:$0xff]  ;;  %v4104_v52 = vsub.f32 %v987_v5, %v1043_v20  ;;  %v4106_v55 = vpack.c.bf16 %v1932_v39, %v1928_v51  ;;  %v1047_v5 = vand.u32 4294901760, %v989_v19 }
  0xa7   :  { %5287 = vst [vmem:[#allocation29_spill] sm:$0xff] %v4096_v50  ;;  %5288 = vst [vmem:[#allocation92_spill] sm:$0xff] %v4098_v10  ;;  %v4108_v49 = vsub.f32 %v1874_v36, %v1928_v51  ;;  %v4110_v18 = vsub.f32 %v1876_v11, %v1932_v39  ;;  %v996_v50 = vld [vmem:[#allocation7 + $0xf8] sm:$0xff]  ;;  %v5295_v59 = vpack.c.bf16 %v3755_v48, %v3753_v47  ;;  %v5296_v16 = vld [vmem:[#allocation30_spill] sm:$0xff]  ;;  %v1051_v36 = vand.u32 4294901760, %v991_v58 }
  0xa8   :  { %5289 = vst [vmem:[#allocation93_spill] sm:$0xff] %v4100_v53  ;;  %5290 = vst [vmem:[#allocation94_spill] sm:$0xff] %v4102_v6  ;;  %2970 = vmatpush1.bf16.msra.mxu0 %v5296_v16  ;;  %v4116_v4 = vpack.c.bf16 %v1049_v13, %v1045_v37  ;;  %v4118_v30 = vsub.f32 %v990_v12, %v1045_v37  ;;  %v1938_v6 = vand.u32 4294901760, %v1881_v15  ;;  %v5300_v51 = vld [vmem:[#allocation31_spill] sm:$0xff]  ;;  %v1936_v11 = vand.u32 4294901760, %v1878_v32  ;;  %v1883_v47 = vld [vmem:[#allocation8 + $0xe8] sm:$0xff] }
  0xa9   :  { %5291 = vst [vmem:[#allocation95_spill] sm:$0xff] %v4104_v52  ;;  %5292 = vst [vmem:[#allocation96_spill] sm:$0xff] %v4106_v55  ;;  %2874 = vmatpush1.bf16.msra.mxu1 %v5295_v59  ;;  %v5299_v20 = vpack.c.bf16 %v3763_v57, %v3761_v54  ;;  %2972 = vmatprep.subr.bf16.mxu0 %v5300_v51  ;;  %v1940_v39 = vand.u32 4294901760, %v1880_v33  ;;  %v4124_v48 = vsub.f32 %v992_v43, %v1049_v13  ;;  %v1885_v37 = vld [vmem:[#allocation8 + $0xf8] sm:$0xff]  ;;  %v1882_v51 = vld [vmem:[#allocation8 + $0xe0] sm:$0xff] }
  0xaa   :  { %5293 = vst [vmem:[#allocation97_spill] sm:$0xff] %v4108_v49  ;;  %5294 = vst [vmem:[#allocation98_spill] sm:$0xff] %v4110_v18  ;;  %v1053_v18 = vand.u32 4294901760, %v994_v34  ;;  %v4126_v59 = vpack.c.bf16 %v1938_v6, %v1934_v41  ;;  %v4128_v16 = vsub.f32 %v1879_v44, %v1934_v41  ;;  %v1057_v12 = vand.u32 4294901760, %v996_v50  ;;  %v995_v49 = vld [vmem:[#allocation7 + $0xf0] sm:$0xff]  ;;  %v5308_v44 = vld [vmem:[#allocation32_spill] sm:$0xff] }
  0xab   :  { %5297 = vst [vmem:[#allocation30_spill] sm:$0xff] %v4116_v4  ;;  %5298 = vst [vmem:[#allocation99_spill] sm:$0xff] %v4118_v30  ;;  %2876 = vmatprep.subr.bf16.mxu1 %v5299_v20  ;;  %v993_v30 = vld [vmem:[#allocation7 + $0xe0] sm:$0xff]  ;;  %v4130_v52 = vsub.f32 %v1881_v15, %v1938_v6  ;;  %v4132_v54 = vpack.c.bf16 %v1051_v36, %v1047_v5  ;;  %v4134_v57 = vsub.f32 %v989_v19, %v1047_v5  ;;  %v1884_v10 = vld [vmem:[#allocation8 + $0xf0] sm:$0xff] }
  0xac   :  { %5301 = vst [vmem:[#allocation31_spill] sm:$0xff] %v4124_v48  ;;  %5302 = vst [vmem:[#allocation100_spill] sm:$0xff] %v4126_v59  ;;  %v4136_v20 = vsub.f32 %v991_v58, %v1051_v36  ;;  %v5307_v43 = vpack.c.bf16 %v3771_v2, %v3769_v61  ;;  %2974 = vmatpush1.bf16.msra.mxu0 %v5308_v44  ;;  %v4142_v41 = vpack.c.bf16 %v1940_v39, %v1936_v11  ;;  %v5313_v19 = vld [vmem:[#allocation35_spill] sm:$0xff]  ;;  %v5315_v58 = vld [vmem:[#allocation34_spill] sm:$0xff] }
  0xad   :  { %5303 = vst [vmem:[#allocation101_spill] sm:$0xff] %v4130_v52  ;;  %5304 = vst [vmem:[#allocation102_spill] sm:$0xff] %v4132_v54  ;;  %v4144_v13 = vsub.f32 %v1878_v32, %v1936_v11  ;;  %v4146_v6 = vsub.f32 %v1880_v33, %v1940_v39  ;;  %v1942_v15 = vand.u32 4294901760, %v1883_v47  ;;  %v5312_v52 = vld [vmem:[#allocation36_spill] sm:$0xff]  ;;  %2976 = vmatprep.subr.bf16.mxu0 %v5315_v58  ;;  %v1055_v61 = vand.u32 4294901760, %v993_v30 }
  0xae   :  { %5305 = vst [vmem:[#allocation103_spill] sm:$0xff] %v4134_v57  ;;  %5306 = vst [vmem:[#allocation104_spill] sm:$0xff] %v4136_v20  ;;  %2878 = vmatpush1.bf16.msra.mxu1 %v5307_v43  ;;  %v5314_v5 = vpack.c.bf16 %v5312_v52, %v5313_v19  ;;  %v4152_v36 = vpack.c.bf16 %v1057_v12, %v1053_v18  ;;  %v1946_v20 = vand.u32 4294901760, %v1885_v37  ;;  %v1059_v2 = vand.u32 4294901760, %v995_v49  ;;  %v5322_v19 = vld [vmem:[#allocation39_spill] sm:$0xff] }
  0xaf   :  { %5309 = vst [vmem:[#allocation32_spill] sm:$0xff] %v4142_v41  ;;  %5310 = vst [vmem:[#allocation105_spill] sm:$0xff] %v4144_v13  ;;  %v4154_v43 = vsub.f32 %v994_v34, %v1053_v18  ;;  %v1944_v44 = vand.u32 4294901760, %v1882_v51  ;;  %v1948_v57 = vand.u32 4294901760, %v1884_v10  ;;  %v5021_v32 = vand.u32 4294901760, %v3919_v1 }
  0xb0   :  { %5311 = vst [vmem:[#allocation106_spill] sm:$0xff] %v4146_v6  ;;  %2880 = vmatprep.subr.bf16.mxu1 %v5314_v5  ;;  %5316 = vst [vmem:[#allocation36_spill] sm:$0xff] %v4152_v36  ;;  %v4157_v33 = vsub.f32 %v996_v50, %v1057_v12  ;;  %v4159_v11 = vpack.c.bf16 %v1946_v20, %v1942_v15  ;;  %v4161_v39 = vsub.f32 %v1883_v47, %v1942_v15  ;;  %v5323_v5 = vld [vmem:[#allocation38_spill] sm:$0xff]  ;;  %v5325_v6 = vld [vmem:[#allocation37_spill] sm:$0xff] }
  0xb1   :  { %5317 = vst [vmem:[#allocation35_spill] sm:$0xff] %v4154_v43  ;;  %v4163_v52 = vsub.f32 %v1885_v37, %v1946_v20  ;;  %v5324_v58 = vpack.c.bf16 %v5322_v19, %v5323_v5  ;;  %2978 = vmatpush1.bf16.msra.mxu0 %v5325_v6  ;;  %v4169_v34 = vpack.c.bf16 %v1059_v2, %v1055_v61  ;;  %v5020_v50 = vand.u32 4294901760, %v3921_v8  ;;  %v5329_v12 = vld [vmem:[#allocation43_spill] sm:$0xff]  ;;  %v5334_v15 = vld [vmem:[#allocation50_spill] sm:$0xff] }
  0xb2   :  { %5318 = vst [vmem:[#allocation34_spill] sm:$0xff] %v4157_v33  ;;  %5319 = vst [vmem:[#allocation107_spill] sm:$0xff] %v4159_v11  ;;  %v4171_v18 = vsub.f32 %v993_v30, %v1055_v61  ;;  %v4173_v43 = vsub.f32 %v995_v49, %v1059_v2  ;;  %3172 = vmatprep.subr.bf16.mxu0 %v3923_v25  ;;  %v4178_v47 = vpack.c.bf16 %v1948_v57, %v1944_v44  ;;  %v5331_v2 = vld [vmem:[#allocation40_spill] sm:$0xff] }
  0xb3   :  { %5320 = vst [vmem:[#allocation108_spill] sm:$0xff] %v4161_v39  ;;  %5321 = vst [vmem:[#allocation109_spill] sm:$0xff] %v4163_v52  ;;  %2882 = vmatpush1.bf16.msra.mxu1 %v5324_v58  ;;  %v1108_v37 = vsub.f32 %v3919_v1, %v5021_v32  ;;  %v5024_v20 = vand.u32 4294901760, %v3926_v21  ;;  %v5026_v6 = vand.u32 4294901760, %v3928_v62  ;;  %v1120_v49 = vsub.f32 %v3921_v8, %v5020_v50  ;;  %v5332_v50 = vld [vmem:[#allocation51_spill] sm:$0xff]  ;;  %v5333_v30 = vld [vmem:[#allocation48_spill] sm:$0xff] }
  0xb4   :  { %5326 = vst [vmem:[#allocation39_spill] sm:$0xff] %v4169_v34  ;;  %5327 = vst [vmem:[#allocation38_spill] sm:$0xff] %v4171_v18  ;;  %2980 = vmatprep.subr.bf16.mxu1 %v5329_v12  ;;  %957 = vmatmul.mubr.f32.vlgmr.msra.gmra.mrb[0].mxu0 %v5225_v9  ;;  %v5339_v32 = vld [vmem:[#allocation55_spill] sm:$0xff]  ;;  %v4219_v8 = vsub.f32 %v1884_v10, %v1948_v57  ;;  %v5345_v57 = vld [vmem:[#allocation56_spill] sm:$0xff] }
  0xb5   :  { %5328 = vst [vmem:[#allocation37_spill] sm:$0xff] %v4173_v43  ;;  %5330 = vst [vmem:[#allocation110_spill] sm:$0xff] %v4178_v47  ;;  %v1109_v19 = vand.u32 4294901760, %v1108_v37  ;;  %v1997_v5 = vsub.f32 %v3926_v21, %v5024_v20  ;;  %v2009_v58 = vsub.f32 %v3928_v62, %v5026_v6  ;;  %3174 = vmatpush1.bf16.msra.mxu0 %v5334_v15  ;;  %v1121_v61 = vand.u32 4294901760, %v1120_v49  ;;  %v5338_v6 = vld [vmem:[#allocation52_spill] sm:$0xff]  ;;  %v5341_v21 = vld [vmem:[#allocation53_spill] sm:$0xff] }
  0xb6   :  { %579 = vmatmul.mubr.f32.vlgmr.msra.gmra.mrb[0].mxu1 %v5331_v2  ;;  %v5335_v2 = vand.u32 4294901760, %v3933_v60  ;;  %v5336_v37 = vand.u32 4294901760, %v3935_v0  ;;  %v5337_v20 = vand.u32 4294901760, %v3939_v29  ;;  %3176 = vmatprep.subr.bf16.mxu0 %v5339_v32  ;;  %v5340_v49 = vand.u32 4294901760, %v5332_v50  ;;  %5343 = vst [vmem:[#allocation111_spill] sm:$0xff] %v4219_v8 }
  0xb7   :  { %2982 = vmatpush1.bf16.msra.mxu1 %v5333_v30  ;;  %v1998_v30 = vand.u32 4294901760, %v1997_v5  ;;  %v2010_v62 = vand.u32 4294901760, %v2009_v58  ;;  %1093 = vmatprep.mubr.f32.mxu1 %v5204_v14 }
  0xb8   :  { %v1114_v25 = vsub.f32 %v3933_v60, %v5335_v2  ;;  %v1126_v12 = vsub.f32 %v3935_v0, %v5336_v37  ;;  %v2003_v9 = vsub.f32 %v3939_v29, %v5337_v20  ;;  %2984 = vmatprep.subr.bf16.mxu1 %v5338_v6  ;;  %v2015_v15 = vsub.f32 %v5332_v50, %v5340_v49  ;;  %v5344_v49 = vld [vmem:[#allocation54_spill] sm:$0xff] }
  0xb9   :  { %v5036_v2 = vand.u32 4294901760, %v5341_v21  ;;  %v4217_v60 = vsub.f32 %v1882_v51, %v1944_v44  ;;  %v4222_v37 = vpack.c.bf16 %v1121_v61, %v1109_v19  ;;  %1982 = vmatprep.mubr.f32.mxu0 %v5204_v14  ;;  %v5043_v6 = vand.u32 4294901760, %v5344_v49  ;;  %3178 = vmatpush1.bf16.msra.mxu0 %v3968_v17  ;;  %v5346_v44 = vld [vmem:[#allocation19_spill] sm:$0xff]  ;;  %v5347_v19 = vld [vmem:[#allocation58_spill] sm:$0xff] }
  0xba   :  { %v1115_v20 = vand.u32 4294901760, %v1114_v25  ;;  %v1127_v32 = vand.u32 4294901760, %v1126_v12  ;;  %v2004_v5 = vand.u32 4294901760, %v2003_v9  ;;  %v2016_v10 = vand.u32 4294901760, %v2015_v15  ;;  %3180 = vmatprep.subr.bf16.mxu0 %v3988_v24 }
  0xbb   :  { %5342 = vst [vmem:[#allocation53_spill] sm:$0xff] %v4217_v60  ;;  %v1132_v58 = vsub.f32 %v5341_v21, %v5036_v2  ;;  %2986 = vmatpush1.bf16.msra.mxu1 %v3960_v27  ;;  %v5047_v51 = vand.u32 4294901760, %v5345_v57  ;;  %v5049_v61 = vand.u32 4294901760, %v5346_v44  ;;  %v4236_v9 = vpack.c.bf16 %v2010_v62, %v1998_v30  ;;  %v5348_v2 = vld [vmem:[#allocation59_spill] sm:$0xff]  ;;  %v5350_v30 = vld [vmem:[#allocation61_spill] sm:$0xff] }
  0xbc   :  { %2988 = vmatprep.subr.bf16.mxu1 %v3978_v31  ;;  %v1144_v12 = vsub.f32 %v5344_v49, %v5043_v6  ;;  %v5051_v17 = vand.u32 4294901760, %v5348_v2  ;;  %v5349_v31 = vand.u32 4294901760, %v5347_v19  ;;  %v5353_v49 = vand.u32 4294901760, %v3976_v56 }
  0xbd   :  { %v1133_v25 = vand.u32 4294901760, %v1132_v58  ;;  %v2021_v15 = vsub.f32 %v5345_v57, %v5047_v51  ;;  %v2033_v50 = vsub.f32 %v5346_v44, %v5049_v61  ;;  %v5052_v58 = vand.u32 4294901760, %v5350_v30  ;;  %v5351_v51 = vld [vmem:[#allocation66_spill] sm:$0xff] }
  0xbe   :  { %v1138_v62 = vsub.f32 %v5347_v19, %v5349_v31  ;;  %v1145_v24 = vand.u32 4294901760, %v1144_v12  ;;  %v1150_v6 = vsub.f32 %v5348_v2, %v5051_v17  ;;  %v5352_v57 = vld [vmem:[#allocation22_spill] sm:$0xff]  ;;  %v4259_v61 = vpack.c.bf16 %v1127_v32, %v1115_v20 }
  0xbf   :  { %2990 = vmatpush1.bf16.msra.mxu1 %v5351_v51  ;;  %3182 = vmatpush1.bf16.msra.mxu0 %v5352_v57  ;;  %v4261_v44 = vpack.c.bf16 %v2016_v10, %v2004_v5  ;;  %v2022_v31 = vand.u32 4294901760, %v2021_v15  ;;  %v2027_v12 = vsub.f32 %v5350_v30, %v5052_v58  ;;  %v2034_v17 = vand.u32 4294901760, %v2033_v50  ;;  %v5355_v15 = vld [vmem:[#allocation21_spill] sm:$0xff]  ;;  %v5356_v58 = vld [vmem:[#allocation64_spill] sm:$0xff] }
  0xc0   :  { %2992 = vmatprep.subr.bf16.mxu1 %v4016_v38  ;;  %3184 = vmatprep.subr.bf16.mxu0 %v4022_v23  ;;  %v1139_v27 = vand.u32 4294901760, %v1138_v62  ;;  %v2039_v51 = vsub.f32 %v3976_v56, %v5353_v49  ;;  %v5354_v32 = vand.u32 4294901760, %v3980_v3  ;;  %v4274_v5 = vpack.c.bf16 %v1145_v24, %v1133_v25  ;;  %v5357_v50 = vld [vmem:[#allocation65_spill] sm:$0xff] }
  0xc1   :  { %v1151_v10 = vand.u32 4294901760, %v1150_v6  ;;  %v5061_v57 = vand.u32 4294901760, %v5355_v15  ;;  %v5067_v30 = vand.u32 4294901760, %v5356_v58  ;;  %v2028_v38 = vand.u32 4294901760, %v2027_v12  ;;  %v5358_v6 = vld [vmem:[#allocation67_spill] sm:$0xff] }
  0xc2   :  { %v1156_v20 = vsub.f32 %v3980_v3, %v5354_v32  ;;  %v2040_v2 = vand.u32 4294901760, %v2039_v51  ;;  %v5072_v62 = vand.u32 4294901760, %v5357_v50  ;;  %v5074_v25 = vand.u32 4294901760, %v5358_v6  ;;  %v5359_v32 = vld [vmem:[#allocation68_spill] sm:$0xff] }
  0xc3   :  { %2994 = vmatpush1.bf16.msra.mxu1 %v4028_v46  ;;  %3186 = vmatpush1.bf16.msra.mxu0 %v4042_v26  ;;  %v1168_v49 = vsub.f32 %v5355_v15, %v5061_v57  ;;  %v2045_v24 = vsub.f32 %v5356_v58, %v5067_v30  ;;  %v4291_v51 = vpack.c.bf16 %v2034_v17, %v2022_v31  ;;  %v5360_v26 = vld [vmem:[#allocation69_spill] sm:$0xff]  ;;  %v5361_v46 = vld [vmem:[#allocation23_spill] sm:$0xff] }
  0xc4   :  { %v1157_v23 = vand.u32 4294901760, %v1156_v20  ;;  %2996 = vmatprep.subr.bf16.mxu1 %v4048_v40  ;;  %3188 = vmatprep.subr.bf16.mxu0 %v4054_v35  ;;  %v2057_v20 = vsub.f32 %v5357_v50, %v5072_v62  ;;  %v5076_v57 = vand.u32 4294901760, %v5360_v26  ;;  %v5077_v15 = vand.u32 4294901760, %v5361_v46  ;;  %v5363_v50 = vld [vmem:[#allocation71_spill] sm:$0xff] }
  0xc5   :  { %v1169_v3 = vand.u32 4294901760, %v1168_v49  ;;  %v2046_v30 = vand.u32 4294901760, %v2045_v24  ;;  %v1162_v12 = vsub.f32 %v5358_v6, %v5074_v25  ;;  %v5362_v40 = vand.u32 4294901760, %v5359_v32 }
  0xc6   :  { %v2058_v17 = vand.u32 4294901760, %v2057_v20  ;;  %v2051_v31 = vsub.f32 %v5360_v26, %v5076_v57  ;;  %v2063_v62 = vsub.f32 %v5361_v46, %v5077_v15  ;;  %v5088_v49 = vand.u32 4294901760, %v5363_v50  ;;  %v5364_v20 = vld [vmem:[#allocation72_spill] sm:$0xff] }
  0xc7   :  { %v1174_v35 = vsub.f32 %v5359_v32, %v5362_v40  ;;  %2998 = vmatpush1.bf16.msra.mxu1 %v4070_v28  ;;  %3190 = vmatpush1.bf16.msra.mxu0 %v4074_v45  ;;  %v4313_v24 = vpack.c.bf16 %v1151_v10, %v1139_v27  ;;  %v4315_v25 = vpack.c.bf16 %v2040_v2, %v2028_v38  ;;  %v5087_v32 = vand.u32 4294901760, %v5364_v20  ;;  %v5366_v38 = vld [vmem:[#allocation75_spill] sm:$0xff] }
  0xc8   :  { %v4317_v40 = vpack.c.bf16 %v1169_v3, %v1157_v23  ;;  %3000 = vmatprep.subr.bf16.mxu1 %v4080_v42  ;;  %3192 = vmatprep.subr.bf16.mxu0 %v4090_v7  ;;  %v1163_v57 = vand.u32 4294901760, %v1162_v12  ;;  %v2052_v46 = vand.u32 4294901760, %v2051_v31  ;;  %v1180_v28 = vsub.f32 %v5363_v50, %v5088_v49  ;;  %v5365_v3 = vld [vmem:[#allocation74_spill] sm:$0xff]  ;;  %v5367_v7 = vld [vmem:[#allocation77_spill] sm:$0xff]  ;;  %v5369_v49 = vld [vmem:[#allocation79_spill] sm:$0xff] }
  0xc9   :  { %v1175_v15 = vand.u32 4294901760, %v1174_v35  ;;  %v2064_v45 = vand.u32 4294901760, %v2063_v62  ;;  %v1192_v27 = vsub.f32 %v5364_v20, %v5087_v32  ;;  %v5089_v23 = vand.u32 4294901760, %v5365_v3 }
  0xca   :  { %v5095_v2 = vand.u32 4294901760, %v5366_v38  ;;  %v4330_v10 = vpack.c.bf16 %v2058_v17, %v2046_v30  ;;  %v1181_v42 = vand.u32 4294901760, %v1180_v28  ;;  %v5101_v12 = vand.u32 4294901760, %v5367_v7  ;;  %v5368_v30 = vld [vmem:[#allocation78_spill] sm:$0xff] }
  0xcb   :  { %v5102_v35 = vand.u32 4294901760, %v4040_v22  ;;  %3002 = vmatpush1.bf16.msra.mxu1 %v4100_v53  ;;  %3194 = vmatpush1.bf16.msra.mxu0 %v4106_v55  ;;  %v1193_v62 = vand.u32 4294901760, %v1192_v27  ;;  %v2069_v31 = vsub.f32 %v5365_v3, %v5089_v23  ;;  %v5105_v23 = vand.u32 4294901760, %v5369_v49  ;;  %v5370_v55 = vld [vmem:[#allocation81_spill] sm:$0xff] }
  0xcc   :  { %v2081_v32 = vsub.f32 %v5366_v38, %v5095_v2  ;;  %3004 = vmatprep.subr.bf16.mxu1 %v4116_v4  ;;  %3196 = vmatprep.subr.bf16.mxu0 %v4126_v59  ;;  %v1186_v28 = vsub.f32 %v5367_v7, %v5101_v12  ;;  %v5106_v53 = vand.u32 4294901760, %v5370_v55  ;;  %v4353_v3 = vpack.c.bf16 %v1175_v15, %v1163_v57  ;;  %v5373_v15 = vld [vmem:[#allocation84_spill] sm:$0xff] }
  0xcd   :  { %v1198_v27 = vsub.f32 %v4040_v22, %v5102_v35  ;;  %v4355_v2 = vpack.c.bf16 %v2064_v45, %v2052_v46  ;;  %v4357_v17 = vpack.c.bf16 %v1193_v62, %v1181_v42  ;;  %v5371_v59 = vand.u32 4294901760, %v5368_v30  ;;  %v5372_v42 = vld [vmem:[#allocation82_spill] sm:$0xff] }
  0xce   :  { %v2070_v38 = vand.u32 4294901760, %v2069_v31  ;;  %v2082_v12 = vand.u32 4294901760, %v2081_v32  ;;  %v2087_v35 = vsub.f32 %v5369_v49, %v5105_v23  ;;  %v1204_v22 = vsub.f32 %v5370_v55, %v5106_v53 }
  0xcf   :  { %v2075_v4 = vsub.f32 %v5368_v30, %v5371_v59  ;;  %3006 = vmatpush1.bf16.msra.mxu1 %v4132_v54  ;;  %3198 = vmatpush1.bf16.msra.mxu0 %v4142_v41  ;;  %v1187_v45 = vand.u32 4294901760, %v1186_v28  ;;  %v1199_v46 = vand.u32 4294901760, %v1198_v27  ;;  %v5117_v57 = vand.u32 4294901760, %v5372_v42  ;;  %v5374_v27 = vld [vmem:[#allocation26_spill] sm:$0xff]  ;;  %v5375_v54 = vld [vmem:[#allocation85_spill] sm:$0xff] }
  0xd0   :  { %v5118_v59 = vand.u32 4294901760, %v5373_v15  ;;  %3008 = vmatprep.subr.bf16.mxu1 %v4152_v36  ;;  %3200 = vmatprep.subr.bf16.mxu0 %v4159_v11  ;;  %v2088_v62 = vand.u32 4294901760, %v2087_v35  ;;  %v1205_v31 = vand.u32 4294901760, %v1204_v22  ;;  %v5119_v23 = vand.u32 4294901760, %v4066_v63  ;;  %v5377_v11 = vld [vmem:[#allocation88_spill] sm:$0xff] }
  0xd1   :  { %v2076_v32 = vand.u32 4294901760, %v2075_v4  ;;  %v1216_v53 = vsub.f32 %v5372_v42, %v5117_v57  ;;  %v5124_v41 = vand.u32 4294901760, %v5374_v27  ;;  %v4383_v36 = vpack.c.bf16 %v2082_v12, %v2070_v38  ;;  %v5376_v4 = vld [vmem:[#allocation87_spill] sm:$0xff] }
  0xd2   :  { %v2093_v28 = vsub.f32 %v5373_v15, %v5118_v59  ;;  %v2105_v22 = vsub.f32 %v4066_v63, %v5119_v23  ;;  %v5127_v35 = vand.u32 4294901760, %v5376_v4  ;;  %v5378_v38 = vand.u32 4294901760, %v5375_v54 }
  0xd3   :  { %3010 = vmatpush1.bf16.msra.mxu1 %v4169_v34  ;;  %3202 = vmatpush1.bf16.msra.mxu0 %v4178_v47  ;;  %v1217_v57 = vand.u32 4294901760, %v1216_v53  ;;  %v1210_v55 = vsub.f32 %v5374_v27, %v5124_v41  ;;  %v5379_v53 = vand.u32 4294901760, %v5377_v11  ;;  %v5380_v47 = vld [vmem:[#allocation90_spill] sm:$0xff]  ;;  %v4407_v41 = vpack.c.bf16 %v1199_v46, %v1187_v45 }
  0xd4   :  { %v2094_v59 = vand.u32 4294901760, %v2093_v28  ;;  %v1222_v12 = vsub.f32 %v5375_v54, %v5378_v38  ;;  %3012 = vmatprep.subr.bf16.mxu1 %v4222_v37  ;;  %3204 = vmatprep.subr.bf16.mxu0 %v4236_v9  ;;  %v2106_v23 = vand.u32 4294901760, %v2105_v22  ;;  %v2099_v49 = vsub.f32 %v5376_v4, %v5127_v35  ;;  %v5381_v37 = vld [vmem:[#allocation91_spill] sm:$0xff]  ;;  %v5382_v9 = vld [vmem:[#allocation42_spill] sm:$0xff] }
  0xd5   :  { %v2111_v28 = vsub.f32 %v5377_v11, %v5379_v53  ;;  %v5129_v34 = vand.u32 4294901760, %v5380_v47  ;;  %v4409_v27 = vpack.c.bf16 %v2088_v62, %v2076_v32  ;;  %v4411_v38 = vpack.c.bf16 %v1217_v57, %v1205_v31  ;;  %v5383_v57 = vld [vmem:[#allocation29_spill] sm:$0xff]  ;;  %v5384_v62 = vld [vmem:[#allocation92_spill] sm:$0xff] }
  0xd6   :  { %v5130_v54 = vand.u32 4294901760, %v5381_v37  ;;  %1099 = vmatmul.mubr.f32.vlgmr.msra.gmra.mrb[2].mxu1 %v5382_v9  ;;  %1988 = vmatmul.mubr.f32.vlgmr.msra.gmra.mrb[2].mxu0 %v5382_v9  ;;  %v1211_v22 = vand.u32 4294901760, %v1210_v55  ;;  %v1223_v35 = vand.u32 4294901760, %v1222_v12  ;;  %v2100_v4 = vand.u32 4294901760, %v2099_v49  ;;  %v5385_v12 = vld [vmem:[#allocation94_spill] sm:$0xff] }
  0xd7   :  { %v1228_v53 = vsub.f32 %v5380_v47, %v5129_v34  ;;  %3014 = vmatpush1.bf16.msra.mxu1 %v4259_v61  ;;  %3206 = vmatpush1.bf16.msra.mxu0 %v4261_v44  ;;  %v2112_v45 = vand.u32 4294901760, %v2111_v28  ;;  %v5134_v32 = vand.u32 4294901760, %v5383_v57  ;;  %v5133_v31 = vand.u32 4294901760, %v5384_v62  ;;  %v5386_v61 = vld [vmem:[#allocation95_spill] sm:$0xff] }
  0xd8   :  { %v1240_v46 = vsub.f32 %v5381_v37, %v5130_v54  ;;  %3016 = vmatprep.subr.bf16.mxu1 %v4274_v5  ;;  %3208 = vmatprep.subr.bf16.mxu0 %v4291_v51  ;;  %v3219_v55 = vpack.c.bf16 %v2106_v23, %v2094_v59  ;;  %v5136_v9 = vand.u32 4294901760, %v5385_v12  ;;  %v5137_v34 = vand.u32 4294901760, %v5386_v61  ;;  %v5387_v37 = vld [vmem:[#allocation97_spill] sm:$0xff]  ;;  %v5388_v23 = vld [vmem:[#allocation98_spill] sm:$0xff] }
  0xd9   :  { %v1229_v49 = vand.u32 4294901760, %v1228_v53  ;;  %v2117_v28 = vsub.f32 %v5383_v57, %v5134_v32  ;;  %v2129_v54 = vsub.f32 %v5384_v62, %v5133_v31  ;;  %v5138_v47 = vand.u32 4294901760, %v5387_v37  ;;  %1329 = vmatprep.mubr.f32.mxu1 %v5204_v14  ;;  %2218 = vmatprep.mubr.f32.mxu0 %v5204_v14  ;;  %v5389_v53 = vld [vmem:[#allocation99_spill] sm:$0xff] }
  0xda   :  { %v1241_v44 = vand.u32 4294901760, %v1240_v46  ;;  %v1234_v5 = vsub.f32 %v5385_v12, %v5136_v9  ;;  %v1246_v51 = vsub.f32 %v5386_v61, %v5137_v34  ;;  %v5141_v59 = vand.u32 4294901760, %v5388_v23 }
  0xdb   :  { %3018 = vmatpush1.bf16.msra.mxu1 %v4313_v24  ;;  %3210 = vmatpush1.bf16.msra.mxu0 %v4315_v25  ;;  %v3029_v31 = vpack.c.bf16 %v1223_v35, %v1211_v22  ;;  %v3221_v32 = vpack.c.bf16 %v2112_v45, %v2100_v4  ;;  %v2123_v62 = vsub.f32 %v5387_v37, %v5138_v47  ;;  %v2118_v34 = vand.u32 4294901760, %v2117_v28  ;;  %v5392_v28 = vld [vmem:[#allocation103_spill] sm:$0xff] }
  0xdc   :  { %3020 = vmatprep.subr.bf16.mxu1 %v4317_v40  ;;  %3212 = vmatprep.subr.bf16.mxu0 %v4330_v10  ;;  %v3031_v9 = vpack.c.bf16 %v1241_v44, %v1229_v49  ;;  %v2135_v46 = vsub.f32 %v5388_v23, %v5141_v59  ;;  %v5390_v24 = vand.u32 4294901760, %v5389_v53  ;;  %v2130_v35 = vand.u32 4294901760, %v2129_v54  ;;  %v5391_v10 = vld [vmem:[#allocation101_spill] sm:$0xff] }
  0xdd   :  { %v1235_v4 = vand.u32 4294901760, %v1234_v5  ;;  %v5140_v22 = vand.u32 4294901760, %v4124_v48  ;;  %v5144_v45 = vand.u32 4294901760, %v4128_v16  ;;  %v1247_v47 = vand.u32 4294901760, %v1246_v51 }
  0xde   :  { %v1252_v25 = vsub.f32 %v5389_v53, %v5390_v24  ;;  %v2124_v40 = vand.u32 4294901760, %v2123_v62  ;;  %v2136_v37 = vand.u32 4294901760, %v2135_v46  ;;  %v5145_v49 = vand.u32 4294901760, %v5391_v10  ;;  %v5393_v24 = vld [vmem:[#allocation104_spill] sm:$0xff]  ;;  %v5394_v46 = vld [vmem:[#allocation106_spill] sm:$0xff] }
  0xdf   :  { %3022 = vmatpush1.bf16.msra.mxu1 %v4353_v3  ;;  %3214 = vmatpush1.bf16.msra.mxu0 %v4355_v2  ;;  %v1264_v44 = vsub.f32 %v4124_v48, %v5140_v22  ;;  %v2141_v54 = vsub.f32 %v4128_v16, %v5144_v45  ;;  %v5147_v5 = vand.u32 4294901760, %v5392_v28  ;;  %v5149_v51 = vand.u32 4294901760, %v5393_v24 }
  0xe0   :  { %3024 = vmatprep.subr.bf16.mxu1 %v4357_v17  ;;  %3216 = vmatprep.subr.bf16.mxu0 %v4383_v36  ;;  %v1253_v62 = vand.u32 4294901760, %v1252_v25  ;;  %v2153_v3 = vsub.f32 %v5391_v10, %v5145_v49  ;;  %v5150_v2 = vand.u32 4294901760, %v4144_v13  ;;  %v5153_v22 = vand.u32 4294901760, %v5394_v46  ;;  %v5395_v10 = vld [vmem:[#allocation35_spill] sm:$0xff] }
  0xe1   :  { %v1265_v59 = vand.u32 4294901760, %v1264_v44  ;;  %v2142_v48 = vand.u32 4294901760, %v2141_v54  ;;  %v1258_v45 = vsub.f32 %v5392_v28, %v5147_v5  ;;  %v1270_v17 = vsub.f32 %v5393_v24, %v5149_v51 }
  0xe2   :  { %v2154_v36 = vand.u32 4294901760, %v2153_v3  ;;  %v2147_v25 = vsub.f32 %v4144_v13, %v5150_v2  ;;  %v2159_v49 = vsub.f32 %v5394_v46, %v5153_v22  ;;  %v5162_v44 = vand.u32 4294901760, %v5395_v10 }
  0xe3   :  { %3026 = vmatpush1.bf16.msra.mxu1 %v4407_v41  ;;  %3218 = vmatpush1.bf16.msra.mxu0 %v4409_v27  ;;  %v3223_v54 = vpack.c.bf16 %v2130_v35, %v2118_v34  ;;  %v3033_v5 = vpack.c.bf16 %v1247_v47, %v1235_v4  ;;  %v3225_v28 = vpack.c.bf16 %v2136_v37, %v2124_v40  ;;  %v5161_v51 = vand.u32 4294901760, %v4157_v33 }
  0xe4   :  { %3028 = vmatprep.subr.bf16.mxu1 %v4411_v38  ;;  %3220 = vmatprep.subr.bf16.mxu0 %v3219_v55  ;;  %v3035_v3 = vpack.c.bf16 %v1265_v59, %v1253_v62  ;;  %v1259_v2 = vand.u32 4294901760, %v1258_v45  ;;  %v1271_v13 = vand.u32 4294901760, %v1270_v17  ;;  %v1276_v22 = vsub.f32 %v5395_v10, %v5162_v44  ;;  %v5411_v44 = vld [vmem:[#allocation74_spill] sm:$0xff] }
  0xe5   :  { %v3227_v46 = vpack.c.bf16 %v2154_v36, %v2142_v48  ;;  %v1288_v41 = vsub.f32 %v4157_v33, %v5161_v51  ;;  %v5160_v34 = vand.u32 4294901760, %v4161_v39  ;;  %v5159_v47 = vand.u32 4294901760, %v4163_v52 }
  0xe6   :  { %v2148_v27 = vand.u32 4294901760, %v2147_v25  ;;  %v2160_v37 = vand.u32 4294901760, %v2159_v49  ;;  %v5156_v38 = vand.u32 4294901760, %v4171_v18  ;;  %v5155_v55 = vand.u32 4294901760, %v4173_v43 }
  0xe7   :  { %3030 = vmatpush1.bf16.msra.mxu1 %v3029_v31  ;;  %3222 = vmatpush1.bf16.msra.mxu0 %v3221_v32  ;;  %v1277_v59 = vand.u32 4294901760, %v1276_v22  ;;  %v2165_v48 = vsub.f32 %v4161_v39, %v5160_v34  ;;  %v2177_v35 = vsub.f32 %v4163_v52, %v5159_v47  ;;  %v5157_v4 = vand.u32 4294901760, %v4217_v60  ;;  %v5410_v47 = vld [vmem:[#allocation23_spill] sm:$0xff] }
  0xe8   :  { %3032 = vmatprep.subr.bf16.mxu1 %v3031_v9  ;;  %3224 = vmatprep.subr.bf16.mxu0 %v3223_v54  ;;  %v1289_v45 = vand.u32 4294901760, %v1288_v41  ;;  %v1282_v40 = vsub.f32 %v4171_v18, %v5156_v38  ;;  %v1294_v32 = vsub.f32 %v4173_v43, %v5155_v55  ;;  %v5158_v31 = vand.u32 4294901760, %v4219_v8 }
  0xe9   :  { %v2166_v22 = vand.u32 4294901760, %v2165_v48  ;;  %v2178_v49 = vand.u32 4294901760, %v2177_v35  ;;  %v2171_v62 = vsub.f32 %v4217_v60, %v5157_v4  ;;  %v3037_v17 = vpack.c.bf16 %v1271_v13, %v1259_v2  ;;  %v5396_v13 = vld [vmem:[#allocation44_spill] sm:$0xff] }
  0xea   :  { %v2183_v9 = vsub.f32 %v4219_v8, %v5158_v31  ;;  %v3229_v36 = vpack.c.bf16 %v2160_v37, %v2148_v27  ;;  %v1283_v25 = vand.u32 4294901760, %v1282_v40  ;;  %v1295_v54 = vand.u32 4294901760, %v1294_v32  ;;  %v5399_v37 = vld [vmem:[#allocation49_spill] sm:$0xff]  ;;  %v5402_v32 = vld [vmem:[#allocation56_spill] sm:$0xff]  ;;  %v5412_v8 = vld [vmem:[#allocation75_spill] sm:$0xff] }
  0xeb   :  { %3034 = vmatpush1.bf16.msra.mxu1 %v3033_v5  ;;  %3226 = vmatpush1.bf16.msra.mxu0 %v3225_v28  ;;  %v2172_v41 = vand.u32 4294901760, %v2171_v62  ;;  %v3039_v55 = vpack.c.bf16 %v1289_v45, %v1277_v59  ;;  %v3231_v48 = vpack.c.bf16 %v2178_v49, %v2166_v22  ;;  %v3043_v2 = vpack.c.bf16 %v5396_v13, %v3919_v1  ;;  %v5397_v5 = vld [vmem:[#allocation46_spill] sm:$0xff]  ;;  %v5398_v28 = vld [vmem:[#allocation47_spill] sm:$0xff] }
  0xec   :  { %3036 = vmatprep.subr.bf16.mxu1 %v3035_v3  ;;  %3228 = vmatprep.subr.bf16.mxu0 %v3227_v46  ;;  %v2184_v35 = vand.u32 4294901760, %v2183_v9  ;;  %v3041_v38 = vpack.c.bf16 %v1295_v54, %v1283_v25  ;;  %v3235_v27 = vpack.c.bf16 %v5398_v28, %v5397_v5  ;;  %v3045_v40 = vpack.c.bf16 %v3935_v0, %v5399_v37  ;;  %v5400_v46 = vld [vmem:[#allocation51_spill] sm:$0xff]  ;;  %v5401_v59 = vld [vmem:[#allocation54_spill] sm:$0xff]  ;;  %v5407_v25 = vld [vmem:[#allocation21_spill] sm:$0xff] }
  0xed   :  { %v3237_v3 = vpack.c.bf16 %v5400_v46, %v3939_v29  ;;  %v3047_v45 = vpack.c.bf16 %v5401_v59, %v5341_v21  ;;  %v5403_v22 = vld [vmem:[#allocation19_spill] sm:$0xff]  ;;  %v3245_v34 = vpack.c.bf16 %v5410_v47, %v5360_v26  ;;  %v3055_v51 = vpack.c.bf16 %v5364_v20, %v5363_v50 }
  0xee   :  { %v3233_v4 = vpack.c.bf16 %v2184_v35, %v2172_v41  ;;  %v3239_v49 = vpack.c.bf16 %v5403_v22, %v5402_v32  ;;  %v5408_v41 = vld [vmem:[#allocation65_spill] sm:$0xff]  ;;  %v5409_v35 = vld [vmem:[#allocation68_spill] sm:$0xff]  ;;  %v3247_v60 = vpack.c.bf16 %v5412_v8, %v5411_v44  ;;  %v5415_v18 = vand.u32 4294901760, %v5397_v5 }
  0xef   :  { %3038 = vmatpush1.bf16.msra.mxu1 %v3037_v17  ;;  %3230 = vmatpush1.bf16.msra.mxu0 %v3229_v36  ;;  %v5405_v17 = vld [vmem:[#allocation61_spill] sm:$0xff]  ;;  %v5406_v36 = vld [vmem:[#allocation62_spill] sm:$0xff]  ;;  %v3053_v31 = vpack.c.bf16 %v5409_v35, %v5358_v6  ;;  %v5416_v52 = vand.u32 4294901760, %v5398_v28  ;;  %v5419_v10 = vand.u32 4294901760, %v3939_v29  ;;  %v5422_v5 = vand.u32 4294901760, %v5401_v59 }
  0xf0   :  { %3040 = vmatprep.subr.bf16.mxu1 %v3039_v55  ;;  %3232 = vmatprep.subr.bf16.mxu0 %v3231_v48  ;;  %v5404_v55 = vld [vmem:[#allocation59_spill] sm:$0xff]  ;;  %v3241_v9 = vpack.c.bf16 %v3976_v56, %v5405_v17  ;;  %v3051_v54 = vpack.c.bf16 %v5407_v25, %v5406_v36  ;;  %v3243_v48 = vpack.c.bf16 %v5408_v41, %v5356_v58  ;;  %v5426_v29 = vand.u32 4294901760, %v5347_v19 }
  0xf1   :  { %v3049_v62 = vpack.c.bf16 %v5404_v55, %v5347_v19  ;;  %v4565_v39 = vpack.c.bf16 %v5416_v52, %v5415_v18  ;;  %v5423_v52 = vld [vmem:[#allocation33_spill] sm:$0xff]  ;;  %v5425_v18 = vand.u32 4294901760, %v5403_v22  ;;  %v5431_v22 = vand.u32 4294901760, %v5407_v25 }
  0xf2   :  { %v5432_v19 = vand.u32 4294901760, %v5356_v58  ;;  %v5439_v58 = vand.u32 4294901760, %v5363_v50  ;;  %v5440_v25 = vand.u32 4294901760, %v5364_v20  ;;  %v5449_v50 = vand.u32 4294901760, %v5368_v30  ;;  %v5450_v20 = vld [vmem:[#allocation79_spill] sm:$0xff] }
  0xf3   :  { %3042 = vmatpush1.bf16.msra.mxu1 %v3041_v38  ;;  %3234 = vmatpush1.bf16.msra.mxu0 %v3233_v4  ;;  %v5413_v38 = vand.u32 4294901760, %v3919_v1  ;;  %v5414_v4 = vand.u32 4294901760, %v5396_v13  ;;  %v5420_v1 = vand.u32 4294901760, %v5400_v46  ;;  %v5421_v13 = vand.u32 4294901760, %v5341_v21 }
  0xf4   :  { %3044 = vmatprep.subr.bf16.mxu1 %v3043_v2  ;;  %3236 = vmatprep.subr.bf16.mxu0 %v3235_v27  ;;  %v5417_v2 = vand.u32 4294901760, %v5399_v37  ;;  %v5418_v27 = vand.u32 4294901760, %v3935_v0  ;;  %v5424_v0 = vand.u32 4294901760, %v5402_v32  ;;  %v5428_v21 = vand.u32 4294901760, %v5405_v17 }
  0xf5   :  { %v4559_v43 = vpack.c.bf16 %v5414_v4, %v5413_v38  ;;  %v4577_v24 = vpack.c.bf16 %v5420_v1, %v5419_v10  ;;  %v4583_v38 = vpack.c.bf16 %v5422_v5, %v5421_v13  ;;  %v5427_v10 = vand.u32 4294901760, %v5404_v55 }
  0xf6   :  { %v4571_v33 = vpack.c.bf16 %v5418_v27, %v5417_v2  ;;  %1331 = vmatmul.mubr.f32.vlgmr.msra.gmra.mrb[2].mxu1 %v5423_v52  ;;  %2220 = vmatmul.mubr.f32.vlgmr.msra.gmra.mrb[2].mxu0 %v5423_v52  ;;  %v4591_v28 = vpack.c.bf16 %v5425_v18, %v5424_v0  ;;  %v5429_v46 = vand.u32 4294901760, %v3976_v56  ;;  %v5430_v32 = vand.u32 4294901760, %v5406_v36 }
  0xf7   :  { %v4597_v37 = vpack.c.bf16 %v5427_v10, %v5426_v29  ;;  %3046 = vmatpush1.bf16.msra.mxu1 %v3045_v40  ;;  %3238 = vmatpush1.bf16.msra.mxu0 %v3237_v3  ;;  %v5433_v55 = vand.u32 4294901760, %v5408_v41  ;;  %v5434_v17 = vand.u32 4294901760, %v5358_v6  ;;  %v5435_v56 = vand.u32 4294901760, %v5409_v35 }
  0xf8   :  { %v4603_v59 = vpack.c.bf16 %v5429_v46, %v5428_v21  ;;  %v4609_v4 = vpack.c.bf16 %v5431_v22, %v5430_v32  ;;  %3048 = vmatprep.subr.bf16.mxu1 %v3047_v45  ;;  %3240 = vmatprep.subr.bf16.mxu0 %v3239_v49  ;;  %v5436_v40 = vand.u32 4294901760, %v5360_v26  ;;  %v5437_v3 = vand.u32 4294901760, %v5410_v47  ;;  %v5446_v47 = vld [vmem:[#allocation24_spill] sm:$0xff]  ;;  %v5460_v46 = vld [vmem:[#allocation26_spill] sm:$0xff]  ;;  %v5462_v22 = vld [vmem:[#allocation85_spill] sm:$0xff] }
  0xf9   :  { %v4615_v2 = vpack.c.bf16 %v5433_v55, %v5432_v19  ;;  %v4621_v27 = vpack.c.bf16 %v5435_v56, %v5434_v17  ;;  %v4633_v41 = vpack.c.bf16 %v5440_v25, %v5439_v58  ;;  %v5442_v6 = vand.u32 4294901760, %v5411_v44  ;;  %1465 = vmatprep.mubr.f32.mxu1 %v5204_v14  ;;  %2354 = vmatprep.mubr.f32.mxu0 %v5204_v14  ;;  %v5453_v44 = vld [vmem:[#allocation81_spill] sm:$0xff]  ;;  %v5465_v17 = vld [vmem:[#allocation87_spill] sm:$0xff]  ;;  %v5469_v58 = vld [vmem:[#allocation90_spill] sm:$0xff] }
  0xfa   :  { %v4627_v36 = vpack.c.bf16 %v5437_v3, %v5436_v40  ;;  %v5443_v35 = vand.u32 4294901760, %v5412_v8  ;;  %v5445_v26 = vand.u32 4294901760, %v5367_v7  ;;  %v5447_v45 = vand.u32 4294901760, %v5446_v47 }
  0xfb   :  { %5441 = vst [vmem:[#allocation64_spill] sm:$0xff] %v4633_v41  ;;  %v5451_v13 = vand.u32 4294901760, %v5450_v20  ;;  %v5454_v8 = vand.u32 4294901760, %v5453_v44  ;;  %v5455_v0 = vand.u32 4294901760, %v5372_v42  ;;  %v5457_v29 = vand.u32 4294901760, %v5373_v15  ;;  %3050 = vmatpush1.bf16.msra.mxu1 %v3049_v62  ;;  %3242 = vmatpush1.bf16.msra.mxu0 %v3241_v9  ;;  %v5486_v9 = vld [vmem:[#allocation31_spill] sm:$0xff] }
  0xfc   :  { %5438 = vst [vmem:[#allocation58_spill] sm:$0xff] %v4627_v36  ;;  %v4639_v1 = vpack.c.bf16 %v5443_v35, %v5442_v6  ;;  %v4647_v49 = vpack.c.bf16 %v5447_v45, %v5445_v26  ;;  %v5458_v10 = vand.u32 4294901760, %v4066_v63  ;;  %v5461_v32 = vand.u32 4294901760, %v5460_v46  ;;  %v5471_v6 = vld [vmem:[#allocation91_spill] sm:$0xff]  ;;  %3052 = vmatprep.subr.bf16.mxu1 %v3051_v54  ;;  %3244 = vmatprep.subr.bf16.mxu0 %v3243_v48  ;;  %v5498_v54 = vld [vmem:[#allocation105_spill] sm:$0xff] }
  0xfd   :  { %v4653_v5 = vpack.c.bf16 %v5451_v13, %v5449_v50  ;;  %v4659_v18 = vpack.c.bf16 %v5455_v0, %v5454_v8  ;;  %v5463_v19 = vand.u32 4294901760, %v5462_v22  ;;  %v5466_v56 = vand.u32 4294901760, %v5465_v17  ;;  %v5475_v50 = vld [vmem:[#allocation92_spill] sm:$0xff] }
  0xfe   :  { %5444 = vst [vmem:[#allocation67_spill] sm:$0xff] %v4639_v1  ;;  %5448 = vst [vmem:[#allocation69_spill] sm:$0xff] %v4647_v49  ;;  %v4665_v21 = vpack.c.bf16 %v5458_v10, %v5457_v29  ;;  %v5467_v40 = vand.u32 4294901760, %v5377_v11  ;;  %v5470_v25 = vand.u32 4294901760, %v5469_v58  ;;  %v5472_v35 = vand.u32 4294901760, %v5471_v6 }
  0xff   :  { %5452 = vst [vmem:[#allocation71_spill] sm:$0xff] %v4653_v5  ;;  %5456 = vst [vmem:[#allocation72_spill] sm:$0xff] %v4659_v18  ;;  %v4671_v55 = vpack.c.bf16 %v5463_v19, %v5461_v32  ;;  %v5474_v45 = vand.u32 4294901760, %v5383_v57  ;;  %v5476_v13 = vand.u32 4294901760, %v5475_v50  ;;  %v5478_v0 = vand.u32 4294901760, %v5385_v12  ;;  %v5481_v32 = vld [vmem:[#allocation97_spill] sm:$0xff]  ;;  %3054 = vmatpush1.bf16.msra.mxu1 %v3053_v31  ;;  %3246 = vmatpush1.bf16.msra.mxu0 %v3245_v34 }
 0x100   :  { %5459 = vst [vmem:[#allocation77_spill] sm:$0xff] %v4665_v21  ;;  %v4677_v3 = vpack.c.bf16 %v5467_v40, %v5466_v56  ;;  %v4683_v26 = vpack.c.bf16 %v5472_v35, %v5470_v25  ;;  %v5479_v29 = vand.u32 4294901760, %v5386_v61  ;;  %v5482_v19 = vand.u32 4294901760, %v5481_v32  ;;  %3056 = vmatprep.subr.bf16.mxu1 %v3055_v51  ;;  %3248 = vmatprep.subr.bf16.mxu0 %v3247_v60  ;;  %v5520_v51 = vld [vmem:[#allocation45_spill] sm:$0xff] }
 0x101   :  { %5464 = vst [vmem:[#allocation78_spill] sm:$0xff] %v4671_v55  ;;  %v4689_v8 = vpack.c.bf16 %v5476_v13, %v5474_v45  ;;  %v5483_v56 = vand.u32 4294901760, %v5388_v23  ;;  %v5485_v62 = vand.u32 4294901760, %v5389_v53  ;;  %v5487_v25 = vand.u32 4294901760, %v5486_v9  ;;  %v5490_v13 = vld [vmem:[#allocation101_spill] sm:$0xff] }
 0x102   :  { %5468 = vst [vmem:[#allocation82_spill] sm:$0xff] %v4677_v3  ;;  %5473 = vst [vmem:[#allocation84_spill] sm:$0xff] %v4683_v26  ;;  %v4695_v10 = vpack.c.bf16 %v5479_v29, %v5478_v0  ;;  %v5489_v45 = vand.u32 4294901760, %v4128_v16  ;;  %v5491_v52 = vand.u32 4294901760, %v5490_v13  ;;  %v5493_v29 = vld [vmem:[#allocation103_spill] sm:$0xff]  ;;  %v5499_v48 = vand.u32 4294901760, %v5498_v54 }
 0x103   :  { %5477 = vst [vmem:[#allocation88_spill] sm:$0xff] %v4689_v8  ;;  %v4701_v40 = vpack.c.bf16 %v5483_v56, %v5482_v19  ;;  %v4707_v35 = vpack.c.bf16 %v5487_v25, %v5485_v62  ;;  %v5495_v8 = vld [vmem:[#allocation104_spill] sm:$0xff]  ;;  %v5500_v56 = vld [vmem:[#allocation106_spill] sm:$0xff]  ;;  %v5503_v62 = vld [vmem:[#allocation35_spill] sm:$0xff]  ;;  %v3061_v31 = vpack.c.bf16 %v5462_v22, %v5460_v46  ;;  %v3253_v34 = vpack.c.bf16 %v5377_v11, %v5465_v17 }
 0x104   :  { %5480 = vst [vmem:[#allocation42_spill] sm:$0xff] %v4695_v10  ;;  %v4713_v0 = vpack.c.bf16 %v5491_v52, %v5489_v45  ;;  %v5494_v10 = vand.u32 4294901760, %v5493_v29  ;;  %v5496_v26 = vand.u32 4294901760, %v5495_v8  ;;  %v5504_v25 = vand.u32 4294901760, %v5503_v62  ;;  %v5507_v52 = vld [vmem:[#allocation108_spill] sm:$0xff]  ;;  %v5525_v46 = vld [vmem:[#allocation55_spill] sm:$0xff] }
 0x105   :  { %5484 = vst [vmem:[#allocation29_spill] sm:$0xff] %v4701_v40  ;;  %5488 = vst [vmem:[#allocation94_spill] sm:$0xff] %v4707_v35  ;;  %v5501_v40 = vand.u32 4294901760, %v5500_v56  ;;  %v5505_v35 = vld [vmem:[#allocation34_spill] sm:$0xff]  ;;  %v5508_v45 = vand.u32 4294901760, %v5507_v52  ;;  %v3255_v60 = vpack.c.bf16 %v5475_v50, %v5383_v57  ;;  %v3067_v11 = vpack.c.bf16 %v5486_v9, %v5389_v53  ;;  %v5519_v53 = vld [vmem:[#allocation43_spill] sm:$0xff] }
 0x106   :  { %5492 = vst [vmem:[#allocation95_spill] sm:$0xff] %v4713_v0  ;;  %v4719_v19 = vpack.c.bf16 %v5496_v26, %v5494_v10  ;;  %v5506_v55 = vand.u32 4294901760, %v5505_v35  ;;  %v5509_v0 = vld [vmem:[#allocation109_spill] sm:$0xff]  ;;  %v5511_v26 = vld [vmem:[#allocation38_spill] sm:$0xff]  ;;  %v3261_v57 = vpack.c.bf16 %v5500_v56, %v5498_v54  ;;  %v5527_v17 = vld [vmem:[#allocation60_spill] sm:$0xff] }
 0x107   :  { %v4725_v3 = vpack.c.bf16 %v5501_v40, %v5499_v48  ;;  %v5510_v18 = vand.u32 4294901760, %v5509_v0  ;;  %v5512_v10 = vand.u32 4294901760, %v5511_v26  ;;  %v5515_v40 = vld [vmem:[#allocation53_spill] sm:$0xff]  ;;  %v5531_v50 = vld [vmem:[#allocation22_spill] sm:$0xff]  ;;  %v5534_v9 = vld [vmem:[#allocation76_spill] sm:$0xff] }
 0x108   :  { %5497 = vst [vmem:[#allocation98_spill] sm:$0xff] %v4719_v19  ;;  %v4731_v21 = vpack.c.bf16 %v5506_v55, %v5504_v25  ;;  %v5513_v19 = vld [vmem:[#allocation37_spill] sm:$0xff]  ;;  %v5516_v48 = vand.u32 4294901760, %v5515_v40  ;;  %v3057_v55 = vpack.c.bf16 %v5446_v47, %v5367_v7  ;;  %v3251_v25 = vpack.c.bf16 %v4066_v63, %v5373_v15  ;;  %v5522_v47 = vld [vmem:[#allocation48_spill] sm:$0xff] }
 0x109   :  { %5502 = vst [vmem:[#allocation99_spill] sm:$0xff] %v4725_v3  ;;  %v4737_v5 = vpack.c.bf16 %v5510_v18, %v5508_v45  ;;  %v5514_v49 = vand.u32 4294901760, %v5513_v19  ;;  %v5517_v3 = vld [vmem:[#allocation111_spill] sm:$0xff]  ;;  %v3249_v18 = vpack.c.bf16 %v5450_v20, %v5368_v30  ;;  %v3063_v7 = vpack.c.bf16 %v5471_v6, %v5469_v58  ;;  %v5523_v20 = vld [vmem:[#allocation50_spill] sm:$0xff]  ;;  %v5526_v22 = vld [vmem:[#allocation57_spill] sm:$0xff] }
 0x10a   :  { %v5518_v41 = vand.u32 4294901760, %v5517_v3  ;;  %3058 = vmatpush1.bf16.msra.mxu1 %v3057_v55  ;;  %v3065_v63 = vpack.c.bf16 %v5386_v61, %v5385_v12  ;;  %v3257_v30 = vpack.c.bf16 %v5388_v23, %v5481_v32  ;;  %v3069_v15 = vpack.c.bf16 %v5495_v8, %v5493_v29  ;;  %v5529_v58 = vld [vmem:[#allocation63_spill] sm:$0xff]  ;;  %v5530_v6 = vld [vmem:[#allocation66_spill] sm:$0xff]  ;;  %v5533_v32 = vld [vmem:[#allocation73_spill] sm:$0xff] }
 0x10b   :  { %v4743_v1 = vpack.c.bf16 %v5514_v49, %v5512_v10  ;;  %v3059_v49 = vpack.c.bf16 %v5372_v42, %v5453_v44  ;;  %3250 = vmatpush1.bf16.msra.mxu0 %v3249_v18  ;;  %v3259_v42 = vpack.c.bf16 %v5490_v13, %v4128_v16  ;;  %v3071_v12 = vpack.c.bf16 %v5505_v35, %v5503_v62  ;;  %v5524_v44 = vld [vmem:[#allocation52_spill] sm:$0xff]  ;;  %v5532_v8 = vld [vmem:[#allocation70_spill] sm:$0xff]  ;;  %v5535_v35 = vld [vmem:[#allocation25_spill] sm:$0xff] }
 0x10c   :  { %v4749_v36 = vpack.c.bf16 %v5518_v41, %v5516_v48  ;;  %3252 = vmatprep.subr.bf16.mxu0 %v3251_v25  ;;  %v3263_v61 = vpack.c.bf16 %v5509_v0, %v5507_v52  ;;  %v3073_v16 = vpack.c.bf16 %v5513_v19, %v5511_v26  ;;  %v3265_v23 = vpack.c.bf16 %v5517_v3, %v5515_v40  ;;  %v5521_v41 = vld [vmem:[#allocation40_spill] sm:$0xff]  ;;  %v5537_v0 = vld [vmem:[#allocation83_spill] sm:$0xff]  ;;  %v5539_v19 = vld [vmem:[#allocation86_spill] sm:$0xff] }
 0x10d   :  { %3060 = vmatprep.subr.bf16.mxu1 %v3059_v49  ;;  %v5528_v3 = vld [vmem:[#allocation20_spill] sm:$0xff]  ;;  %v5538_v29 = vld [vmem:[#allocation27_spill] sm:$0xff]  ;;  %v5540_v54 = vld [vmem:[#allocation89_spill] sm:$0xff] }
 0x10e   :  { %3062 = vmatpush1.bf16.msra.mxu1 %v3061_v31  ;;  %v5536_v13 = vld [vmem:[#allocation80_spill] sm:$0xff]  ;;  %v5542_v62 = vld [vmem:[#allocation93_spill] sm:$0xff]  ;;  %v5544_v45 = vld [vmem:[#allocation30_spill] sm:$0xff] }
 0x10f   :  { %3254 = vmatpush1.bf16.msra.mxu0 %v3253_v34  ;;  %3064 = vmatprep.subr.bf16.mxu1 %v3063_v7  ;;  %v5541_v56 = vld [vmem:[#allocation28_spill] sm:$0xff]  ;;  %v5546_v10 = vld [vmem:[#allocation102_spill] sm:$0xff]  ;;  %v5549_v55 = vld [vmem:[#allocation107_spill] sm:$0xff] }
 0x110   :  { %3256 = vmatprep.subr.bf16.mxu0 %v3255_v60  ;;  %v5543_v52 = vld [vmem:[#allocation96_spill] sm:$0xff]  ;;  %v5550_v18 = vld [vmem:[#allocation39_spill] sm:$0xff]  ;;  %v5551_v49 = vld [vmem:[#allocation110_spill] sm:$0xff] }
 0x111   :  { %v5545_v26 = vld [vmem:[#allocation100_spill] sm:$0xff]  ;;  %v5552_v25 = vld [vmem:[#allocation41_spill] sm:$0xff]  ;;  %v5564_v31 = vld [vmem:[#allocation42_spill] sm:$0xff] }
 0x112   :  { %3066 = vmatpush1.bf16.msra.mxu1 %v3065_v63  ;;  %v5547_v40 = vld [vmem:[#allocation32_spill] sm:$0xff]  ;;  %v5565_v34 = vld [vmem:[#allocation29_spill] sm:$0xff]  ;;  %v5566_v7 = vld [vmem:[#allocation94_spill] sm:$0xff] }
 0x113   :  { %3258 = vmatpush1.bf16.msra.mxu0 %v3257_v30  ;;  %3068 = vmatprep.subr.bf16.mxu1 %v3067_v11  ;;  %v5548_v48 = vld [vmem:[#allocation36_spill] sm:$0xff]  ;;  %v5567_v60 = vld [vmem:[#allocation95_spill] sm:$0xff]  ;;  %v5568_v63 = vld [vmem:[#allocation98_spill] sm:$0xff] }
 0x114   :  { %3260 = vmatprep.subr.bf16.mxu0 %v3259_v42  ;;  %v5569_v30 = vld [vmem:[#allocation99_spill] sm:$0xff]  ;;  %v5570_v11 = vld [vmem:[#allocation33_spill] sm:$0xff] }
 0x116   :  { %3070 = vmatpush1.bf16.msra.mxu1 %v3069_v15 }
 0x117   :  { %3262 = vmatpush1.bf16.msra.mxu0 %v3261_v57  ;;  %3072 = vmatprep.subr.bf16.mxu1 %v3071_v12 }
 0x118   :  { %3264 = vmatprep.subr.bf16.mxu0 %v3263_v61 }
 0x11a   :  { %3074 = vmatpush1.bf16.msra.mxu1 %v3073_v16 }
 0x11b   :  { %3266 = vmatpush1.bf16.msra.mxu0 %v3265_v23  ;;  %3076 = vmatprep.subr.bf16.mxu1 %v5519_v53 }
 0x11c   :  { %3268 = vmatprep.subr.bf16.mxu0 %v5520_v51 }
 0x11d   :  { %1468 = vmatmul.mubr.f32.vlgmr.msra.gmra.mrb[2].mxu1 %v5521_v41 }
 0x11e   :  { %2357 = vmatmul.mubr.f32.vlgmr.msra.gmra.mrb[2].mxu0 %v5521_v41  ;;  %3078 = vmatpush1.bf16.msra.mxu1 %v5522_v47 }
 0x11f   :  { %3270 = vmatpush1.bf16.msra.mxu0 %v5523_v20  ;;  %3080 = vmatprep.subr.bf16.mxu1 %v5524_v44 }
 0x120   :  { %3272 = vmatprep.subr.bf16.mxu0 %v5525_v46  ;;  %1570 = vmatprep.mubr.f32.mxu1 %v5204_v14 }
 0x121   :  { %2459 = vmatprep.mubr.f32.mxu0 %v5204_v14 }
 0x122   :  { %3082 = vmatpush1.bf16.msra.mxu1 %v5526_v22 }
 0x123   :  { %3274 = vmatpush1.bf16.msra.mxu0 %v5527_v17  ;;  %3084 = vmatprep.subr.bf16.mxu1 %v5528_v3 }
 0x124   :  { %3276 = vmatprep.subr.bf16.mxu0 %v5529_v58 }
 0x126   :  { %3086 = vmatpush1.bf16.msra.mxu1 %v5530_v6 }
 0x127   :  { %3278 = vmatpush1.bf16.msra.mxu0 %v5531_v50  ;;  %3088 = vmatprep.subr.bf16.mxu1 %v5532_v8 }
 0x128   :  { %3280 = vmatprep.subr.bf16.mxu0 %v5533_v32 }
 0x12a   :  { %3090 = vmatpush1.bf16.msra.mxu1 %v5534_v9 }
 0x12b   :  { %3282 = vmatpush1.bf16.msra.mxu0 %v5535_v35  ;;  %3092 = vmatprep.subr.bf16.mxu1 %v5536_v13 }
 0x12c   :  { %3284 = vmatprep.subr.bf16.mxu0 %v5537_v0 }
 0x12e   :  { %3094 = vmatpush1.bf16.msra.mxu1 %v5538_v29 }
 0x12f   :  { %3286 = vmatpush1.bf16.msra.mxu0 %v5539_v19  ;;  %3096 = vmatprep.subr.bf16.mxu1 %v5540_v54 }
 0x130   :  { %3288 = vmatprep.subr.bf16.mxu0 %v5541_v56 }
 0x132   :  { %3098 = vmatpush1.bf16.msra.mxu1 %v5542_v62 }
 0x133   :  { %3290 = vmatpush1.bf16.msra.mxu0 %v5543_v52  ;;  %3100 = vmatprep.subr.bf16.mxu1 %v5544_v45 }
 0x134   :  { %3292 = vmatprep.subr.bf16.mxu0 %v5545_v26 }
 0x136   :  { %3102 = vmatpush1.bf16.msra.mxu1 %v5546_v10 }
 0x137   :  { %3294 = vmatpush1.bf16.msra.mxu0 %v5547_v40  ;;  %3104 = vmatprep.subr.bf16.mxu1 %v5548_v48 }
 0x138   :  { %3296 = vmatprep.subr.bf16.mxu0 %v5549_v55 }
 0x13a   :  { %3106 = vmatpush1.bf16.msra.mxu1 %v5550_v18 }
 0x13b   :  { %3298 = vmatpush1.bf16.msra.mxu0 %v5551_v49  ;;  %3108 = vmatprep.subr.bf16.mxu1 %v4559_v43  ;;  %v5553_v43 = vld [vmem:[#allocation58_spill] sm:$0xff] }
 0x13c   :  { %3300 = vmatprep.subr.bf16.mxu0 %v4565_v39  ;;  %v5555_v39 = vld [vmem:[#allocation67_spill] sm:$0xff] }
 0x13d   :  { %1574 = vmatmul.mubr.f32.vlgmr.msra.gmra.mrb[2].mxu1 %v5552_v25 }
 0x13e   :  { %2463 = vmatmul.mubr.f32.vlgmr.msra.gmra.mrb[2].mxu0 %v5552_v25  ;;  %3110 = vmatpush1.bf16.msra.mxu1 %v4571_v33  ;;  %v5554_v33 = vld [vmem:[#allocation64_spill] sm:$0xff] }
 0x13f   :  { %3302 = vmatpush1.bf16.msra.mxu0 %v4577_v24  ;;  %3112 = vmatprep.subr.bf16.mxu1 %v4583_v38  ;;  %v5556_v24 = vld [vmem:[#allocation69_spill] sm:$0xff]  ;;  %v5557_v38 = vld [vmem:[#allocation71_spill] sm:$0xff] }
 0x140   :  { %3304 = vmatprep.subr.bf16.mxu0 %v4591_v28  ;;  %1740 = vmatprep.mubr.f32.mxu1 %v5204_v14  ;;  %v5558_v28 = vld [vmem:[#allocation72_spill] sm:$0xff] }
 0x141   :  { %2629 = vmatprep.mubr.f32.mxu0 %v5204_v14 }
 0x142   :  { %3114 = vmatpush1.bf16.msra.mxu1 %v4597_v37  ;;  %v5559_v37 = vld [vmem:[#allocation77_spill] sm:$0xff] }
 0x143   :  { %3306 = vmatpush1.bf16.msra.mxu0 %v4603_v59  ;;  %3116 = vmatprep.subr.bf16.mxu1 %v4609_v4  ;;  %v5560_v59 = vld [vmem:[#allocation78_spill] sm:$0xff] }
 0x144   :  { %3308 = vmatprep.subr.bf16.mxu0 %v4615_v2  ;;  %v5561_v4 = vld [vmem:[#allocation82_spill] sm:$0xff]  ;;  %v5562_v2 = vld [vmem:[#allocation84_spill] sm:$0xff] }
 0x146   :  { %3118 = vmatpush1.bf16.msra.mxu1 %v4621_v27  ;;  %v5563_v27 = vld [vmem:[#allocation88_spill] sm:$0xff] }
 0x147   :  { %3310 = vmatpush1.bf16.msra.mxu0 %v5553_v43  ;;  %3120 = vmatprep.subr.bf16.mxu1 %v5554_v33 }
 0x148   :  { %3312 = vmatprep.subr.bf16.mxu0 %v5555_v39 }
 0x14a   :  { %3122 = vmatpush1.bf16.msra.mxu1 %v5556_v24 }
 0x14b   :  { %3314 = vmatpush1.bf16.msra.mxu0 %v5557_v38  ;;  %3124 = vmatprep.subr.bf16.mxu1 %v5558_v28 }
 0x14c   :  { %3316 = vmatprep.subr.bf16.mxu0 %v5559_v37 }
 0x14e   :  { %3126 = vmatpush1.bf16.msra.mxu1 %v5560_v59 }
 0x14f   :  { %3318 = vmatpush1.bf16.msra.mxu0 %v5561_v4  ;;  %3128 = vmatprep.subr.bf16.mxu1 %v5562_v2 }
 0x150   :  { %3320 = vmatprep.subr.bf16.mxu0 %v5563_v27 }
 0x152   :  { %3130 = vmatpush1.bf16.msra.mxu1 %v5564_v31 }
 0x153   :  { %3322 = vmatpush1.bf16.msra.mxu0 %v5565_v34  ;;  %3132 = vmatprep.subr.bf16.mxu1 %v5566_v7 }
 0x154   :  { %3324 = vmatprep.subr.bf16.mxu0 %v5567_v60 }
 0x156   :  { %3134 = vmatpush1.bf16.msra.mxu1 %v5568_v63 }
 0x157   :  { %3326 = vmatpush1.bf16.msra.mxu0 %v5569_v30  ;;  %3136 = vmatprep.subr.bf16.mxu1 %v4731_v21 }
 0x158   :  { %3328 = vmatprep.subr.bf16.mxu0 %v4737_v5 }
 0x15a   :  { %3138 = vmatpush1.bf16.msra.mxu1 %v4743_v1 }
 0x15b   :  { %3330 = vmatpush1.bf16.msra.mxu0 %v4749_v36  ;;  %3140 = vmatprep.subr.bf16.mxu1 %v5519_v53 }
 0x15c   :  { %3332 = vmatprep.subr.bf16.mxu0 %v5520_v51 }
 0x15d   :  { %1742 = vmatmul.mubr.f32.vlgmr.msra.gmra.mrb[2].mxu1 %v5570_v11 }
 0x15e   :  { %2631 = vmatmul.mubr.f32.vlgmr.msra.gmra.mrb[2].mxu0 %v5570_v11  ;;  %3142 = vmatpush1.bf16.msra.mxu1 %v5522_v47 }
 0x15f   :  { %3334 = vmatpush1.bf16.msra.mxu0 %v5523_v20  ;;  %3144 = vmatprep.subr.bf16.mxu1 %v5524_v44 }
 0x160   :  { %3336 = vmatprep.subr.bf16.mxu0 %v5525_v46  ;;  %1844 = vmatprep.mubr.f32.mxu1 %v5204_v14 }
 0x161   :  { %2733 = vmatprep.mubr.f32.mxu0 %v5204_v14 }
 0x162   :  { %3146 = vmatpush1.bf16.msra.mxu1 %v5526_v22 }
 0x163   :  { %3338 = vmatpush1.bf16.msra.mxu0 %v5527_v17  ;;  %3148 = vmatprep.subr.bf16.mxu1 %v5528_v3 }
 0x164   :  { %3340 = vmatprep.subr.bf16.mxu0 %v5529_v58 }
 0x166   :  { %3150 = vmatpush1.bf16.msra.mxu1 %v5530_v6 }
 0x167   :  { %3342 = vmatpush1.bf16.msra.mxu0 %v5531_v50  ;;  %3152 = vmatprep.subr.bf16.mxu1 %v5532_v8 }
 0x168   :  { %3344 = vmatprep.subr.bf16.mxu0 %v5533_v32 }
 0x16a   :  { %3154 = vmatpush1.bf16.msra.mxu1 %v5534_v9 }
 0x16b   :  { %3346 = vmatpush1.bf16.msra.mxu0 %v5535_v35  ;;  %3156 = vmatprep.subr.bf16.mxu1 %v5536_v13 }
 0x16c   :  { %3348 = vmatprep.subr.bf16.mxu0 %v5537_v0 }
 0x16e   :  { %3158 = vmatpush1.bf16.msra.mxu1 %v5538_v29 }
 0x16f   :  { %3350 = vmatpush1.bf16.msra.mxu0 %v5539_v19  ;;  %3160 = vmatprep.subr.bf16.mxu1 %v5540_v54 }
 0x170   :  { %3352 = vmatprep.subr.bf16.mxu0 %v5541_v56 }
 0x172   :  { %3162 = vmatpush1.bf16.msra.mxu1 %v5542_v62 }
 0x173   :  { %3354 = vmatpush1.bf16.msra.mxu0 %v5543_v52  ;;  %3164 = vmatprep.subr.bf16.mxu1 %v5544_v45 }
 0x174   :  { %3356 = vmatprep.subr.bf16.mxu0 %v5545_v26 }
 0x176   :  { %3166 = vmatpush1.bf16.msra.mxu1 %v5546_v10 }
 0x177   :  { %3358 = vmatpush1.bf16.msra.mxu0 %v5547_v40  ;;  %3168 = vmatprep.subr.bf16.mxu1 %v5548_v48 }
 0x178   :  { %3360 = vmatprep.subr.bf16.mxu0 %v5549_v55 }
 0x17a   :  { %3170 = vmatpush1.bf16.msra.mxu1 %v5550_v18 }
 0x17b   :  { %3362 = vmatpush1.bf16.msra.mxu0 %v5551_v49 }
 0x17d   :  { %1846 = vmatmul.mubr.f32.vlgmr.msra.gmra.mrb[2].mxu1 %v5570_v11 }
 0x17e   :  { %2735 = vmatmul.mubr.f32.vlgmr.msra.gmra.mrb[2].mxu0 %v5570_v11 }
 0x187   :  { %v958_v36 = vpop.f32.mrb[0].mxu0 }
 0x188   :  { %v960_v21 = vpop.f32.mrb[1].mxu0 }
 0x189   :  { %v580_v14 = vpop.f32.mrb[0].mxu1 }
 0x18a   :  { %v3363_v1 = vadd.f32 %v958_v36, %v580_v14  ;;  %v582_v5 = vpop.f32.mrb[1].mxu1 }
 0x18b   :  { %v3364_v42 = vadd.f32 %v960_v21, %v582_v5 }
 0x18c   :  { %963 = vst [vmem:[#allocation10] sm:$0xff] %v3363_v1 }
 0x18d   :  { %964 = vst [vmem:[#allocation10 + $0x8] sm:$0xff] %v3364_v42 }
 0x18e   :  { %3502 = shalt.err (!%p3499_p8)
}
 0x18f   :  { %s3503_s23 = scalar_lea.hbm %s4937_s4, 256 }
 0x190   :  { %p3504_p9 = scmp.ne.s32.totalorder %s4937_s4, %s3503_s23  ;;  %p3507_p10 = scmp.lt.u32.totalorder %s3503_s23, %s4937_s4 }
 0x192   :  { %p3509_p11 = pnand %p3507_p10, %p3504_p9 }
 0x194   :  { %3512 = shalt.err (!%p3509_p11)
}
 0x195   :  { %2752 = dma.vmem_to_hbm [thread:$0]  %s2750_s7, 256, %s4937_s4, [#allocation4]  }
 0x196   :  { %s3575_s30 = smov [#allocation11]   ;;  %s3576_s0 = smov [#allocation13]  }
 0x197   :  { %s2759_s9 = sshll.u32 %s3575_s30, 4  ;;  %s2769_s10 = sshll.u32 %s3576_s0, 4  ;;  %s2760_s9 = int_to_ptr.vmem [resolvable:$true] %s2759_s9  ;;  %s2770_s10 = int_to_ptr.vmem [resolvable:$true] %s2769_s10 }
 0x198   :  { %s3513_s11 = scalar_lea.vmem %s2760_s9, 256  ;;  %p3518_p13 = scmp.lt.s32.totalorder %s2760_s9, %s2760_s9 }
 0x199   :  { %p3514_p12 = scmp.ne.s32.totalorder %s2760_s9, %s3513_s11  ;;  %p3519_p0 = scmp.lt.s32.totalorder %s3513_s11, %s3513_s11 }
 0x19b   :  { %p3520_p1 = por %p3519_p0, %p3518_p13 }
 0x19d   :  { %p3521_p2 = pnand %p3520_p1, %p3514_p12 }
 0x250   :  { %v1847_v15 = vpop.f32.mrb[2].mxu1 }
 0x251   :  { %v2736_v57 = vpop.f32.mrb[2].mxu0  ;;  %1852 = vst [vmem:[#allocation11] sm:$0xff] %v1847_v15  ;;  %v1849_v12 = vpop.f32.mrb[3].mxu1 }
 0x252   :  { %2741 = vst [vmem:[#allocation13] sm:$0xff] %v2736_v57  ;;  %v2738_v61 = vpop.f32.mrb[3].mxu0  ;;  %1853 = vst [vmem:[#allocation11 + $0x8] sm:$0xff] %v1849_v12 }
 0x253   :  { %2742 = vst [vmem:[#allocation13 + $0x8] sm:$0xff] %v2738_v61 }
 0x254   :  { %3524 = shalt.err (!%p3521_p2)
}
 0x255   :  { %s3525_s13 = scalar_lea.hbm %s4938_s5, 256 }
 0x256   :  { %p3526_p3 = scmp.ne.s32.totalorder %s4938_s5, %s3525_s13  ;;  %p3529_p4 = scmp.lt.u32.totalorder %s3525_s13, %s4938_s5 }
 0x258   :  { %p3531_p5 = pnand %p3529_p4, %p3526_p3 }
 0x25a   :  { %3534 = shalt.err (!%p3531_p5)
}
 0x25b   :  { %2762 = dma.vmem_to_hbm [thread:$0]  %s2760_s9, 256, %s4938_s5, [#allocation12]  }
 0x25c   :  { %s3535_s21 = scalar_lea.vmem %s2770_s10, 256  ;;  %p3540_p7 = scmp.lt.s32.totalorder %s2770_s10, %s2770_s10 }
 0x25d   :  { %p3536_p6 = scmp.ne.s32.totalorder %s2770_s10, %s3535_s21  ;;  %p3541_p8 = scmp.lt.s32.totalorder %s3535_s21, %s3535_s21 }
 0x25f   :  { %p3542_p9 = por %p3541_p8, %p3540_p7 }
 0x261   :  { %p3543_p10 = pnand %p3542_p9, %p3536_p6 }
 0x263   :  { %3546 = shalt.err (!%p3543_p10)
}
 0x264   :  { %s3547_s3 = scalar_lea.hbm %s4939_s6, 256 }
 0x265   :  { %p3548_p11 = scmp.ne.s32.totalorder %s4939_s6, %s3547_s3  ;;  %p3551_p12 = scmp.lt.u32.totalorder %s3547_s3, %s4939_s6 }
 0x267   :  { %p3553_p13 = pnand %p3551_p12, %p3548_p11 }
 0x269   :  { %3556 = shalt.err (!%p3553_p13)
}
 0x26a   :  { %2772 = dma.vmem_to_hbm [thread:$0]  %s2770_s10, 256, %s4939_s6, [#allocation12]  }
 0x26b   :  { %3563 = dma.done.wait [#allocation4], 256  }
 0x26c   :  { %3564 = vsyncadd [#allocation4], 4294967040 }
 0x26d   :  { %3565 = dma.done.wait [#allocation12], 512  }
 0x26e   :  { %3566 = vsyncadd [#allocation12], 4294966784 }
 0x26f   :  { %2782 = vsyncpa [#allocation3], 1 }
 0x270   :  { %2783 = vsyncpa [#allocation6], 1 }
 0x271   :  { %2784 = vsyncpa [#allocation9], 1 }
 0x272   :  { %2785 = vsyncpa [#allocation4], 1 }
 0x273   :  { %2786 = vsyncpa [#allocation12], 1 }

// kernel: tpu_custom_call.1
= control target key start
LH: loop header
LB: loop body
LE: loop exit
PB: predicated region body
PF: predicated region fallthrough
CT: control target
= control target key end

     0   :  { %12 = vsyncpa [#allocation3], 0  ;;  %s4933_s0 = inlined_call_operand.hbm [shape: f32[8,128], index: 0, kind: input, shape index: {}]   ;;  %s4934_s1 = inlined_call_operand.hbm [shape: f32[128,256], index: 1, kind: input, shape index: {}]   ;;  %s4935_s2 = inlined_call_operand.hbm [shape: f32[128,256], index: 2, kind: input, shape index: {}]   ;;  %s4936_s3 = inlined_call_operand.hbm [shape: f32[128,256], index: 3, kind: input, shape index: {}]   ;;  %s4937_s4 = inlined_call_operand.hbm [shape: f32[8,256], index: 4, kind: output, shape index: {0}]   ;;  %s4938_s5 = inlined_call_operand.hbm [shape: f32[8,256], index: 5, kind: output, shape index: {1}]   ;;  %s4939_s6 = inlined_call_operand.hbm [shape: f32[8,256], index: 6, kind: output, shape index: {2}]  }
   0x1   :  { %13 = vsyncpa [#allocation6], 0 }
   0x2   :  { %14 = vsyncpa [#allocation9], 0 }
   0x3   :  { %15 = vsyncpa [#allocation4], 0 }
   0x4   :  { %16 = vsyncpa [#allocation12], 0  ;;  %s3567_s21 = smov [#allocation5]   ;;  %s3403_s25 = scalar_lea.hbm %s4934_s1, 4096 }
   0x5   :  { %s32_s22 = sshll.u32 %s3567_s21, 4  ;;  %p3404_p0 = scmp.ne.s32.totalorder %s4934_s1, %s3403_s25  ;;  %s33_s22 = int_to_ptr.vmem [resolvable:$true] %s32_s22 }
   0x6   :  { %p3407_p1 = scmp.lt.u32.totalorder %s3403_s25, %s4934_s1 }
   0x8   :  { %p3409_p2 = pnand %p3407_p1, %p3404_p0 }
   0xa   :  { %3412 = shalt.err (!%p3409_p2)
}
   0xb   :  { %s3413_s30 = scalar_lea.vmem %s33_s22, 4096  ;;  %p3418_p4 = scmp.lt.s32.totalorder %s33_s22, %s33_s22 }
   0xc   :  { %p3414_p3 = scmp.ne.s32.totalorder %s33_s22, %s3413_s30  ;;  %p3419_p5 = scmp.lt.s32.totalorder %s3413_s30, %s3413_s30 }
   0xe   :  { %p3420_p6 = por %p3419_p5, %p3418_p4 }
  0x10   :  { %p3421_p7 = pnand %p3420_p6, %p3414_p3 }
  0x12   :  { %3424 = shalt.err (!%p3421_p7)
}
  0x13   :  { %s3568_s7 = smov 256   ;;  %s3569_s8 = smov 16  }
  0x14   :  { %38 = dma.hbm_to_vmem [thread:$0]  %s4934_s1, 4096, %s33_s22, [#allocation6], %s3568_s7, %s3568_s7, %s3569_s8  }
  0x15   :  { %s3570_s11 = smov [#allocation2]   ;;  %s3571_s13 = smov [#allocation7]  }
  0x16   :  { %s23_s12 = sshll.u32 %s3570_s11, 4  ;;  %s44_s14 = sshll.u32 %s3571_s13, 4  ;;  %s24_s12 = int_to_ptr.vmem [resolvable:$true] %s23_s12  ;;  %s45_s14 = int_to_ptr.vmem [resolvable:$true] %s44_s14 }
  0x17   :  { %s3425_s17 = scalar_lea.hbm %s4933_s0, 128 }
  0x18   :  { %p3426_p8 = scmp.ne.s32.totalorder %s4933_s0, %s3425_s17  ;;  %p3429_p9 = scmp.lt.u32.totalorder %s3425_s17, %s4933_s0 }
  0x1a   :  { %p3431_p10 = pnand %p3429_p9, %p3426_p8 }
  0x1c   :  { %3434 = shalt.err (!%p3431_p10)
}
  0x1d   :  { %s3435_s1 = scalar_lea.vmem %s24_s12, 128  ;;  %p3440_p12 = scmp.lt.s32.totalorder %s24_s12, %s24_s12 }
  0x1e   :  { %p3436_p11 = scmp.ne.s32.totalorder %s24_s12, %s3435_s1  ;;  %p3441_p13 = scmp.lt.s32.totalorder %s3435_s1, %s3435_s1 }
  0x20   :  { %p3442_p0 = por %p3441_p13, %p3440_p12 }
  0x22   :  { %p3443_p1 = pnand %p3442_p0, %p3436_p11 }
  0x24   :  { %3446 = shalt.err (!%p3443_p1)
}
  0x25   :  { %26 = dma.hbm_to_vmem [thread:$0]  %s4933_s0, 128, %s24_s12, [#allocation3]  }
  0x26   :  { %s3447_s26 = scalar_lea.hbm %s4935_s2, 4096 }
  0x27   :  { %p3448_p2 = scmp.ne.s32.totalorder %s4935_s2, %s3447_s26  ;;  %p3451_p3 = scmp.lt.u32.totalorder %s3447_s26, %s4935_s2 }
  0x29   :  { %p3453_p4 = pnand %p3451_p3, %p3448_p2 }
  0x2b   :  { %3456 = shalt.err (!%p3453_p4)
}
  0x2c   :  { %s3457_s9 = scalar_lea.vmem %s45_s14, 4096  ;;  %p3462_p6 = scmp.lt.s32.totalorder %s45_s14, %s45_s14 }
  0x2d   :  { %p3458_p5 = scmp.ne.s32.totalorder %s45_s14, %s3457_s9  ;;  %p3463_p7 = scmp.lt.s32.totalorder %s3457_s9, %s3457_s9 }
  0x2f   :  { %p3464_p8 = por %p3463_p7, %p3462_p6 }
  0x31   :  { %p3465_p9 = pnand %p3464_p8, %p3458_p5 }
  0x33   :  { %3468 = shalt.err (!%p3465_p9)
}
  0x34   :  { %50 = dma.hbm_to_vmem [thread:$0]  %s4935_s2, 4096, %s45_s14, [#allocation6], %s3568_s7, %s3568_s7, %s3569_s8  }
  0x35   :  { %s3572_s11 = smov [#allocation8]   ;;  %s3469_s16 = scalar_lea.hbm %s4936_s3, 4096 }
  0x36   :  { %s56_s12 = sshll.u32 %s3572_s11, 4  ;;  %p3470_p10 = scmp.ne.s32.totalorder %s4936_s3, %s3469_s16  ;;  %s57_s12 = int_to_ptr.vmem [resolvable:$true] %s56_s12 }
  0x37   :  { %p3473_p11 = scmp.lt.u32.totalorder %s3469_s16, %s4936_s3 }
  0x39   :  { %p3475_p12 = pnand %p3473_p11, %p3470_p10 }
  0x3b   :  { %3478 = shalt.err (!%p3475_p12)
}
  0x3c   :  { %s3479_s21 = scalar_lea.vmem %s57_s12, 4096  ;;  %p3484_p0 = scmp.lt.s32.totalorder %s57_s12, %s57_s12 }
  0x3d   :  { %p3480_p13 = scmp.ne.s32.totalorder %s57_s12, %s3479_s21  ;;  %p3485_p1 = scmp.lt.s32.totalorder %s3479_s21, %s3479_s21 }
  0x3f   :  { %p3486_p2 = por %p3485_p1, %p3484_p0 }
  0x41   :  { %p3487_p3 = pnand %p3486_p2, %p3480_p13 }
  0x43   :  { %3490 = shalt.err (!%p3487_p3)
}
  0x44   :  { %62 = dma.hbm_to_vmem [thread:$0]  %s4936_s3, 4096, %s57_s12, [#allocation9], %s3568_s7, %s3568_s7, %s3569_s8  }
  0x45   :  { %3557 = dma.done.wait [#allocation3], 128  }
  0x46   :  { %3558 = vsyncadd [#allocation3], 4294967168 }
  0x47   :  { %3559 = dma.done.wait [#allocation6], 8192  }
  0x48   :  { %3560 = vsyncadd [#allocation6], 4294959104 }
  0x49   :  { %3561 = dma.done.wait [#allocation9], 4096  }
  0x4a   :  { %3562 = vsyncadd [#allocation9], 4294963200  ;;  %v4940_v0 = vmov 0.0   ;;  %v77_v1 = vld [vmem:[#allocation5 + $0x8] sm:$0xff]  ;;  %v79_v2 = vld [vmem:[#allocation5 + $0x18] sm:$0xff]  ;;  %s3574_s3 = smov [#allocation10]  }
  0x4b   :  { %204 = vmatprep.mubr.f32.mxu1 %v4940_v0  ;;  %681 = vmatprep.mubr.f32.mxu0 %v4940_v0  ;;  %v76_v3 = vld [vmem:[#allocation5] sm:$0xff]  ;;  %v108_v4 = vand.u32 4294901760, %v77_v1  ;;  %v112_v5 = vand.u32 4294901760, %v79_v2  ;;  %v78_v6 = vld [vmem:[#allocation5 + $0x10] sm:$0xff]  ;;  %v81_v8 = vld [vmem:[#allocation5 + $0x28] sm:$0xff]  ;;  %s2749_s7 = sshll.u32 %s3574_s3, 4  ;;  %s2750_s7 = int_to_ptr.vmem [resolvable:$true] %s2749_s7 }
  0x4c   :  { %v110_v7 = vand.u32 4294901760, %v76_v3  ;;  %v83_v9 = vld [vmem:[#allocation5 + $0x38] sm:$0xff]  ;;  %v114_v10 = vand.u32 4294901760, %v78_v6  ;;  %v116_v11 = vand.u32 4294901760, %v81_v8  ;;  %v80_v13 = vld [vmem:[#allocation5 + $0x20] sm:$0xff]  ;;  %v82_v14 = vld [vmem:[#allocation5 + $0x30] sm:$0xff]  ;;  %p3496_p5 = scmp.lt.s32.totalorder %s2750_s7, %s2750_s7 }
  0x4d   :  { %v120_v12 = vand.u32 4294901760, %v83_v9  ;;  %v85_v15 = vld [vmem:[#allocation5 + $0x48] sm:$0xff]  ;;  %v3671_v16 = vpack.c.bf16 %v112_v5, %v108_v4  ;;  %v3673_v17 = vsub.f32 %v77_v1, %v108_v4  ;;  %v3675_v18 = vsub.f32 %v79_v2, %v112_v5  ;;  %v87_v19 = vld [vmem:[#allocation5 + $0x58] sm:$0xff]  ;;  %v84_v20 = vld [vmem:[#allocation5 + $0x40] sm:$0xff]  ;;  %s3491_s8 = scalar_lea.vmem %s2750_s7, 256 }
  0x4e   :  { %v86_v21 = vld [vmem:[#allocation5 + $0x50] sm:$0xff]  ;;  %v3677_v22 = vpack.c.bf16 %v114_v10, %v110_v7  ;;  %v3679_v23 = vsub.f32 %v76_v3, %v110_v7  ;;  %v3681_v24 = vsub.f32 %v78_v6, %v114_v10  ;;  %v89_v26 = vld [vmem:[#allocation5 + $0x68] sm:$0xff]  ;;  %v91_v27 = vld [vmem:[#allocation5 + $0x78] sm:$0xff]  ;;  %v3687_v28 = vsub.f32 %v81_v8, %v116_v11  ;;  %p3492_p4 = scmp.ne.s32.totalorder %s2750_s7, %s3491_s8  ;;  %p3497_p6 = scmp.lt.s32.totalorder %s3491_s8, %s3491_s8 }
  0x4f   :  { %5180 = vst [vmem:[#allocation19_spill] sm:$0xff] %v3671_v16  ;;  %v3683_v25 = vpack.c.bf16 %v120_v12, %v116_v11  ;;  %2788 = vmatprep.subr.bf16.mxu1 %v3671_v16  ;;  %2884 = vmatprep.subr.bf16.mxu0 %v3671_v16  ;;  %v118_v29 = vand.u32 4294901760, %v80_v13  ;;  %v122_v30 = vand.u32 4294901760, %v82_v14  ;;  %v124_v31 = vand.u32 4294901760, %v85_v15  ;;  %v88_v40 = vld [vmem:[#allocation5 + $0x60] sm:$0xff]  ;;  %v90_v41 = vld [vmem:[#allocation5 + $0x70] sm:$0xff] }
  0x50   :  { %5181 = vst [vmem:[#allocation20_spill] sm:$0xff] %v3677_v22  ;;  %2790 = vmatpush1.bf16.msra.mxu1 %v3677_v22  ;;  %2886 = vmatpush1.bf16.msra.mxu0 %v3677_v22  ;;  %v128_v32 = vand.u32 4294901760, %v87_v19  ;;  %v126_v33 = vand.u32 4294901760, %v84_v20  ;;  %v130_v34 = vand.u32 4294901760, %v86_v21  ;;  %v132_v35 = vand.u32 4294901760, %v89_v26  ;;  %v93_v42 = vld [vmem:[#allocation5 + $0x88] sm:$0xff]  ;;  %p3498_p7 = por %p3497_p6, %p3496_p5 }
  0x51   :  { %5182 = vst [vmem:[#allocation21_spill] sm:$0xff] %v3683_v25  ;;  %2792 = vmatprep.subr.bf16.mxu1 %v3683_v25  ;;  %v3692_v36 = vsub.f32 %v83_v9, %v120_v12  ;;  %2888 = vmatprep.subr.bf16.mxu0 %v3683_v25  ;;  %v3695_v37 = vpack.c.bf16 %v122_v30, %v118_v29  ;;  %v136_v39 = vand.u32 4294901760, %v91_v27  ;;  %v95_v47 = vld [vmem:[#allocation5 + $0x98] sm:$0xff]  ;;  %v92_v48 = vld [vmem:[#allocation5 + $0x80] sm:$0xff]  ;;  %v94_v49 = vld [vmem:[#allocation5 + $0x90] sm:$0xff]  ;;  %v134_v56 = vand.u32 4294901760, %v88_v40 }
  0x52   :  { %v3697_v38 = vsub.f32 %v80_v13, %v118_v29  ;;  %v3699_v43 = vsub.f32 %v82_v14, %v122_v30  ;;  %v3701_v44 = vpack.c.bf16 %v128_v32, %v124_v31  ;;  %v3703_v45 = vsub.f32 %v85_v15, %v124_v31  ;;  %v97_v54 = vld [vmem:[#allocation5 + $0xa8] sm:$0xff]  ;;  %v99_v63 = vld [vmem:[#allocation5 + $0xb8] sm:$0xff]  ;;  %v96_v1 = vld [vmem:[#allocation5 + $0xa0] sm:$0xff]  ;;  %p3499_p8 = pnand %p3498_p7, %p3492_p4 }
  0x53   :  { %5183 = vst [vmem:[#allocation22_spill] sm:$0xff] %v3695_v37  ;;  %v3705_v46 = vsub.f32 %v87_v19, %v128_v32  ;;  %v3707_v50 = vpack.c.bf16 %v130_v34, %v126_v33  ;;  %v3709_v51 = vsub.f32 %v84_v20, %v126_v33  ;;  %v3711_v52 = vsub.f32 %v86_v21, %v130_v34  ;;  %v98_v2 = vld [vmem:[#allocation5 + $0xb0] sm:$0xff]  ;;  %v101_v7 = vld [vmem:[#allocation5 + $0xc8] sm:$0xff]  ;;  %v103_v8 = vld [vmem:[#allocation5 + $0xd8] sm:$0xff] }
  0x54   :  { %5184 = vst [vmem:[#allocation23_spill] sm:$0xff] %v3701_v44  ;;  %v3713_v53 = vpack.c.bf16 %v136_v39, %v132_v35  ;;  %2794 = vmatpush1.bf16.msra.mxu1 %v3695_v37  ;;  %2890 = vmatpush1.bf16.msra.mxu0 %v3695_v37  ;;  %v3717_v55 = vsub.f32 %v89_v26, %v132_v35  ;;  %v138_v57 = vand.u32 4294901760, %v90_v41  ;;  %v140_v58 = vand.u32 4294901760, %v93_v42  ;;  %v100_v9 = vld [vmem:[#allocation5 + $0xc0] sm:$0xff]  ;;  %v102_v14 = vld [vmem:[#allocation5 + $0xd0] sm:$0xff]  ;;  %v105_v31 = vld [vmem:[#allocation5 + $0xe8] sm:$0xff] }
  0x55   :  { %5185 = vst [vmem:[#allocation24_spill] sm:$0xff] %v3707_v50  ;;  %2796 = vmatprep.subr.bf16.mxu1 %v3701_v44  ;;  %2892 = vmatprep.subr.bf16.mxu0 %v3701_v44  ;;  %v3721_v59 = vsub.f32 %v91_v27, %v136_v39  ;;  %v144_v60 = vand.u32 4294901760, %v95_v47  ;;  %v142_v61 = vand.u32 4294901760, %v92_v48  ;;  %v146_v62 = vand.u32 4294901760, %v94_v49  ;;  %v107_v39 = vld [vmem:[#allocation5 + $0xf8] sm:$0xff] }
  0x56   :  { %5186 = vst [vmem:[#allocation25_spill] sm:$0xff] %v3713_v53  ;;  %v3723_v3 = vpack.c.bf16 %v138_v57, %v134_v56  ;;  %v3725_v4 = vsub.f32 %v88_v40, %v134_v56  ;;  %v3727_v5 = vsub.f32 %v90_v41, %v138_v57  ;;  %v148_v6 = vand.u32 4294901760, %v97_v54  ;;  %v104_v40 = vld [vmem:[#allocation5 + $0xe0] sm:$0xff]  ;;  %v106_v41 = vld [vmem:[#allocation5 + $0xf0] sm:$0xff]  ;;  %v75_v56 = vld [vmem:[#allocation2] sm:$0xff] }
  0x57   :  { %v3729_v10 = vpack.c.bf16 %v144_v60, %v140_v58  ;;  %v3731_v11 = vsub.f32 %v93_v42, %v140_v58  ;;  %v3733_v12 = vsub.f32 %v95_v47, %v144_v60  ;;  %v3735_v13 = vpack.c.bf16 %v146_v62, %v142_v61 }
  0x58   :  { %5187 = vst [vmem:[#allocation26_spill] sm:$0xff] %v3723_v3  ;;  %2798 = vmatpush1.bf16.msra.mxu1 %v3707_v50  ;;  %2894 = vmatpush1.bf16.msra.mxu0 %v3707_v50  ;;  %v3739_v15 = vsub.f32 %v92_v48, %v142_v61  ;;  %v3741_v19 = vsub.f32 %v94_v49, %v146_v62  ;;  %v152_v20 = vand.u32 4294901760, %v99_v63  ;;  %v150_v21 = vand.u32 4294901760, %v96_v1 }
  0x59   :  { %5188 = vst [vmem:[#allocation27_spill] sm:$0xff] %v3729_v10  ;;  %5189 = vst [vmem:[#allocation28_spill] sm:$0xff] %v3735_v13  ;;  %2800 = vmatprep.subr.bf16.mxu1 %v3713_v53  ;;  %2896 = vmatprep.subr.bf16.mxu0 %v3713_v53  ;;  %v154_v26 = vand.u32 4294901760, %v98_v2  ;;  %v156_v27 = vand.u32 4294901760, %v101_v7  ;;  %v160_v29 = vand.u32 4294901760, %v103_v8  ;;  %v158_v30 = vand.u32 4294901760, %v100_v9 }
  0x5a   :  { %v3745_v32 = vpack.c.bf16 %v152_v20, %v148_v6  ;;  %v3747_v33 = vsub.f32 %v97_v54, %v148_v6  ;;  %v3749_v34 = vsub.f32 %v99_v63, %v152_v20  ;;  %v162_v35 = vand.u32 4294901760, %v102_v14 }
  0x5b   :  { %v3751_v42 = vpack.c.bf16 %v154_v26, %v150_v21  ;;  %v3753_v47 = vsub.f32 %v96_v1, %v150_v21  ;;  %v3755_v48 = vsub.f32 %v98_v2, %v154_v26  ;;  %v3757_v49 = vpack.c.bf16 %v160_v29, %v156_v27 }
  0x5c   :  { %5190 = vst [vmem:[#allocation29_spill] sm:$0xff] %v3745_v32  ;;  %2802 = vmatpush1.bf16.msra.mxu1 %v3723_v3  ;;  %2898 = vmatpush1.bf16.msra.mxu0 %v3723_v3  ;;  %v3761_v54 = vsub.f32 %v101_v7, %v156_v27  ;;  %v3763_v57 = vsub.f32 %v103_v8, %v160_v29  ;;  %v164_v60 = vand.u32 4294901760, %v105_v31  ;;  %v168_v62 = vand.u32 4294901760, %v107_v39 }
  0x5d   :  { %5191 = vst [vmem:[#allocation30_spill] sm:$0xff] %v3751_v42  ;;  %5192 = vst [vmem:[#allocation31_spill] sm:$0xff] %v3757_v49  ;;  %v3765_v58 = vpack.c.bf16 %v162_v35, %v158_v30  ;;  %2804 = vmatprep.subr.bf16.mxu1 %v3729_v10  ;;  %2900 = vmatprep.subr.bf16.mxu0 %v3729_v10  ;;  %v3769_v61 = vsub.f32 %v100_v9, %v158_v30  ;;  %v166_v63 = vand.u32 4294901760, %v104_v40 }
  0x5e   :  { %v170_v1 = vand.u32 4294901760, %v106_v41  ;;  %v3771_v2 = vsub.f32 %v102_v14, %v162_v35  ;;  %v218_v6 = vand.u32 4294901760, %v3673_v17  ;;  %v230_v7 = vand.u32 4294901760, %v3675_v18 }
  0x5f   :  { %5193 = vst [vmem:[#allocation32_spill] sm:$0xff] %v3765_v58  ;;  %v3775_v8 = vand.u32 4294901760, %v75_v56  ;;  %v3777_v20 = vpack.c.bf16 %v168_v62, %v164_v60  ;;  %v3779_v21 = vsub.f32 %v105_v31, %v164_v60  ;;  %v3781_v26 = vsub.f32 %v107_v39, %v168_v62 }
  0x60   :  { %v3783_v27 = vpack.c.bf16 %v170_v1, %v166_v63  ;;  %2806 = vmatpush1.bf16.msra.mxu1 %v3735_v13  ;;  %2902 = vmatpush1.bf16.msra.mxu0 %v3735_v13  ;;  %v3787_v9 = vsub.f32 %v104_v40, %v166_v63  ;;  %v219_v14 = vsub.f32 %v3673_v17, %v218_v6  ;;  %v224_v30 = vand.u32 4294901760, %v3679_v23 }
  0x61   :  { %5194 = vst [vmem:[#allocation33_spill] sm:$0xff] %v3775_v8  ;;  %5195 = vst [vmem:[#allocation34_spill] sm:$0xff] %v3777_v20  ;;  %v231_v29 = vsub.f32 %v3675_v18, %v230_v7  ;;  %2808 = vmatprep.subr.bf16.mxu1 %v3745_v32  ;;  %2904 = vmatprep.subr.bf16.mxu0 %v3745_v32  ;;  %v3794_v31 = vsub.f32 %v106_v41, %v170_v1  ;;  %v236_v39 = vand.u32 4294901760, %v3681_v24 }
  0x62   :  { %5196 = vst [vmem:[#allocation35_spill] sm:$0xff] %v3779_v21  ;;  %5197 = vst [vmem:[#allocation36_spill] sm:$0xff] %v3781_v26  ;;  %v3797_v35 = vsub.f32 %v75_v56, %v3775_v8  ;;  %v242_v40 = vand.u32 4294901760, %v3687_v28  ;;  %v220_v60 = vand.u32 4294901760, %v219_v14  ;;  %v225_v63 = vsub.f32 %v3679_v23, %v224_v30 }
  0x63   :  { %5198 = vst [vmem:[#allocation37_spill] sm:$0xff] %v3783_v27  ;;  %5199 = vst [vmem:[#allocation38_spill] sm:$0xff] %v3787_v9  ;;  %v232_v62 = vand.u32 4294901760, %v231_v29  ;;  %v254_v0 = vand.u32 4294901760, %v3692_v36  ;;  %v2915_v13 = vpack.c.bf16 %v230_v7, %v218_v6  ;;  %v237_v41 = vsub.f32 %v3681_v24, %v236_v39 }
  0x64   :  { %5200 = vst [vmem:[#allocation39_spill] sm:$0xff] %v3794_v31  ;;  %5201 = vst [vmem:[#allocation40_spill] sm:$0xff] %v3797_v35  ;;  %v3804_v10 = vand.u32 4294901760, %v3797_v35  ;;  %v243_v1 = vsub.f32 %v3687_v28, %v242_v40  ;;  %2810 = vmatpush1.bf16.msra.mxu1 %v3751_v42  ;;  %2906 = vmatpush1.bf16.msra.mxu0 %v3751_v42  ;;  %v226_v32 = vand.u32 4294901760, %v225_v63  ;;  %v248_v53 = vand.u32 4294901760, %v3697_v38 }
  0x65   :  { %v2819_v56 = vpack.c.bf16 %v232_v62, %v220_v60  ;;  %v2917_v14 = vpack.c.bf16 %v236_v39, %v224_v30  ;;  %v255_v29 = vsub.f32 %v3692_v36, %v254_v0  ;;  %2812 = vmatprep.subr.bf16.mxu1 %v3757_v49  ;;  %2908 = vmatprep.subr.bf16.mxu0 %v3757_v49  ;;  %v238_v7 = vand.u32 4294901760, %v237_v41 }
  0x66   :  { %5202 = vst [vmem:[#allocation41_spill] sm:$0xff] %v3804_v10  ;;  %v208_v6 = vsub.f32 %v3797_v35, %v3804_v10  ;;  %v244_v3 = vand.u32 4294901760, %v243_v1  ;;  %v260_v44 = vand.u32 4294901760, %v3699_v43  ;;  %v266_v60 = vand.u32 4294901760, %v3703_v45 }
  0x67   :  { %v256_v50 = vand.u32 4294901760, %v255_v29  ;;  %v278_v30 = vand.u32 4294901760, %v3705_v46  ;;  %v2919_v62 = vpack.c.bf16 %v254_v0, %v242_v40  ;;  %v249_v63 = vsub.f32 %v3697_v38, %v248_v53 }
  0x68   :  { %v3819_v39 = vand.u32 4294901760, %v208_v6  ;;  %v272_v49 = vand.u32 4294901760, %v3709_v51  ;;  %2814 = vmatpush1.bf16.msra.mxu1 %v3765_v58  ;;  %2910 = vmatpush1.bf16.msra.mxu0 %v3765_v58  ;;  %v2821_v41 = vpack.c.bf16 %v238_v7, %v226_v32  ;;  %v261_v29 = vsub.f32 %v3699_v43, %v260_v44 }
  0x69   :  { %v2823_v1 = vpack.c.bf16 %v256_v50, %v244_v3  ;;  %v284_v35 = vand.u32 4294901760, %v3711_v52  ;;  %2816 = vmatprep.subr.bf16.mxu1 %v3777_v20  ;;  %2912 = vmatprep.subr.bf16.mxu0 %v3777_v20  ;;  %v250_v6 = vand.u32 4294901760, %v249_v63  ;;  %v2921_v0 = vpack.c.bf16 %v260_v44, %v248_v53 }
  0x6a   :  { %5203 = vst [vmem:[#allocation42_spill] sm:$0xff] %v3819_v39  ;;  %v267_v40 = vsub.f32 %v3703_v45, %v266_v60  ;;  %v279_v42 = vsub.f32 %v3705_v46, %v278_v30  ;;  %v262_v37 = vand.u32 4294901760, %v261_v29  ;;  %v2923_v25 = vpack.c.bf16 %v278_v30, %v266_v60 }
  0x6b   :  { %v273_v58 = vsub.f32 %v3709_v51, %v272_v49  ;;  %v285_v50 = vsub.f32 %v3711_v52, %v284_v35  ;;  %v290_v7 = vand.u32 4294901760, %v3717_v55  ;;  %v302_v22 = vand.u32 4294901760, %v3721_v59 }
  0x6c   :  { %v268_v3 = vand.u32 4294901760, %v267_v40  ;;  %v280_v32 = vand.u32 4294901760, %v279_v42  ;;  %2818 = vmatpush1.bf16.msra.mxu1 %v3783_v27  ;;  %2914 = vmatpush1.bf16.msra.mxu0 %v3783_v27  ;;  %v2925_v63 = vpack.c.bf16 %v284_v35, %v272_v49  ;;  %v296_v29 = vand.u32 4294901760, %v3725_v4 }
  0x6d   :  { %v274_v44 = vand.u32 4294901760, %v273_v58  ;;  %v286_v53 = vand.u32 4294901760, %v285_v50  ;;  %2820 = vmatprep.subr.bf16.mxu1 %v2819_v56  ;;  %2916 = vmatprep.subr.bf16.mxu0 %v2915_v13  ;;  %v2825_v60 = vpack.c.bf16 %v262_v37, %v250_v6  ;;  %v291_v30 = vsub.f32 %v3717_v55, %v290_v7 }
  0x6e   :  { %v303_v42 = vsub.f32 %v3721_v59, %v302_v22  ;;  %v308_v40 = vand.u32 4294901760, %v3727_v5  ;;  %v2827_v20 = vpack.c.bf16 %v280_v32, %v268_v3  ;;  %v297_v16 = vsub.f32 %v3725_v4, %v296_v29 }
  0x6f   :  { %v2829_v8 = vpack.c.bf16 %v286_v53, %v274_v44  ;;  %v314_v27 = vand.u32 4294901760, %v3731_v11  ;;  %210 = vmatmul.mubr.f32.vlgmr.msra.gmra.mrb[0].mxu1 %v3819_v39  ;;  %685 = vmatmul.mubr.f32.vlgmr.msra.gmra.mrb[0].mxu0 %v3804_v10  ;;  %v292_v49 = vand.u32 4294901760, %v291_v30  ;;  %v2927_v13 = vpack.c.bf16 %v302_v22, %v290_v7 }
  0x70   :  { %v304_v58 = vand.u32 4294901760, %v303_v42  ;;  %v309_v37 = vsub.f32 %v3727_v5, %v308_v40  ;;  %2822 = vmatpush1.bf16.msra.mxu1 %v2821_v41  ;;  %2918 = vmatpush1.bf16.msra.mxu0 %v2917_v14  ;;  %v298_v35 = vand.u32 4294901760, %v297_v16  ;;  %v326_v6 = vand.u32 4294901760, %v3733_v12 }
  0x71   :  { %v315_v56 = vsub.f32 %v3731_v11, %v314_v27  ;;  %v320_v50 = vand.u32 4294901760, %v3739_v15  ;;  %2824 = vmatprep.subr.bf16.mxu1 %v2823_v1  ;;  %2920 = vmatprep.subr.bf16.mxu0 %v2919_v62  ;;  %v2929_v32 = vpack.c.bf16 %v308_v40, %v296_v29  ;;  %v332_v44 = vand.u32 4294901760, %v3741_v19 }
  0x72   :  { %v310_v3 = vand.u32 4294901760, %v309_v37  ;;  %v338_v53 = vand.u32 4294901760, %v3747_v33  ;;  %v2831_v22 = vpack.c.bf16 %v304_v58, %v292_v49  ;;  %v327_v41 = vsub.f32 %v3733_v12, %v326_v6 }
  0x73   :  { %v316_v7 = vand.u32 4294901760, %v315_v56  ;;  %v321_v16 = vsub.f32 %v3739_v15, %v320_v50  ;;  %v5204_v14 = vmov 0.0   ;;  %v2931_v42 = vpack.c.bf16 %v326_v6, %v314_v27 }
  0x74   :  { %440 = vmatprep.mubr.f32.mxu1 %v5204_v14  ;;  %851 = vmatprep.mubr.f32.mxu0 %v5204_v14  ;;  %v2833_v30 = vpack.c.bf16 %v310_v3, %v298_v35  ;;  %v333_v62 = vsub.f32 %v3741_v19, %v332_v44  ;;  %v339_v1 = vsub.f32 %v3747_v33, %v338_v53  ;;  %v328_v29 = vand.u32 4294901760, %v327_v41 }
  0x75   :  { %2826 = vmatpush1.bf16.msra.mxu1 %v2825_v60  ;;  %2922 = vmatpush1.bf16.msra.mxu0 %v2921_v0  ;;  %v322_v40 = vand.u32 4294901760, %v321_v16  ;;  %v350_v49 = vand.u32 4294901760, %v3749_v34  ;;  %v344_v58 = vand.u32 4294901760, %v3753_v47  ;;  %v2933_v56 = vpack.c.bf16 %v332_v44, %v320_v50 }
  0x76   :  { %2828 = vmatprep.subr.bf16.mxu1 %v2827_v20  ;;  %2924 = vmatprep.subr.bf16.mxu0 %v2923_v25  ;;  %v334_v37 = vand.u32 4294901760, %v333_v62  ;;  %v356_v10 = vand.u32 4294901760, %v3755_v48  ;;  %v362_v27 = vand.u32 4294901760, %v3761_v54  ;;  %v2835_v35 = vpack.c.bf16 %v328_v29, %v316_v7 }
  0x77   :  { %v340_v6 = vand.u32 4294901760, %v339_v1  ;;  %v351_v3 = vsub.f32 %v3749_v34, %v350_v49  ;;  %v345_v0 = vsub.f32 %v3753_v47, %v344_v58  ;;  %v2935_v41 = vpack.c.bf16 %v350_v49, %v338_v53 }
  0x78   :  { %v2837_v60 = vpack.c.bf16 %v334_v37, %v322_v40  ;;  %v357_v16 = vsub.f32 %v3755_v48, %v356_v10  ;;  %v363_v39 = vsub.f32 %v3761_v54, %v362_v27  ;;  %v374_v50 = vand.u32 4294901760, %v3763_v57 }
  0x79   :  { %2830 = vmatpush1.bf16.msra.mxu1 %v2829_v8  ;;  %2926 = vmatpush1.bf16.msra.mxu0 %v2925_v63  ;;  %v352_v25 = vand.u32 4294901760, %v351_v3  ;;  %v346_v20 = vand.u32 4294901760, %v345_v0  ;;  %v368_v44 = vand.u32 4294901760, %v3769_v61  ;;  %v2937_v62 = vpack.c.bf16 %v356_v10, %v344_v58 }
  0x7a   :  { %2832 = vmatprep.subr.bf16.mxu1 %v2831_v22  ;;  %2928 = vmatprep.subr.bf16.mxu0 %v2927_v13  ;;  %v358_v7 = vand.u32 4294901760, %v357_v16  ;;  %v380_v1 = vand.u32 4294901760, %v3771_v2  ;;  %v386_v53 = vand.u32 4294901760, %v3779_v21  ;;  %v364_v40 = vand.u32 4294901760, %v363_v39 }
  0x7b   :  { %v2839_v29 = vpack.c.bf16 %v352_v25, %v340_v6  ;;  %v375_v49 = vsub.f32 %v3763_v57, %v374_v50  ;;  %v369_v8 = vsub.f32 %v3769_v61, %v368_v44  ;;  %v2939_v37 = vpack.c.bf16 %v374_v50, %v362_v27 }
  0x7c   :  { %v2841_v63 = vpack.c.bf16 %v358_v7, %v346_v20  ;;  %v381_v3 = vsub.f32 %v3771_v2, %v380_v1  ;;  %v387_v0 = vsub.f32 %v3779_v21, %v386_v53  ;;  %v398_v22 = vand.u32 4294901760, %v3781_v26 }
  0x7d   :  { %2834 = vmatpush1.bf16.msra.mxu1 %v2833_v30  ;;  %2930 = vmatpush1.bf16.msra.mxu0 %v2929_v32  ;;  %v376_v13 = vand.u32 4294901760, %v375_v49  ;;  %v370_v10 = vand.u32 4294901760, %v369_v8  ;;  %v392_v58 = vand.u32 4294901760, %v3787_v9  ;;  %v3875_v6 = vpack.c.bf16 %v380_v1, %v368_v44  ;;  %v972_v49 = vld [vmem:[#allocation7 + $0x38] sm:$0xff] }
  0x7e   :  { %2836 = vmatprep.subr.bf16.mxu1 %v2835_v35  ;;  %2932 = vmatprep.subr.bf16.mxu0 %v2931_v42  ;;  %v382_v39 = vand.u32 4294901760, %v381_v3  ;;  %v388_v16 = vand.u32 4294901760, %v387_v0  ;;  %v404_v27 = vand.u32 4294901760, %v3794_v31  ;;  %v399_v20 = vsub.f32 %v3781_v26, %v398_v22  ;;  %v968_v0 = vld [vmem:[#allocation7 + $0x18] sm:$0xff]  ;;  %v970_v3 = vld [vmem:[#allocation7 + $0x28] sm:$0xff]  ;;  %v969_v26 = vld [vmem:[#allocation7 + $0x20] sm:$0xff] }
  0x7f   :  { %v2843_v25 = vpack.c.bf16 %v376_v13, %v364_v40  ;;  %v393_v30 = vsub.f32 %v3787_v9, %v392_v58  ;;  %v3882_v7 = vpack.c.bf16 %v398_v22, %v386_v53  ;;  %v1855_v22 = vld [vmem:[#allocation8 + $0x8] sm:$0xff]  ;;  %v1861_v32 = vld [vmem:[#allocation8 + $0x38] sm:$0xff] }
  0x80   :  { %v2845_v50 = vpack.c.bf16 %v382_v39, %v370_v10  ;;  %v405_v35 = vsub.f32 %v3794_v31, %v404_v27  ;;  %v3885_v42 = vpack.c.bf16 %v404_v27, %v392_v58  ;;  %v400_v44 = vand.u32 4294901760, %v399_v20  ;;  %v1857_v58 = vld [vmem:[#allocation8 + $0x18] sm:$0xff]  ;;  %v965_v39 = vld [vmem:[#allocation7] sm:$0xff]  ;;  %v1856_v10 = vld [vmem:[#allocation8 + $0x10] sm:$0xff] }
  0x81   :  { %2838 = vmatpush1.bf16.msra.mxu1 %v2837_v60  ;;  %2934 = vmatpush1.bf16.msra.mxu0 %v2933_v56  ;;  %v394_v1 = vand.u32 4294901760, %v393_v30  ;;  %v966_v60 = vld [vmem:[#allocation7 + $0x8] sm:$0xff]  ;;  %v1001_v30 = vand.u32 4294901760, %v968_v0  ;;  %v999_v56 = vand.u32 4294901760, %v965_v39  ;;  %v1005_v31 = vand.u32 4294901760, %v970_v3 }
  0x82   :  { %2840 = vmatprep.subr.bf16.mxu1 %v2839_v29  ;;  %2936 = vmatprep.subr.bf16.mxu0 %v2935_v41  ;;  %v406_v8 = vand.u32 4294901760, %v405_v35  ;;  %v2847_v13 = vpack.c.bf16 %v400_v44, %v388_v16  ;;  %v967_v35 = vld [vmem:[#allocation7 + $0x10] sm:$0xff]  ;;  %v1854_v44 = vld [vmem:[#allocation8] sm:$0xff]  ;;  %v997_v20 = vand.u32 4294901760, %v966_v60  ;;  %v1886_v29 = vand.u32 4294901760, %v1855_v22 }
  0x83   :  { %v1890_v16 = vand.u32 4294901760, %v1857_v58  ;;  %v1888_v53 = vand.u32 4294901760, %v1854_v44  ;;  %v1892_v41 = vand.u32 4294901760, %v1856_v10 }
  0x84   :  { %v2849_v27 = vpack.c.bf16 %v406_v8, %v394_v1  ;;  %v3917_v40 = vpack.c.bf16 %v1001_v30, %v997_v20  ;;  %v3919_v1 = vsub.f32 %v966_v60, %v997_v20  ;;  %v3921_v8 = vsub.f32 %v968_v0, %v1001_v30 }
  0x85   :  { %2842 = vmatpush1.bf16.msra.mxu1 %v2841_v63  ;;  %2938 = vmatpush1.bf16.msra.mxu0 %v2937_v62  ;;  %v1003_v63 = vand.u32 4294901760, %v967_v35  ;;  %v3926_v21 = vsub.f32 %v1855_v22, %v1886_v29  ;;  %v3928_v62 = vsub.f32 %v1857_v58, %v1890_v16  ;;  %v3933_v60 = vsub.f32 %v965_v39, %v999_v56  ;;  %v974_v39 = vld [vmem:[#allocation7 + $0x48] sm:$0xff] }
  0x86   :  { %2844 = vmatprep.subr.bf16.mxu1 %v2843_v25  ;;  %2940 = vmatprep.subr.bf16.mxu0 %v2939_v37  ;;  %5205 = vst [vmem:[#allocation43_spill] sm:$0xff] %v3917_v40  ;;  %5206 = vst [vmem:[#allocation44_spill] sm:$0xff] %v3921_v8  ;;  %v3923_v25 = vpack.c.bf16 %v1890_v16, %v1886_v29  ;;  %v1859_v37 = vld [vmem:[#allocation8 + $0x28] sm:$0xff]  ;;  %v971_v40 = vld [vmem:[#allocation7 + $0x30] sm:$0xff]  ;;  %v3937_v20 = vpack.c.bf16 %v1892_v41, %v1888_v53  ;;  %v1898_v30 = vand.u32 4294901760, %v1861_v32 }
  0x87   :  { %5208 = vst [vmem:[#allocation46_spill] sm:$0xff] %v3926_v21  ;;  %5209 = vst [vmem:[#allocation47_spill] sm:$0xff] %v3928_v62  ;;  %v3930_v9 = vpack.c.bf16 %v1003_v63, %v999_v56  ;;  %v3935_v0 = vsub.f32 %v967_v35, %v1003_v63  ;;  %v3939_v29 = vsub.f32 %v1854_v44, %v1888_v53  ;;  %v1894_v58 = vand.u32 4294901760, %v1859_v37  ;;  %v1860_v16 = vld [vmem:[#allocation8 + $0x30] sm:$0xff]  ;;  %v976_v35 = vld [vmem:[#allocation7 + $0x58] sm:$0xff] }
  0x88   :  { %5207 = vst [vmem:[#allocation45_spill] sm:$0xff] %v3923_v25  ;;  %5211 = vst [vmem:[#allocation49_spill] sm:$0xff] %v3933_v60  ;;  %v3941_v22 = vsub.f32 %v1856_v10, %v1892_v41  ;;  %v1011_v56 = vand.u32 4294901760, %v971_v40  ;;  %v1863_v63 = vld [vmem:[#allocation8 + $0x48] sm:$0xff]  ;;  %v1865_v44 = vld [vmem:[#allocation8 + $0x58] sm:$0xff] }
  0x89   :  { %2846 = vmatpush1.bf16.msra.mxu1 %v2845_v50  ;;  %2942 = vmatpush1.bf16.msra.mxu0 %v3875_v6  ;;  %5210 = vst [vmem:[#allocation48_spill] sm:$0xff] %v3930_v9  ;;  %5212 = vst [vmem:[#allocation50_spill] sm:$0xff] %v3937_v20  ;;  %v1009_v50 = vand.u32 4294901760, %v972_v49  ;;  %v1858_v6 = vld [vmem:[#allocation8 + $0x20] sm:$0xff]  ;;  %v3950_v53 = vpack.c.bf16 %v1898_v30, %v1894_v58  ;;  %v3952_v10 = vsub.f32 %v1859_v37, %v1894_v58 }
  0x8a   :  { %2848 = vmatprep.subr.bf16.mxu1 %v2847_v13  ;;  %2944 = vmatprep.subr.bf16.mxu0 %v3882_v7  ;;  %5213 = vst [vmem:[#allocation51_spill] sm:$0xff] %v3941_v22  ;;  %v3945_v13 = vsub.f32 %v970_v3, %v1005_v31  ;;  %v1007_v7 = vand.u32 4294901760, %v969_v26  ;;  %v1896_v41 = vand.u32 4294901760, %v1858_v6  ;;  %v973_v22 = vld [vmem:[#allocation7 + $0x40] sm:$0xff]  ;;  %v5220_v3 = vld [vmem:[#allocation19_spill] sm:$0xff]  ;;  %v1013_v37 = vand.u32 4294901760, %v974_v39 }
  0x8b   :  { %v3943_v9 = vpack.c.bf16 %v1009_v50, %v1005_v31  ;;  %v3948_v20 = vsub.f32 %v972_v49, %v1009_v50  ;;  %5217 = vst [vmem:[#allocation55_spill] sm:$0xff] %v3950_v53  ;;  %5218 = vst [vmem:[#allocation56_spill] sm:$0xff] %v3952_v10  ;;  %v5219_v31 = vpack.c.bf16 %v3675_v18, %v3673_v17  ;;  %v1900_v49 = vand.u32 4294901760, %v1860_v16  ;;  %v975_v50 = vld [vmem:[#allocation7 + $0x50] sm:$0xff]  ;;  %v1862_v53 = vld [vmem:[#allocation8 + $0x40] sm:$0xff] }
  0x8c   :  { %5215 = vst [vmem:[#allocation53_spill] sm:$0xff] %v3945_v13  ;;  %v3958_v13 = vsub.f32 %v1861_v32, %v1898_v30  ;;  %v1017_v58 = vand.u32 4294901760, %v976_v35  ;;  %v1902_v10 = vand.u32 4294901760, %v1863_v63  ;;  %v3970_v18 = vsub.f32 %v1858_v6, %v1896_v41  ;;  %v1867_v6 = vld [vmem:[#allocation8 + $0x68] sm:$0xff] }
  0x8d   :  { %5214 = vst [vmem:[#allocation52_spill] sm:$0xff] %v3943_v9  ;;  %2850 = vmatpush1.bf16.msra.mxu1 %v2849_v27  ;;  %2946 = vmatpush1.bf16.msra.mxu0 %v3885_v42  ;;  %5216 = vst [vmem:[#allocation54_spill] sm:$0xff] %v3948_v20  ;;  %v3960_v27 = vpack.c.bf16 %v1011_v56, %v1007_v7  ;;  %v3962_v42 = vsub.f32 %v969_v26, %v1007_v7  ;;  %v5225_v9 = vld [vmem:[#allocation33_spill] sm:$0xff]  ;;  %v1906_v32 = vand.u32 4294901760, %v1865_v44  ;;  %v1864_v26 = vld [vmem:[#allocation8 + $0x50] sm:$0xff] }
  0x8e   :  { %2852 = vmatprep.subr.bf16.mxu1 %v5219_v31  ;;  %2948 = vmatprep.subr.bf16.mxu0 %v5220_v3  ;;  %5221 = vst [vmem:[#allocation19_spill] sm:$0xff] %v3958_v13  ;;  %v3964_v20 = vsub.f32 %v971_v40, %v1011_v56  ;;  %v3968_v17 = vpack.c.bf16 %v1900_v49, %v1896_v41  ;;  %5227 = vst [vmem:[#allocation61_spill] sm:$0xff] %v3970_v18  ;;  %v1015_v30 = vand.u32 4294901760, %v973_v22  ;;  %v5229_v40 = vld [vmem:[#allocation20_spill] sm:$0xff]  ;;  %v5233_v18 = vld [vmem:[#allocation21_spill] sm:$0xff] }
  0x8f   :  { %5222 = vst [vmem:[#allocation57_spill] sm:$0xff] %v3960_v27  ;;  %5223 = vst [vmem:[#allocation58_spill] sm:$0xff] %v3962_v42  ;;  %v5228_v7 = vpack.c.bf16 %v3681_v24, %v3679_v23  ;;  %v3976_v56 = vsub.f32 %v1860_v16, %v1900_v49  ;;  %v3978_v31 = vpack.c.bf16 %v1017_v58, %v1013_v37  ;;  %v978_v42 = vld [vmem:[#allocation7 + $0x68] sm:$0xff]  ;;  %v980_v13 = vld [vmem:[#allocation7 + $0x78] sm:$0xff]  ;;  %v1904_v49 = vand.u32 4294901760, %v1862_v53 }
  0x90   :  { %5224 = vst [vmem:[#allocation59_spill] sm:$0xff] %v3964_v20  ;;  %442 = vmatmul.mubr.f32.vlgmr.msra.gmra.mrb[0].mxu1 %v5225_v9  ;;  %853 = vmatmul.mubr.f32.vlgmr.msra.gmra.mrb[0].mxu0 %v5225_v9  ;;  %5226 = vst [vmem:[#allocation60_spill] sm:$0xff] %v3968_v17  ;;  %v3980_v3 = vsub.f32 %v974_v39, %v1013_v37  ;;  %v1019_v20 = vand.u32 4294901760, %v975_v50  ;;  %v5232_v41 = vpack.c.bf16 %v3692_v36, %v3687_v28  ;;  %v977_v39 = vld [vmem:[#allocation7 + $0x60] sm:$0xff] }
  0x91   :  { %2854 = vmatpush1.bf16.msra.mxu1 %v5228_v7  ;;  %2950 = vmatpush1.bf16.msra.mxu0 %v5229_v40  ;;  %5230 = vst [vmem:[#allocation20_spill] sm:$0xff] %v3978_v31  ;;  %v3986_v23 = vsub.f32 %v976_v35, %v1017_v58  ;;  %v3988_v24 = vpack.c.bf16 %v1906_v32, %v1902_v10  ;;  %v1869_v7 = vld [vmem:[#allocation8 + $0x78] sm:$0xff]  ;;  %v1908_v36 = vand.u32 4294901760, %v1864_v26  ;;  %v979_v35 = vld [vmem:[#allocation7 + $0x70] sm:$0xff] }
  0x92   :  { %5231 = vst [vmem:[#allocation62_spill] sm:$0xff] %v3980_v3  ;;  %2856 = vmatprep.subr.bf16.mxu1 %v5232_v41  ;;  %2952 = vmatprep.subr.bf16.mxu0 %v5233_v18  ;;  %v3990_v16 = vsub.f32 %v1863_v63, %v1902_v10  ;;  %v3994_v37 = vsub.f32 %v1865_v44, %v1906_v32  ;;  %v1021_v18 = vand.u32 4294901760, %v978_v42  ;;  %v1025_v63 = vand.u32 4294901760, %v980_v13 }
  0x93   :  { %5234 = vst [vmem:[#allocation21_spill] sm:$0xff] %v3986_v23  ;;  %5235 = vst [vmem:[#allocation63_spill] sm:$0xff] %v3988_v24  ;;  %576 = vmatprep.mubr.f32.mxu1 %v5204_v14  ;;  %955 = vmatprep.mubr.f32.mxu0 %v5204_v14  ;;  %v3996_v40 = vpack.c.bf16 %v1019_v20, %v1015_v30  ;;  %v3998_v28 = vsub.f32 %v973_v22, %v1015_v30  ;;  %v1910_v10 = vand.u32 4294901760, %v1867_v6  ;;  %v1866_v30 = vld [vmem:[#allocation8 + $0x60] sm:$0xff] }
  0x94   :  { %5236 = vst [vmem:[#allocation64_spill] sm:$0xff] %v3990_v16  ;;  %5237 = vst [vmem:[#allocation65_spill] sm:$0xff] %v3994_v37  ;;  %v4000_v58 = vsub.f32 %v975_v50, %v1019_v20  ;;  %v5241_v41 = vpack.c.bf16 %v3699_v43, %v3697_v38  ;;  %v5242_v16 = vld [vmem:[#allocation22_spill] sm:$0xff]  ;;  %v4006_v23 = vpack.c.bf16 %v1908_v36, %v1904_v49  ;;  %v1914_v32 = vand.u32 4294901760, %v1869_v7  ;;  %v5246_v50 = vld [vmem:[#allocation23_spill] sm:$0xff] }
  0x95   :  { %5238 = vst [vmem:[#allocation66_spill] sm:$0xff] %v3996_v40  ;;  %5239 = vst [vmem:[#allocation67_spill] sm:$0xff] %v3998_v28  ;;  %2954 = vmatpush1.bf16.msra.mxu0 %v5242_v16  ;;  %v4008_v44 = vsub.f32 %v1862_v53, %v1904_v49  ;;  %v1023_v22 = vand.u32 4294901760, %v977_v39  ;;  %v1868_v28 = vld [vmem:[#allocation8 + $0x70] sm:$0xff]  ;;  %v982_v37 = vld [vmem:[#allocation7 + $0x88] sm:$0xff]  ;;  %v5245_v20 = vpack.c.bf16 %v3705_v46, %v3703_v45  ;;  %v1027_v16 = vand.u32 4294901760, %v979_v35 }
  0x96   :  { %5240 = vst [vmem:[#allocation68_spill] sm:$0xff] %v4000_v58  ;;  %2858 = vmatpush1.bf16.msra.mxu1 %v5241_v41  ;;  %5243 = vst [vmem:[#allocation22_spill] sm:$0xff] %v4006_v23  ;;  %2956 = vmatprep.subr.bf16.mxu0 %v5246_v50  ;;  %v4014_v58 = vsub.f32 %v1864_v26, %v1908_v36  ;;  %v4016_v38 = vpack.c.bf16 %v1025_v63, %v1021_v18  ;;  %v984_v53 = vld [vmem:[#allocation7 + $0x98] sm:$0xff]  ;;  %v1871_v49 = vld [vmem:[#allocation8 + $0x88] sm:$0xff]  ;;  %v1912_v36 = vand.u32 4294901760, %v1866_v30 }
  0x97   :  { %5244 = vst [vmem:[#allocation69_spill] sm:$0xff] %v4008_v44  ;;  %2860 = vmatprep.subr.bf16.mxu1 %v5245_v20  ;;  %v4018_v43 = vsub.f32 %v978_v42, %v1021_v18  ;;  %v1873_v41 = vld [vmem:[#allocation8 + $0x98] sm:$0xff]  ;;  %v4020_v44 = vsub.f32 %v980_v13, %v1025_v63  ;;  %v4022_v23 = vpack.c.bf16 %v1914_v32, %v1910_v10  ;;  %v1916_v20 = vand.u32 4294901760, %v1868_v28  ;;  %v981_v42 = vld [vmem:[#allocation7 + $0x80] sm:$0xff] }
  0x98   :  { %5247 = vst [vmem:[#allocation23_spill] sm:$0xff] %v4014_v58  ;;  %5248 = vst [vmem:[#allocation70_spill] sm:$0xff] %v4016_v38  ;;  %v4024_v40 = vsub.f32 %v1867_v6, %v1910_v10  ;;  %v4026_v45 = vsub.f32 %v1869_v7, %v1914_v32  ;;  %v4028_v46 = vpack.c.bf16 %v1027_v16, %v1023_v22  ;;  %v5257_v50 = vld [vmem:[#allocation24_spill] sm:$0xff]  ;;  %v1029_v13 = vand.u32 4294901760, %v982_v37  ;;  %v983_v10 = vld [vmem:[#allocation7 + $0x90] sm:$0xff] }
  0x99   :  { %5249 = vst [vmem:[#allocation71_spill] sm:$0xff] %v4018_v43  ;;  %5250 = vst [vmem:[#allocation72_spill] sm:$0xff] %v4020_v44  ;;  %v4030_v26 = vsub.f32 %v977_v39, %v1023_v22  ;;  %v5256_v18 = vpack.c.bf16 %v3711_v52, %v3709_v51  ;;  %2958 = vmatpush1.bf16.msra.mxu0 %v5257_v50  ;;  %v1033_v63 = vand.u32 4294901760, %v984_v53  ;;  %v1918_v44 = vand.u32 4294901760, %v1871_v49  ;;  %v1870_v7 = vld [vmem:[#allocation8 + $0x80] sm:$0xff]  ;;  %v1872_v52 = vld [vmem:[#allocation8 + $0x90] sm:$0xff] }
  0x9a   :  { %5251 = vst [vmem:[#allocation73_spill] sm:$0xff] %v4022_v23  ;;  %5252 = vst [vmem:[#allocation74_spill] sm:$0xff] %v4024_v40  ;;  %v1922_v6 = vand.u32 4294901760, %v1873_v41  ;;  %v5258_v32 = vpack.c.bf16 %v3721_v59, %v3717_v55  ;;  %v5259_v39 = vld [vmem:[#allocation25_spill] sm:$0xff]  ;;  %v4040_v22 = vsub.f32 %v979_v35, %v1027_v16  ;;  %v4044_v51 = vsub.f32 %v1866_v30, %v1912_v36  ;;  %v988_v50 = vld [vmem:[#allocation7 + $0xb8] sm:$0xff] }
  0x9b   :  { %5253 = vst [vmem:[#allocation75_spill] sm:$0xff] %v4026_v45  ;;  %5254 = vst [vmem:[#allocation76_spill] sm:$0xff] %v4028_v46  ;;  %2862 = vmatpush1.bf16.msra.mxu1 %v5256_v18  ;;  %2960 = vmatprep.subr.bf16.mxu0 %v5259_v39  ;;  %v986_v18 = vld [vmem:[#allocation7 + $0xa8] sm:$0xff]  ;;  %v4046_v45 = vsub.f32 %v1868_v28, %v1916_v20  ;;  %v4048_v40 = vpack.c.bf16 %v1033_v63, %v1029_v13  ;;  %v1031_v58 = vand.u32 4294901760, %v981_v42  ;;  %v1877_v59 = vld [vmem:[#allocation8 + $0xb8] sm:$0xff] }
  0x9c   :  { %5255 = vst [vmem:[#allocation77_spill] sm:$0xff] %v4030_v26  ;;  %2864 = vmatprep.subr.bf16.mxu1 %v5258_v32  ;;  %5260 = vst [vmem:[#allocation24_spill] sm:$0xff] %v4040_v22  ;;  %v4042_v26 = vpack.c.bf16 %v1916_v20, %v1912_v36  ;;  %v4050_v43 = vsub.f32 %v982_v37, %v1029_v13  ;;  %v1875_v55 = vld [vmem:[#allocation8 + $0xa8] sm:$0xff]  ;;  %v4052_v32 = vsub.f32 %v984_v53, %v1033_v63  ;;  %v5272_v53 = vld [vmem:[#allocation27_spill] sm:$0xff] }
  0x9d   :  { %5262 = vst [vmem:[#allocation78_spill] sm:$0xff] %v4044_v51  ;;  %5263 = vst [vmem:[#allocation79_spill] sm:$0xff] %v4046_v45  ;;  %v4054_v35 = vpack.c.bf16 %v1922_v6, %v1918_v44  ;;  %v4056_v16 = vsub.f32 %v1871_v49, %v1918_v44  ;;  %v1035_v30 = vand.u32 4294901760, %v983_v10  ;;  %v5269_v36 = vpack.c.bf16 %v3727_v5, %v3725_v4  ;;  %v5270_v28 = vld [vmem:[#allocation26_spill] sm:$0xff]  ;;  %v985_v4 = vld [vmem:[#allocation7 + $0xa0] sm:$0xff] }
  0x9e   :  { %5261 = vst [vmem:[#allocation25_spill] sm:$0xff] %v4042_v26  ;;  %5264 = vst [vmem:[#allocation80_spill] sm:$0xff] %v4048_v40  ;;  %2962 = vmatpush1.bf16.msra.mxu0 %v5270_v28  ;;  %v1920_v20 = vand.u32 4294901760, %v1870_v7  ;;  %v1924_v39 = vand.u32 4294901760, %v1872_v52  ;;  %v1037_v37 = vand.u32 4294901760, %v986_v18  ;;  %v1041_v13 = vand.u32 4294901760, %v988_v50 }
  0x9f   :  { %5265 = vst [vmem:[#allocation81_spill] sm:$0xff] %v4050_v43  ;;  %5266 = vst [vmem:[#allocation82_spill] sm:$0xff] %v4052_v32  ;;  %2866 = vmatpush1.bf16.msra.mxu1 %v5269_v36  ;;  %v5271_v43 = vpack.c.bf16 %v3733_v12, %v3731_v11  ;;  %2964 = vmatprep.subr.bf16.mxu0 %v5272_v53  ;;  %v4066_v63 = vsub.f32 %v1873_v41, %v1922_v6  ;;  %v1926_v49 = vand.u32 4294901760, %v1875_v55  ;;  %v987_v5 = vld [vmem:[#allocation7 + $0xb0] sm:$0xff]  ;;  %v1874_v36 = vld [vmem:[#allocation8 + $0xa0] sm:$0xff] }
  0xa0   :  { %5267 = vst [vmem:[#allocation83_spill] sm:$0xff] %v4054_v35  ;;  %5268 = vst [vmem:[#allocation84_spill] sm:$0xff] %v4056_v16  ;;  %v4068_v44 = vsub.f32 %v981_v42, %v1031_v58  ;;  %v1930_v16 = vand.u32 4294901760, %v1877_v59  ;;  %v4070_v28 = vpack.c.bf16 %v1035_v30, %v1031_v58  ;;  %v4072_v32 = vsub.f32 %v983_v10, %v1035_v30  ;;  %v1876_v11 = vld [vmem:[#allocation8 + $0xb0] sm:$0xff]  ;;  %v990_v12 = vld [vmem:[#allocation7 + $0xc8] sm:$0xff] }
  0xa1   :  { %2868 = vmatprep.subr.bf16.mxu1 %v5271_v43  ;;  %v4074_v45 = vpack.c.bf16 %v1924_v39, %v1920_v20  ;;  %v4076_v51 = vsub.f32 %v1870_v7, %v1920_v20  ;;  %v992_v43 = vld [vmem:[#allocation7 + $0xd8] sm:$0xff]  ;;  %v4078_v41 = vsub.f32 %v1872_v52, %v1924_v39  ;;  %v4080_v42 = vpack.c.bf16 %v1041_v13, %v1037_v37 }
  0xa2   :  { %5273 = vst [vmem:[#allocation26_spill] sm:$0xff] %v4068_v44  ;;  %5274 = vst [vmem:[#allocation27_spill] sm:$0xff] %v4070_v28  ;;  %v4082_v6 = vsub.f32 %v986_v18, %v1037_v37  ;;  %v4084_v53 = vsub.f32 %v988_v50, %v1041_v13  ;;  %v1879_v44 = vld [vmem:[#allocation8 + $0xc8] sm:$0xff]  ;;  %v5282_v58 = vpack.c.bf16 %v3741_v19, %v3739_v15  ;;  %v5283_v10 = vld [vmem:[#allocation28_spill] sm:$0xff]  ;;  %v1039_v30 = vand.u32 4294901760, %v985_v4 }
  0xa3   :  { %5275 = vst [vmem:[#allocation85_spill] sm:$0xff] %v4072_v32  ;;  %5276 = vst [vmem:[#allocation86_spill] sm:$0xff] %v4074_v45  ;;  %2966 = vmatpush1.bf16.msra.mxu0 %v5283_v10  ;;  %v4090_v7 = vpack.c.bf16 %v1930_v16, %v1926_v49  ;;  %v1043_v20 = vand.u32 4294901760, %v987_v5  ;;  %v5285_v52 = vpack.c.bf16 %v3749_v34, %v3747_v33  ;;  %v5286_v18 = vld [vmem:[#allocation29_spill] sm:$0xff]  ;;  %v1932_v39 = vand.u32 4294901760, %v1876_v11  ;;  %v1881_v15 = vld [vmem:[#allocation8 + $0xd8] sm:$0xff] }
  0xa4   :  { %5277 = vst [vmem:[#allocation87_spill] sm:$0xff] %v4076_v51  ;;  %5278 = vst [vmem:[#allocation88_spill] sm:$0xff] %v4078_v41  ;;  %2870 = vmatpush1.bf16.msra.mxu1 %v5282_v58  ;;  %v1928_v51 = vand.u32 4294901760, %v1874_v36  ;;  %2968 = vmatprep.subr.bf16.mxu0 %v5286_v18  ;;  %v4096_v50 = vsub.f32 %v1875_v55, %v1926_v49  ;;  %v1045_v37 = vand.u32 4294901760, %v990_v12  ;;  %v1049_v13 = vand.u32 4294901760, %v992_v43  ;;  %v989_v19 = vld [vmem:[#allocation7 + $0xc0] sm:$0xff] }
  0xa5   :  { %5279 = vst [vmem:[#allocation89_spill] sm:$0xff] %v4080_v42  ;;  %5280 = vst [vmem:[#allocation90_spill] sm:$0xff] %v4082_v6  ;;  %2872 = vmatprep.subr.bf16.mxu1 %v5285_v52  ;;  %v991_v58 = vld [vmem:[#allocation7 + $0xd0] sm:$0xff]  ;;  %v4098_v10 = vsub.f32 %v1877_v59, %v1930_v16  ;;  %v4102_v6 = vsub.f32 %v985_v4, %v1039_v30  ;;  %v1934_v41 = vand.u32 4294901760, %v1879_v44  ;;  %v1878_v32 = vld [vmem:[#allocation8 + $0xc0] sm:$0xff] }
  0xa6   :  { %5281 = vst [vmem:[#allocation91_spill] sm:$0xff] %v4084_v53  ;;  %5284 = vst [vmem:[#allocation28_spill] sm:$0xff] %v4090_v7  ;;  %v4100_v53 = vpack.c.bf16 %v1043_v20, %v1039_v30  ;;  %v1880_v33 = vld [vmem:[#allocation8 + $0xd0] sm:$0xff]  ;;  %v994_v34 = vld [vmem:[#allocation7 + $0xe8] sm:$0xff]  ;;  %v4104_v52 = vsub.f32 %v987_v5, %v1043_v20  ;;  %v4106_v55 = vpack.c.bf16 %v1932_v39, %v1928_v51  ;;  %v1047_v5 = vand.u32 4294901760, %v989_v19 }
  0xa7   :  { %5287 = vst [vmem:[#allocation29_spill] sm:$0xff] %v4096_v50  ;;  %5288 = vst [vmem:[#allocation92_spill] sm:$0xff] %v4098_v10  ;;  %v4108_v49 = vsub.f32 %v1874_v36, %v1928_v51  ;;  %v4110_v18 = vsub.f32 %v1876_v11, %v1932_v39  ;;  %v996_v50 = vld [vmem:[#allocation7 + $0xf8] sm:$0xff]  ;;  %v5295_v59 = vpack.c.bf16 %v3755_v48, %v3753_v47  ;;  %v5296_v16 = vld [vmem:[#allocation30_spill] sm:$0xff]  ;;  %v1051_v36 = vand.u32 4294901760, %v991_v58 }
  0xa8   :  { %5289 = vst [vmem:[#allocation93_spill] sm:$0xff] %v4100_v53  ;;  %5290 = vst [vmem:[#allocation94_spill] sm:$0xff] %v4102_v6  ;;  %2970 = vmatpush1.bf16.msra.mxu0 %v5296_v16  ;;  %v4116_v4 = vpack.c.bf16 %v1049_v13, %v1045_v37  ;;  %v4118_v30 = vsub.f32 %v990_v12, %v1045_v37  ;;  %v1938_v6 = vand.u32 4294901760, %v1881_v15  ;;  %v5300_v51 = vld [vmem:[#allocation31_spill] sm:$0xff]  ;;  %v1936_v11 = vand.u32 4294901760, %v1878_v32  ;;  %v1883_v47 = vld [vmem:[#allocation8 + $0xe8] sm:$0xff] }
  0xa9   :  { %5291 = vst [vmem:[#allocation95_spill] sm:$0xff] %v4104_v52  ;;  %5292 = vst [vmem:[#allocation96_spill] sm:$0xff] %v4106_v55  ;;  %2874 = vmatpush1.bf16.msra.mxu1 %v5295_v59  ;;  %v5299_v20 = vpack.c.bf16 %v3763_v57, %v3761_v54  ;;  %2972 = vmatprep.subr.bf16.mxu0 %v5300_v51  ;;  %v1940_v39 = vand.u32 4294901760, %v1880_v33  ;;  %v4124_v48 = vsub.f32 %v992_v43, %v1049_v13  ;;  %v1885_v37 = vld [vmem:[#allocation8 + $0xf8] sm:$0xff]  ;;  %v1882_v51 = vld [vmem:[#allocation8 + $0xe0] sm:$0xff] }
  0xaa   :  { %5293 = vst [vmem:[#allocation97_spill] sm:$0xff] %v4108_v49  ;;  %5294 = vst [vmem:[#allocation98_spill] sm:$0xff] %v4110_v18  ;;  %v1053_v18 = vand.u32 4294901760, %v994_v34  ;;  %v4126_v59 = vpack.c.bf16 %v1938_v6, %v1934_v41  ;;  %v4128_v16 = vsub.f32 %v1879_v44, %v1934_v41  ;;  %v1057_v12 = vand.u32 4294901760, %v996_v50  ;;  %v995_v49 = vld [vmem:[#allocation7 + $0xf0] sm:$0xff]  ;;  %v5308_v44 = vld [vmem:[#allocation32_spill] sm:$0xff] }
  0xab   :  { %5297 = vst [vmem:[#allocation30_spill] sm:$0xff] %v4116_v4  ;;  %5298 = vst [vmem:[#allocation99_spill] sm:$0xff] %v4118_v30  ;;  %2876 = vmatprep.subr.bf16.mxu1 %v5299_v20  ;;  %v993_v30 = vld [vmem:[#allocation7 + $0xe0] sm:$0xff]  ;;  %v4130_v52 = vsub.f32 %v1881_v15, %v1938_v6  ;;  %v4132_v54 = vpack.c.bf16 %v1051_v36, %v1047_v5  ;;  %v4134_v57 = vsub.f32 %v989_v19, %v1047_v5  ;;  %v1884_v10 = vld [vmem:[#allocation8 + $0xf0] sm:$0xff] }
  0xac   :  { %5301 = vst [vmem:[#allocation31_spill] sm:$0xff] %v4124_v48  ;;  %5302 = vst [vmem:[#allocation100_spill] sm:$0xff] %v4126_v59  ;;  %v4136_v20 = vsub.f32 %v991_v58, %v1051_v36  ;;  %v5307_v43 = vpack.c.bf16 %v3771_v2, %v3769_v61  ;;  %2974 = vmatpush1.bf16.msra.mxu0 %v5308_v44  ;;  %v4142_v41 = vpack.c.bf16 %v1940_v39, %v1936_v11  ;;  %v5313_v19 = vld [vmem:[#allocation35_spill] sm:$0xff]  ;;  %v5315_v58 = vld [vmem:[#allocation34_spill] sm:$0xff] }
  0xad   :  { %5303 = vst [vmem:[#allocation101_spill] sm:$0xff] %v4130_v52  ;;  %5304 = vst [vmem:[#allocation102_spill] sm:$0xff] %v4132_v54  ;;  %v4144_v13 = vsub.f32 %v1878_v32, %v1936_v11  ;;  %v4146_v6 = vsub.f32 %v1880_v33, %v1940_v39  ;;  %v1942_v15 = vand.u32 4294901760, %v1883_v47  ;;  %v5312_v52 = vld [vmem:[#allocation36_spill] sm:$0xff]  ;;  %2976 = vmatprep.subr.bf16.mxu0 %v5315_v58  ;;  %v1055_v61 = vand.u32 4294901760, %v993_v30 }
  0xae   :  { %5305 = vst [vmem:[#allocation103_spill] sm:$0xff] %v4134_v57  ;;  %5306 = vst [vmem:[#allocation104_spill] sm:$0xff] %v4136_v20  ;;  %2878 = vmatpush1.bf16.msra.mxu1 %v5307_v43  ;;  %v5314_v5 = vpack.c.bf16 %v5312_v52, %v5313_v19  ;;  %v4152_v36 = vpack.c.bf16 %v1057_v12, %v1053_v18  ;;  %v1946_v20 = vand.u32 4294901760, %v1885_v37  ;;  %v1059_v2 = vand.u32 4294901760, %v995_v49  ;;  %v5322_v19 = vld [vmem:[#allocation39_spill] sm:$0xff] }
  0xaf   :  { %5309 = vst [vmem:[#allocation32_spill] sm:$0xff] %v4142_v41  ;;  %5310 = vst [vmem:[#allocation105_spill] sm:$0xff] %v4144_v13  ;;  %v4154_v43 = vsub.f32 %v994_v34, %v1053_v18  ;;  %v1944_v44 = vand.u32 4294901760, %v1882_v51  ;;  %v1948_v57 = vand.u32 4294901760, %v1884_v10  ;;  %v5021_v32 = vand.u32 4294901760, %v3919_v1 }
  0xb0   :  { %5311 = vst [vmem:[#allocation106_spill] sm:$0xff] %v4146_v6  ;;  %2880 = vmatprep.subr.bf16.mxu1 %v5314_v5  ;;  %5316 = vst [vmem:[#allocation36_spill] sm:$0xff] %v4152_v36  ;;  %v4157_v33 = vsub.f32 %v996_v50, %v1057_v12  ;;  %v4159_v11 = vpack.c.bf16 %v1946_v20, %v1942_v15  ;;  %v4161_v39 = vsub.f32 %v1883_v47, %v1942_v15  ;;  %v5323_v5 = vld [vmem:[#allocation38_spill] sm:$0xff]  ;;  %v5325_v6 = vld [vmem:[#allocation37_spill] sm:$0xff] }
  0xb1   :  { %5317 = vst [vmem:[#allocation35_spill] sm:$0xff] %v4154_v43  ;;  %v4163_v52 = vsub.f32 %v1885_v37, %v1946_v20  ;;  %v5324_v58 = vpack.c.bf16 %v5322_v19, %v5323_v5  ;;  %2978 = vmatpush1.bf16.msra.mxu0 %v5325_v6  ;;  %v4169_v34 = vpack.c.bf16 %v1059_v2, %v1055_v61  ;;  %v5020_v50 = vand.u32 4294901760, %v3921_v8  ;;  %v5329_v12 = vld [vmem:[#allocation43_spill] sm:$0xff]  ;;  %v5334_v15 = vld [vmem:[#allocation50_spill] sm:$0xff] }
  0xb2   :  { %5318 = vst [vmem:[#allocation34_spill] sm:$0xff] %v4157_v33  ;;  %5319 = vst [vmem:[#allocation107_spill] sm:$0xff] %v4159_v11  ;;  %v4171_v18 = vsub.f32 %v993_v30, %v1055_v61  ;;  %v4173_v43 = vsub.f32 %v995_v49, %v1059_v2  ;;  %3172 = vmatprep.subr.bf16.mxu0 %v3923_v25  ;;  %v4178_v47 = vpack.c.bf16 %v1948_v57, %v1944_v44  ;;  %v5331_v2 = vld [vmem:[#allocation40_spill] sm:$0xff] }
  0xb3   :  { %5320 = vst [vmem:[#allocation108_spill] sm:$0xff] %v4161_v39  ;;  %5321 = vst [vmem:[#allocation109_spill] sm:$0xff] %v4163_v52  ;;  %2882 = vmatpush1.bf16.msra.mxu1 %v5324_v58  ;;  %v1108_v37 = vsub.f32 %v3919_v1, %v5021_v32  ;;  %v5024_v20 = vand.u32 4294901760, %v3926_v21  ;;  %v5026_v6 = vand.u32 4294901760, %v3928_v62  ;;  %v1120_v49 = vsub.f32 %v3921_v8, %v5020_v50  ;;  %v5332_v50 = vld [vmem:[#allocation51_spill] sm:$0xff]  ;;  %v5333_v30 = vld [vmem:[#allocation48_spill] sm:$0xff] }
  0xb4   :  { %5326 = vst [vmem:[#allocation39_spill] sm:$0xff] %v4169_v34  ;;  %5327 = vst [vmem:[#allocation38_spill] sm:$0xff] %v4171_v18  ;;  %2980 = vmatprep.subr.bf16.mxu1 %v5329_v12  ;;  %957 = vmatmul.mubr.f32.vlgmr.msra.gmra.mrb[0].mxu0 %v5225_v9  ;;  %v5339_v32 = vld [vmem:[#allocation55_spill] sm:$0xff]  ;;  %v4219_v8 = vsub.f32 %v1884_v10, %v1948_v57  ;;  %v5345_v57 = vld [vmem:[#allocation56_spill] sm:$0xff] }
  0xb5   :  { %5328 = vst [vmem:[#allocation37_spill] sm:$0xff] %v4173_v43  ;;  %5330 = vst [vmem:[#allocation110_spill] sm:$0xff] %v4178_v47  ;;  %v1109_v19 = vand.u32 4294901760, %v1108_v37  ;;  %v1997_v5 = vsub.f32 %v3926_v21, %v5024_v20  ;;  %v2009_v58 = vsub.f32 %v3928_v62, %v5026_v6  ;;  %3174 = vmatpush1.bf16.msra.mxu0 %v5334_v15  ;;  %v1121_v61 = vand.u32 4294901760, %v1120_v49  ;;  %v5338_v6 = vld [vmem:[#allocation52_spill] sm:$0xff]  ;;  %v5341_v21 = vld [vmem:[#allocation53_spill] sm:$0xff] }
  0xb6   :  { %579 = vmatmul.mubr.f32.vlgmr.msra.gmra.mrb[0].mxu1 %v5331_v2  ;;  %v5335_v2 = vand.u32 4294901760, %v3933_v60  ;;  %v5336_v37 = vand.u32 4294901760, %v3935_v0  ;;  %v5337_v20 = vand.u32 4294901760, %v3939_v29  ;;  %3176 = vmatprep.subr.bf16.mxu0 %v5339_v32  ;;  %v5340_v49 = vand.u32 4294901760, %v5332_v50  ;;  %5343 = vst [vmem:[#allocation111_spill] sm:$0xff] %v4219_v8 }
  0xb7   :  { %2982 = vmatpush1.bf16.msra.mxu1 %v5333_v30  ;;  %v1998_v30 = vand.u32 4294901760, %v1997_v5  ;;  %v2010_v62 = vand.u32 4294901760, %v2009_v58  ;;  %1093 = vmatprep.mubr.f32.mxu1 %v5204_v14 }
  0xb8   :  { %v1114_v25 = vsub.f32 %v3933_v60, %v5335_v2  ;;  %v1126_v12 = vsub.f32 %v3935_v0, %v5336_v37  ;;  %v2003_v9 = vsub.f32 %v3939_v29, %v5337_v20  ;;  %2984 = vmatprep.subr.bf16.mxu1 %v5338_v6  ;;  %v2015_v15 = vsub.f32 %v5332_v50, %v5340_v49  ;;  %v5344_v49 = vld [vmem:[#allocation54_spill] sm:$0xff] }
  0xb9   :  { %v5036_v2 = vand.u32 4294901760, %v5341_v21  ;;  %v4217_v60 = vsub.f32 %v1882_v51, %v1944_v44  ;;  %v4222_v37 = vpack.c.bf16 %v1121_v61, %v1109_v19  ;;  %1982 = vmatprep.mubr.f32.mxu0 %v5204_v14  ;;  %v5043_v6 = vand.u32 4294901760, %v5344_v49  ;;  %3178 = vmatpush1.bf16.msra.mxu0 %v3968_v17  ;;  %v5346_v44 = vld [vmem:[#allocation19_spill] sm:$0xff]  ;;  %v5347_v19 = vld [vmem:[#allocation58_spill] sm:$0xff] }
  0xba   :  { %v1115_v20 = vand.u32 4294901760, %v1114_v25  ;;  %v1127_v32 = vand.u32 4294901760, %v1126_v12  ;;  %v2004_v5 = vand.u32 4294901760, %v2003_v9  ;;  %v2016_v10 = vand.u32 4294901760, %v2015_v15  ;;  %3180 = vmatprep.subr.bf16.mxu0 %v3988_v24 }
  0xbb   :  { %5342 = vst [vmem:[#allocation53_spill] sm:$0xff] %v4217_v60  ;;  %v1132_v58 = vsub.f32 %v5341_v21, %v5036_v2  ;;  %2986 = vmatpush1.bf16.msra.mxu1 %v3960_v27  ;;  %v5047_v51 = vand.u32 4294901760, %v5345_v57  ;;  %v5049_v61 = vand.u32 4294901760, %v5346_v44  ;;  %v4236_v9 = vpack.c.bf16 %v2010_v62, %v1998_v30  ;;  %v5348_v2 = vld [vmem:[#allocation59_spill] sm:$0xff]  ;;  %v5350_v30 = vld [vmem:[#allocation61_spill] sm:$0xff] }
  0xbc   :  { %2988 = vmatprep.subr.bf16.mxu1 %v3978_v31  ;;  %v1144_v12 = vsub.f32 %v5344_v49, %v5043_v6  ;;  %v5051_v17 = vand.u32 4294901760, %v5348_v2  ;;  %v5349_v31 = vand.u32 4294901760, %v5347_v19  ;;  %v5353_v49 = vand.u32 4294901760, %v3976_v56 }
  0xbd   :  { %v1133_v25 = vand.u32 4294901760, %v1132_v58  ;;  %v2021_v15 = vsub.f32 %v5345_v57, %v5047_v51  ;;  %v2033_v50 = vsub.f32 %v5346_v44, %v5049_v61  ;;  %v5052_v58 = vand.u32 4294901760, %v5350_v30  ;;  %v5351_v51 = vld [vmem:[#allocation66_spill] sm:$0xff] }
  0xbe   :  { %v1138_v62 = vsub.f32 %v5347_v19, %v5349_v31  ;;  %v1145_v24 = vand.u32 4294901760, %v1144_v12  ;;  %v1150_v6 = vsub.f32 %v5348_v2, %v5051_v17  ;;  %v5352_v57 = vld [vmem:[#allocation22_spill] sm:$0xff]  ;;  %v4259_v61 = vpack.c.bf16 %v1127_v32, %v1115_v20 }
  0xbf   :  { %2990 = vmatpush1.bf16.msra.mxu1 %v5351_v51  ;;  %3182 = vmatpush1.bf16.msra.mxu0 %v5352_v57  ;;  %v4261_v44 = vpack.c.bf16 %v2016_v10, %v2004_v5  ;;  %v2022_v31 = vand.u32 4294901760, %v2021_v15  ;;  %v2027_v12 = vsub.f32 %v5350_v30, %v5052_v58  ;;  %v2034_v17 = vand.u32 4294901760, %v2033_v50  ;;  %v5355_v15 = vld [vmem:[#allocation21_spill] sm:$0xff]  ;;  %v5356_v58 = vld [vmem:[#allocation64_spill] sm:$0xff] }
  0xc0   :  { %2992 = vmatprep.subr.bf16.mxu1 %v4016_v38  ;;  %3184 = vmatprep.subr.bf16.mxu0 %v4022_v23  ;;  %v1139_v27 = vand.u32 4294901760, %v1138_v62  ;;  %v2039_v51 = vsub.f32 %v3976_v56, %v5353_v49  ;;  %v5354_v32 = vand.u32 4294901760, %v3980_v3  ;;  %v4274_v5 = vpack.c.bf16 %v1145_v24, %v1133_v25  ;;  %v5357_v50 = vld [vmem:[#allocation65_spill] sm:$0xff] }
  0xc1   :  { %v1151_v10 = vand.u32 4294901760, %v1150_v6  ;;  %v5061_v57 = vand.u32 4294901760, %v5355_v15  ;;  %v5067_v30 = vand.u32 4294901760, %v5356_v58  ;;  %v2028_v38 = vand.u32 4294901760, %v2027_v12  ;;  %v5358_v6 = vld [vmem:[#allocation67_spill] sm:$0xff] }
  0xc2   :  { %v1156_v20 = vsub.f32 %v3980_v3, %v5354_v32  ;;  %v2040_v2 = vand.u32 4294901760, %v2039_v51  ;;  %v5072_v62 = vand.u32 4294901760, %v5357_v50  ;;  %v5074_v25 = vand.u32 4294901760, %v5358_v6  ;;  %v5359_v32 = vld [vmem:[#allocation68_spill] sm:$0xff] }
  0xc3   :  { %2994 = vmatpush1.bf16.msra.mxu1 %v4028_v46  ;;  %3186 = vmatpush1.bf16.msra.mxu0 %v4042_v26  ;;  %v1168_v49 = vsub.f32 %v5355_v15, %v5061_v57  ;;  %v2045_v24 = vsub.f32 %v5356_v58, %v5067_v30  ;;  %v4291_v51 = vpack.c.bf16 %v2034_v17, %v2022_v31  ;;  %v5360_v26 = vld [vmem:[#allocation69_spill] sm:$0xff]  ;;  %v5361_v46 = vld [vmem:[#allocation23_spill] sm:$0xff] }
  0xc4   :  { %v1157_v23 = vand.u32 4294901760, %v1156_v20  ;;  %2996 = vmatprep.subr.bf16.mxu1 %v4048_v40  ;;  %3188 = vmatprep.subr.bf16.mxu0 %v4054_v35  ;;  %v2057_v20 = vsub.f32 %v5357_v50, %v5072_v62  ;;  %v5076_v57 = vand.u32 4294901760, %v5360_v26  ;;  %v5077_v15 = vand.u32 4294901760, %v5361_v46  ;;  %v5363_v50 = vld [vmem:[#allocation71_spill] sm:$0xff] }
  0xc5   :  { %v1169_v3 = vand.u32 4294901760, %v1168_v49  ;;  %v2046_v30 = vand.u32 4294901760, %v2045_v24  ;;  %v1162_v12 = vsub.f32 %v5358_v6, %v5074_v25  ;;  %v5362_v40 = vand.u32 4294901760, %v5359_v32 }
  0xc6   :  { %v2058_v17 = vand.u32 4294901760, %v2057_v20  ;;  %v2051_v31 = vsub.f32 %v5360_v26, %v5076_v57  ;;  %v2063_v62 = vsub.f32 %v5361_v46, %v5077_v15  ;;  %v5088_v49 = vand.u32 4294901760, %v5363_v50  ;;  %v5364_v20 = vld [vmem:[#allocation72_spill] sm:$0xff] }
  0xc7   :  { %v1174_v35 = vsub.f32 %v5359_v32, %v5362_v40  ;;  %2998 = vmatpush1.bf16.msra.mxu1 %v4070_v28  ;;  %3190 = vmatpush1.bf16.msra.mxu0 %v4074_v45  ;;  %v4313_v24 = vpack.c.bf16 %v1151_v10, %v1139_v27  ;;  %v4315_v25 = vpack.c.bf16 %v2040_v2, %v2028_v38  ;;  %v5087_v32 = vand.u32 4294901760, %v5364_v20  ;;  %v5366_v38 = vld [vmem:[#allocation75_spill] sm:$0xff] }
  0xc8   :  { %v4317_v40 = vpack.c.bf16 %v1169_v3, %v1157_v23  ;;  %3000 = vmatprep.subr.bf16.mxu1 %v4080_v42  ;;  %3192 = vmatprep.subr.bf16.mxu0 %v4090_v7  ;;  %v1163_v57 = vand.u32 4294901760, %v1162_v12  ;;  %v2052_v46 = vand.u32 4294901760, %v2051_v31  ;;  %v1180_v28 = vsub.f32 %v5363_v50, %v5088_v49  ;;  %v5365_v3 = vld [vmem:[#allocation74_spill] sm:$0xff]  ;;  %v5367_v7 = vld [vmem:[#allocation77_spill] sm:$0xff]  ;;  %v5369_v49 = vld [vmem:[#allocation79_spill] sm:$0xff] }
  0xc9   :  { %v1175_v15 = vand.u32 4294901760, %v1174_v35  ;;  %v2064_v45 = vand.u32 4294901760, %v2063_v62  ;;  %v1192_v27 = vsub.f32 %v5364_v20, %v5087_v32  ;;  %v5089_v23 = vand.u32 4294901760, %v5365_v3 }
  0xca   :  { %v5095_v2 = vand.u32 4294901760, %v5366_v38  ;;  %v4330_v10 = vpack.c.bf16 %v2058_v17, %v2046_v30  ;;  %v1181_v42 = vand.u32 4294901760, %v1180_v28  ;;  %v5101_v12 = vand.u32 4294901760, %v5367_v7  ;;  %v5368_v30 = vld [vmem:[#allocation78_spill] sm:$0xff] }
  0xcb   :  { %v5102_v35 = vand.u32 4294901760, %v4040_v22  ;;  %3002 = vmatpush1.bf16.msra.mxu1 %v4100_v53  ;;  %3194 = vmatpush1.bf16.msra.mxu0 %v4106_v55  ;;  %v1193_v62 = vand.u32 4294901760, %v1192_v27  ;;  %v2069_v31 = vsub.f32 %v5365_v3, %v5089_v23  ;;  %v5105_v23 = vand.u32 4294901760, %v5369_v49  ;;  %v5370_v55 = vld [vmem:[#allocation81_spill] sm:$0xff] }
  0xcc   :  { %v2081_v32 = vsub.f32 %v5366_v38, %v5095_v2  ;;  %3004 = vmatprep.subr.bf16.mxu1 %v4116_v4  ;;  %3196 = vmatprep.subr.bf16.mxu0 %v4126_v59  ;;  %v1186_v28 = vsub.f32 %v5367_v7, %v5101_v12  ;;  %v5106_v53 = vand.u32 4294901760, %v5370_v55  ;;  %v4353_v3 = vpack.c.bf16 %v1175_v15, %v1163_v57  ;;  %v5373_v15 = vld [vmem:[#allocation84_spill] sm:$0xff] }
  0xcd   :  { %v1198_v27 = vsub.f32 %v4040_v22, %v5102_v35  ;;  %v4355_v2 = vpack.c.bf16 %v2064_v45, %v2052_v46  ;;  %v4357_v17 = vpack.c.bf16 %v1193_v62, %v1181_v42  ;;  %v5371_v59 = vand.u32 4294901760, %v5368_v30  ;;  %v5372_v42 = vld [vmem:[#allocation82_spill] sm:$0xff] }
  0xce   :  { %v2070_v38 = vand.u32 4294901760, %v2069_v31  ;;  %v2082_v12 = vand.u32 4294901760, %v2081_v32  ;;  %v2087_v35 = vsub.f32 %v5369_v49, %v5105_v23  ;;  %v1204_v22 = vsub.f32 %v5370_v55, %v5106_v53 }
  0xcf   :  { %v2075_v4 = vsub.f32 %v5368_v30, %v5371_v59  ;;  %3006 = vmatpush1.bf16.msra.mxu1 %v4132_v54  ;;  %3198 = vmatpush1.bf16.msra.mxu0 %v4142_v41  ;;  %v1187_v45 = vand.u32 4294901760, %v1186_v28  ;;  %v1199_v46 = vand.u32 4294901760, %v1198_v27  ;;  %v5117_v57 = vand.u32 4294901760, %v5372_v42  ;;  %v5374_v27 = vld [vmem:[#allocation26_spill] sm:$0xff]  ;;  %v5375_v54 = vld [vmem:[#allocation85_spill] sm:$0xff] }
  0xd0   :  { %v5118_v59 = vand.u32 4294901760, %v5373_v15  ;;  %3008 = vmatprep.subr.bf16.mxu1 %v4152_v36  ;;  %3200 = vmatprep.subr.bf16.mxu0 %v4159_v11  ;;  %v2088_v62 = vand.u32 4294901760, %v2087_v35  ;;  %v1205_v31 = vand.u32 4294901760, %v1204_v22  ;;  %v5119_v23 = vand.u32 4294901760, %v4066_v63  ;;  %v5377_v11 = vld [vmem:[#allocation88_spill] sm:$0xff] }
  0xd1   :  { %v2076_v32 = vand.u32 4294901760, %v2075_v4  ;;  %v1216_v53 = vsub.f32 %v5372_v42, %v5117_v57  ;;  %v5124_v41 = vand.u32 4294901760, %v5374_v27  ;;  %v4383_v36 = vpack.c.bf16 %v2082_v12, %v2070_v38  ;;  %v5376_v4 = vld [vmem:[#allocation87_spill] sm:$0xff] }
  0xd2   :  { %v2093_v28 = vsub.f32 %v5373_v15, %v5118_v59  ;;  %v2105_v22 = vsub.f32 %v4066_v63, %v5119_v23  ;;  %v5127_v35 = vand.u32 4294901760, %v5376_v4  ;;  %v5378_v38 = vand.u32 4294901760, %v5375_v54 }
  0xd3   :  { %3010 = vmatpush1.bf16.msra.mxu1 %v4169_v34  ;;  %3202 = vmatpush1.bf16.msra.mxu0 %v4178_v47  ;;  %v1217_v57 = vand.u32 4294901760, %v1216_v53  ;;  %v1210_v55 = vsub.f32 %v5374_v27, %v5124_v41  ;;  %v5379_v53 = vand.u32 4294901760, %v5377_v11  ;;  %v5380_v47 = vld [vmem:[#allocation90_spill] sm:$0xff]  ;;  %v4407_v41 = vpack.c.bf16 %v1199_v46, %v1187_v45 }
  0xd4   :  { %v2094_v59 = vand.u32 4294901760, %v2093_v28  ;;  %v1222_v12 = vsub.f32 %v5375_v54, %v5378_v38  ;;  %3012 = vmatprep.subr.bf16.mxu1 %v4222_v37  ;;  %3204 = vmatprep.subr.bf16.mxu0 %v4236_v9  ;;  %v2106_v23 = vand.u32 4294901760, %v2105_v22  ;;  %v2099_v49 = vsub.f32 %v5376_v4, %v5127_v35  ;;  %v5381_v37 = vld [vmem:[#allocation91_spill] sm:$0xff]  ;;  %v5382_v9 = vld [vmem:[#allocation42_spill] sm:$0xff] }
  0xd5   :  { %v2111_v28 = vsub.f32 %v5377_v11, %v5379_v53  ;;  %v5129_v34 = vand.u32 4294901760, %v5380_v47  ;;  %v4409_v27 = vpack.c.bf16 %v2088_v62, %v2076_v32  ;;  %v4411_v38 = vpack.c.bf16 %v1217_v57, %v1205_v31  ;;  %v5383_v57 = vld [vmem:[#allocation29_spill] sm:$0xff]  ;;  %v5384_v62 = vld [vmem:[#allocation92_spill] sm:$0xff] }
  0xd6   :  { %v5130_v54 = vand.u32 4294901760, %v5381_v37  ;;  %1099 = vmatmul.mubr.f32.vlgmr.msra.gmra.mrb[2].mxu1 %v5382_v9  ;;  %1988 = vmatmul.mubr.f32.vlgmr.msra.gmra.mrb[2].mxu0 %v5382_v9  ;;  %v1211_v22 = vand.u32 4294901760, %v1210_v55  ;;  %v1223_v35 = vand.u32 4294901760, %v1222_v12  ;;  %v2100_v4 = vand.u32 4294901760, %v2099_v49  ;;  %v5385_v12 = vld [vmem:[#allocation94_spill] sm:$0xff] }
  0xd7   :  { %v1228_v53 = vsub.f32 %v5380_v47, %v5129_v34  ;;  %3014 = vmatpush1.bf16.msra.mxu1 %v4259_v61  ;;  %3206 = vmatpush1.bf16.msra.mxu0 %v4261_v44  ;;  %v2112_v45 = vand.u32 4294901760, %v2111_v28  ;;  %v5134_v32 = vand.u32 4294901760, %v5383_v57  ;;  %v5133_v31 = vand.u32 4294901760, %v5384_v62  ;;  %v5386_v61 = vld [vmem:[#allocation95_spill] sm:$0xff] }
  0xd8   :  { %v1240_v46 = vsub.f32 %v5381_v37, %v5130_v54  ;;  %3016 = vmatprep.subr.bf16.mxu1 %v4274_v5  ;;  %3208 = vmatprep.subr.bf16.mxu0 %v4291_v51  ;;  %v3219_v55 = vpack.c.bf16 %v2106_v23, %v2094_v59  ;;  %v5136_v9 = vand.u32 4294901760, %v5385_v12  ;;  %v5137_v34 = vand.u32 4294901760, %v5386_v61  ;;  %v5387_v37 = vld [vmem:[#allocation97_spill] sm:$0xff]  ;;  %v5388_v23 = vld [vmem:[#allocation98_spill] sm:$0xff] }
  0xd9   :  { %v1229_v49 = vand.u32 4294901760, %v1228_v53  ;;  %v2117_v28 = vsub.f32 %v5383_v57, %v5134_v32  ;;  %v2129_v54 = vsub.f32 %v5384_v62, %v5133_v31  ;;  %v5138_v47 = vand.u32 4294901760, %v5387_v37  ;;  %1329 = vmatprep.mubr.f32.mxu1 %v5204_v14  ;;  %2218 = vmatprep.mubr.f32.mxu0 %v5204_v14  ;;  %v5389_v53 = vld [vmem:[#allocation99_spill] sm:$0xff] }
  0xda   :  { %v1241_v44 = vand.u32 4294901760, %v1240_v46  ;;  %v1234_v5 = vsub.f32 %v5385_v12, %v5136_v9  ;;  %v1246_v51 = vsub.f32 %v5386_v61, %v5137_v34  ;;  %v5141_v59 = vand.u32 4294901760, %v5388_v23 }
  0xdb   :  { %3018 = vmatpush1.bf16.msra.mxu1 %v4313_v24  ;;  %3210 = vmatpush1.bf16.msra.mxu0 %v4315_v25  ;;  %v3029_v31 = vpack.c.bf16 %v1223_v35, %v1211_v22  ;;  %v3221_v32 = vpack.c.bf16 %v2112_v45, %v2100_v4  ;;  %v2123_v62 = vsub.f32 %v5387_v37, %v5138_v47  ;;  %v2118_v34 = vand.u32 4294901760, %v2117_v28  ;;  %v5392_v28 = vld [vmem:[#allocation103_spill] sm:$0xff] }
  0xdc   :  { %3020 = vmatprep.subr.bf16.mxu1 %v4317_v40  ;;  %3212 = vmatprep.subr.bf16.mxu0 %v4330_v10  ;;  %v3031_v9 = vpack.c.bf16 %v1241_v44, %v1229_v49  ;;  %v2135_v46 = vsub.f32 %v5388_v23, %v5141_v59  ;;  %v5390_v24 = vand.u32 4294901760, %v5389_v53  ;;  %v2130_v35 = vand.u32 4294901760, %v2129_v54  ;;  %v5391_v10 = vld [vmem:[#allocation101_spill] sm:$0xff] }
  0xdd   :  { %v1235_v4 = vand.u32 4294901760, %v1234_v5  ;;  %v5140_v22 = vand.u32 4294901760, %v4124_v48  ;;  %v5144_v45 = vand.u32 4294901760, %v4128_v16  ;;  %v1247_v47 = vand.u32 4294901760, %v1246_v51 }
  0xde   :  { %v1252_v25 = vsub.f32 %v5389_v53, %v5390_v24  ;;  %v2124_v40 = vand.u32 4294901760, %v2123_v62  ;;  %v2136_v37 = vand.u32 4294901760, %v2135_v46  ;;  %v5145_v49 = vand.u32 4294901760, %v5391_v10  ;;  %v5393_v24 = vld [vmem:[#allocation104_spill] sm:$0xff]  ;;  %v5394_v46 = vld [vmem:[#allocation106_spill] sm:$0xff] }
  0xdf   :  { %3022 = vmatpush1.bf16.msra.mxu1 %v4353_v3  ;;  %3214 = vmatpush1.bf16.msra.mxu0 %v4355_v2  ;;  %v1264_v44 = vsub.f32 %v4124_v48, %v5140_v22  ;;  %v2141_v54 = vsub.f32 %v4128_v16, %v5144_v45  ;;  %v5147_v5 = vand.u32 4294901760, %v5392_v28  ;;  %v5149_v51 = vand.u32 4294901760, %v5393_v24 }
  0xe0   :  { %3024 = vmatprep.subr.bf16.mxu1 %v4357_v17  ;;  %3216 = vmatprep.subr.bf16.mxu0 %v4383_v36  ;;  %v1253_v62 = vand.u32 4294901760, %v1252_v25  ;;  %v2153_v3 = vsub.f32 %v5391_v10, %v5145_v49  ;;  %v5150_v2 = vand.u32 4294901760, %v4144_v13  ;;  %v5153_v22 = vand.u32 4294901760, %v5394_v46  ;;  %v5395_v10 = vld [vmem:[#allocation35_spill] sm:$0xff] }
  0xe1   :  { %v1265_v59 = vand.u32 4294901760, %v1264_v44  ;;  %v2142_v48 = vand.u32 4294901760, %v2141_v54  ;;  %v1258_v45 = vsub.f32 %v5392_v28, %v5147_v5  ;;  %v1270_v17 = vsub.f32 %v5393_v24, %v5149_v51 }
  0xe2   :  { %v2154_v36 = vand.u32 4294901760, %v2153_v3  ;;  %v2147_v25 = vsub.f32 %v4144_v13, %v5150_v2  ;;  %v2159_v49 = vsub.f32 %v5394_v46, %v5153_v22  ;;  %v5162_v44 = vand.u32 4294901760, %v5395_v10 }
  0xe3   :  { %3026 = vmatpush1.bf16.msra.mxu1 %v4407_v41  ;;  %3218 = vmatpush1.bf16.msra.mxu0 %v4409_v27  ;;  %v3223_v54 = vpack.c.bf16 %v2130_v35, %v2118_v34  ;;  %v3033_v5 = vpack.c.bf16 %v1247_v47, %v1235_v4  ;;  %v3225_v28 = vpack.c.bf16 %v2136_v37, %v2124_v40  ;;  %v5161_v51 = vand.u32 4294901760, %v4157_v33 }
  0xe4   :  { %3028 = vmatprep.subr.bf16.mxu1 %v4411_v38  ;;  %3220 = vmatprep.subr.bf16.mxu0 %v3219_v55  ;;  %v3035_v3 = vpack.c.bf16 %v1265_v59, %v1253_v62  ;;  %v1259_v2 = vand.u32 4294901760, %v1258_v45  ;;  %v1271_v13 = vand.u32 4294901760, %v1270_v17  ;;  %v1276_v22 = vsub.f32 %v5395_v10, %v5162_v44  ;;  %v5411_v44 = vld [vmem:[#allocation74_spill] sm:$0xff] }
  0xe5   :  { %v3227_v46 = vpack.c.bf16 %v2154_v36, %v2142_v48  ;;  %v1288_v41 = vsub.f32 %v4157_v33, %v5161_v51  ;;  %v5160_v34 = vand.u32 4294901760, %v4161_v39  ;;  %v5159_v47 = vand.u32 4294901760, %v4163_v52 }
  0xe6   :  { %v2148_v27 = vand.u32 4294901760, %v2147_v25  ;;  %v2160_v37 = vand.u32 4294901760, %v2159_v49  ;;  %v5156_v38 = vand.u32 4294901760, %v4171_v18  ;;  %v5155_v55 = vand.u32 4294901760, %v4173_v43 }
  0xe7   :  { %3030 = vmatpush1.bf16.msra.mxu1 %v3029_v31  ;;  %3222 = vmatpush1.bf16.msra.mxu0 %v3221_v32  ;;  %v1277_v59 = vand.u32 4294901760, %v1276_v22  ;;  %v2165_v48 = vsub.f32 %v4161_v39, %v5160_v34  ;;  %v2177_v35 = vsub.f32 %v4163_v52, %v5159_v47  ;;  %v5157_v4 = vand.u32 4294901760, %v4217_v60  ;;  %v5410_v47 = vld [vmem:[#allocation23_spill] sm:$0xff] }
  0xe8   :  { %3032 = vmatprep.subr.bf16.mxu1 %v3031_v9  ;;  %3224 = vmatprep.subr.bf16.mxu0 %v3223_v54  ;;  %v1289_v45 = vand.u32 4294901760, %v1288_v41  ;;  %v1282_v40 = vsub.f32 %v4171_v18, %v5156_v38  ;;  %v1294_v32 = vsub.f32 %v4173_v43, %v5155_v55  ;;  %v5158_v31 = vand.u32 4294901760, %v4219_v8 }
  0xe9   :  { %v2166_v22 = vand.u32 4294901760, %v2165_v48  ;;  %v2178_v49 = vand.u32 4294901760, %v2177_v35  ;;  %v2171_v62 = vsub.f32 %v4217_v60, %v5157_v4  ;;  %v3037_v17 = vpack.c.bf16 %v1271_v13, %v1259_v2  ;;  %v5396_v13 = vld [vmem:[#allocation44_spill] sm:$0xff] }
  0xea   :  { %v2183_v9 = vsub.f32 %v4219_v8, %v5158_v31  ;;  %v3229_v36 = vpack.c.bf16 %v2160_v37, %v2148_v27  ;;  %v1283_v25 = vand.u32 4294901760, %v1282_v40  ;;  %v1295_v54 = vand.u32 4294901760, %v1294_v32  ;;  %v5399_v37 = vld [vmem:[#allocation49_spill] sm:$0xff]  ;;  %v5402_v32 = vld [vmem:[#allocation56_spill] sm:$0xff]  ;;  %v5412_v8 = vld [vmem:[#allocation75_spill] sm:$0xff] }
  0xeb   :  { %3034 = vmatpush1.bf16.msra.mxu1 %v3033_v5  ;;  %3226 = vmatpush1.bf16.msra.mxu0 %v3225_v28  ;;  %v2172_v41 = vand.u32 4294901760, %v2171_v62  ;;  %v3039_v55 = vpack.c.bf16 %v1289_v45, %v1277_v59  ;;  %v3231_v48 = vpack.c.bf16 %v2178_v49, %v2166_v22  ;;  %v3043_v2 = vpack.c.bf16 %v5396_v13, %v3919_v1  ;;  %v5397_v5 = vld [vmem:[#allocation46_spill] sm:$0xff]  ;;  %v5398_v28 = vld [vmem:[#allocation47_spill] sm:$0xff] }
  0xec   :  { %3036 = vmatprep.subr.bf16.mxu1 %v3035_v3  ;;  %3228 = vmatprep.subr.bf16.mxu0 %v3227_v46  ;;  %v2184_v35 = vand.u32 4294901760, %v2183_v9  ;;  %v3041_v38 = vpack.c.bf16 %v1295_v54, %v1283_v25  ;;  %v3235_v27 = vpack.c.bf16 %v5398_v28, %v5397_v5  ;;  %v3045_v40 = vpack.c.bf16 %v3935_v0, %v5399_v37  ;;  %v5400_v46 = vld [vmem:[#allocation51_spill] sm:$0xff]  ;;  %v5401_v59 = vld [vmem:[#allocation54_spill] sm:$0xff]  ;;  %v5407_v25 = vld [vmem:[#allocation21_spill] sm:$0xff] }
  0xed   :  { %v3237_v3 = vpack.c.bf16 %v5400_v46, %v3939_v29  ;;  %v3047_v45 = vpack.c.bf16 %v5401_v59, %v5341_v21  ;;  %v5403_v22 = vld [vmem:[#allocation19_spill] sm:$0xff]  ;;  %v3245_v34 = vpack.c.bf16 %v5410_v47, %v5360_v26  ;;  %v3055_v51 = vpack.c.bf16 %v5364_v20, %v5363_v50 }
  0xee   :  { %v3233_v4 = vpack.c.bf16 %v2184_v35, %v2172_v41  ;;  %v3239_v49 = vpack.c.bf16 %v5403_v22, %v5402_v32  ;;  %v5408_v41 = vld [vmem:[#allocation65_spill] sm:$0xff]  ;;  %v5409_v35 = vld [vmem:[#allocation68_spill] sm:$0xff]  ;;  %v3247_v60 = vpack.c.bf16 %v5412_v8, %v5411_v44  ;;  %v5415_v18 = vand.u32 4294901760, %v5397_v5 }
  0xef   :  { %3038 = vmatpush1.bf16.msra.mxu1 %v3037_v17  ;;  %3230 = vmatpush1.bf16.msra.mxu0 %v3229_v36  ;;  %v5405_v17 = vld [vmem:[#allocation61_spill] sm:$0xff]  ;;  %v5406_v36 = vld [vmem:[#allocation62_spill] sm:$0xff]  ;;  %v3053_v31 = vpack.c.bf16 %v5409_v35, %v5358_v6  ;;  %v5416_v52 = vand.u32 4294901760, %v5398_v28  ;;  %v5419_v10 = vand.u32 4294901760, %v3939_v29  ;;  %v5422_v5 = vand.u32 4294901760, %v5401_v59 }
  0xf0   :  { %3040 = vmatprep.subr.bf16.mxu1 %v3039_v55  ;;  %3232 = vmatprep.subr.bf16.mxu0 %v3231_v48  ;;  %v5404_v55 = vld [vmem:[#allocation59_spill] sm:$0xff]  ;;  %v3241_v9 = vpack.c.bf16 %v3976_v56, %v5405_v17  ;;  %v3051_v54 = vpack.c.bf16 %v5407_v25, %v5406_v36  ;;  %v3243_v48 = vpack.c.bf16 %v5408_v41, %v5356_v58  ;;  %v5426_v29 = vand.u32 4294901760, %v5347_v19 }
  0xf1   :  { %v3049_v62 = vpack.c.bf16 %v5404_v55, %v5347_v19  ;;  %v4565_v39 = vpack.c.bf16 %v5416_v52, %v5415_v18  ;;  %v5423_v52 = vld [vmem:[#allocation33_spill] sm:$0xff]  ;;  %v5425_v18 = vand.u32 4294901760, %v5403_v22  ;;  %v5431_v22 = vand.u32 4294901760, %v5407_v25 }
  0xf2   :  { %v5432_v19 = vand.u32 4294901760, %v5356_v58  ;;  %v5439_v58 = vand.u32 4294901760, %v5363_v50  ;;  %v5440_v25 = vand.u32 4294901760, %v5364_v20  ;;  %v5449_v50 = vand.u32 4294901760, %v5368_v30  ;;  %v5450_v20 = vld [vmem:[#allocation79_spill] sm:$0xff] }
  0xf3   :  { %3042 = vmatpush1.bf16.msra.mxu1 %v3041_v38  ;;  %3234 = vmatpush1.bf16.msra.mxu0 %v3233_v4  ;;  %v5413_v38 = vand.u32 4294901760, %v3919_v1  ;;  %v5414_v4 = vand.u32 4294901760, %v5396_v13  ;;  %v5420_v1 = vand.u32 4294901760, %v5400_v46  ;;  %v5421_v13 = vand.u32 4294901760, %v5341_v21 }
  0xf4   :  { %3044 = vmatprep.subr.bf16.mxu1 %v3043_v2  ;;  %3236 = vmatprep.subr.bf16.mxu0 %v3235_v27  ;;  %v5417_v2 = vand.u32 4294901760, %v5399_v37  ;;  %v5418_v27 = vand.u32 4294901760, %v3935_v0  ;;  %v5424_v0 = vand.u32 4294901760, %v5402_v32  ;;  %v5428_v21 = vand.u32 4294901760, %v5405_v17 }
  0xf5   :  { %v4559_v43 = vpack.c.bf16 %v5414_v4, %v5413_v38  ;;  %v4577_v24 = vpack.c.bf16 %v5420_v1, %v5419_v10  ;;  %v4583_v38 = vpack.c.bf16 %v5422_v5, %v5421_v13  ;;  %v5427_v10 = vand.u32 4294901760, %v5404_v55 }
  0xf6   :  { %v4571_v33 = vpack.c.bf16 %v5418_v27, %v5417_v2  ;;  %1331 = vmatmul.mubr.f32.vlgmr.msra.gmra.mrb[2].mxu1 %v5423_v52  ;;  %2220 = vmatmul.mubr.f32.vlgmr.msra.gmra.mrb[2].mxu0 %v5423_v52  ;;  %v4591_v28 = vpack.c.bf16 %v5425_v18, %v5424_v0  ;;  %v5429_v46 = vand.u32 4294901760, %v3976_v56  ;;  %v5430_v32 = vand.u32 4294901760, %v5406_v36 }
  0xf7   :  { %v4597_v37 = vpack.c.bf16 %v5427_v10, %v5426_v29  ;;  %3046 = vmatpush1.bf16.msra.mxu1 %v3045_v40  ;;  %3238 = vmatpush1.bf16.msra.mxu0 %v3237_v3  ;;  %v5433_v55 = vand.u32 4294901760, %v5408_v41  ;;  %v5434_v17 = vand.u32 4294901760, %v5358_v6  ;;  %v5435_v56 = vand.u32 4294901760, %v5409_v35 }
  0xf8   :  { %v4603_v59 = vpack.c.bf16 %v5429_v46, %v5428_v21  ;;  %v4609_v4 = vpack.c.bf16 %v5431_v22, %v5430_v32  ;;  %3048 = vmatprep.subr.bf16.mxu1 %v3047_v45  ;;  %3240 = vmatprep.subr.bf16.mxu0 %v3239_v49  ;;  %v5436_v40 = vand.u32 4294901760, %v5360_v26  ;;  %v5437_v3 = vand.u32 4294901760, %v5410_v47  ;;  %v5446_v47 = vld [vmem:[#allocation24_spill] sm:$0xff]  ;;  %v5460_v46 = vld [vmem:[#allocation26_spill] sm:$0xff]  ;;  %v5462_v22 = vld [vmem:[#allocation85_spill] sm:$0xff] }
  0xf9   :  { %v4615_v2 = vpack.c.bf16 %v5433_v55, %v5432_v19  ;;  %v4621_v27 = vpack.c.bf16 %v5435_v56, %v5434_v17  ;;  %v4633_v41 = vpack.c.bf16 %v5440_v25, %v5439_v58  ;;  %v5442_v6 = vand.u32 4294901760, %v5411_v44  ;;  %1465 = vmatprep.mubr.f32.mxu1 %v5204_v14  ;;  %2354 = vmatprep.mubr.f32.mxu0 %v5204_v14  ;;  %v5453_v44 = vld [vmem:[#allocation81_spill] sm:$0xff]  ;;  %v5465_v17 = vld [vmem:[#allocation87_spill] sm:$0xff]  ;;  %v5469_v58 = vld [vmem:[#allocation90_spill] sm:$0xff] }
  0xfa   :  { %v4627_v36 = vpack.c.bf16 %v5437_v3, %v5436_v40  ;;  %v5443_v35 = vand.u32 4294901760, %v5412_v8  ;;  %v5445_v26 = vand.u32 4294901760, %v5367_v7  ;;  %v5447_v45 = vand.u32 4294901760, %v5446_v47 }
  0xfb   :  { %5441 = vst [vmem:[#allocation64_spill] sm:$0xff] %v4633_v41  ;;  %v5451_v13 = vand.u32 4294901760, %v5450_v20  ;;  %v5454_v8 = vand.u32 4294901760, %v5453_v44  ;;  %v5455_v0 = vand.u32 4294901760, %v5372_v42  ;;  %v5457_v29 = vand.u32 4294901760, %v5373_v15  ;;  %3050 = vmatpush1.bf16.msra.mxu1 %v3049_v62  ;;  %3242 = vmatpush1.bf16.msra.mxu0 %v3241_v9  ;;  %v5486_v9 = vld [vmem:[#allocation31_spill] sm:$0xff] }
  0xfc   :  { %5438 = vst [vmem:[#allocation58_spill] sm:$0xff] %v4627_v36  ;;  %v4639_v1 = vpack.c.bf16 %v5443_v35, %v5442_v6  ;;  %v4647_v49 = vpack.c.bf16 %v5447_v45, %v5445_v26  ;;  %v5458_v10 = vand.u32 4294901760, %v4066_v63  ;;  %v5461_v32 = vand.u32 4294901760, %v5460_v46  ;;  %v5471_v6 = vld [vmem:[#allocation91_spill] sm:$0xff]  ;;  %3052 = vmatprep.subr.bf16.mxu1 %v3051_v54  ;;  %3244 = vmatprep.subr.bf16.mxu0 %v3243_v48  ;;  %v5498_v54 = vld [vmem:[#allocation105_spill] sm:$0xff] }
  0xfd   :  { %v4653_v5 = vpack.c.bf16 %v5451_v13, %v5449_v50  ;;  %v4659_v18 = vpack.c.bf16 %v5455_v0, %v5454_v8  ;;  %v5463_v19 = vand.u32 4294901760, %v5462_v22  ;;  %v5466_v56 = vand.u32 4294901760, %v5465_v17  ;;  %v5475_v50 = vld [vmem:[#allocation92_spill] sm:$0xff] }
  0xfe   :  { %5444 = vst [vmem:[#allocation67_spill] sm:$0xff] %v4639_v1  ;;  %5448 = vst [vmem:[#allocation69_spill] sm:$0xff] %v4647_v49  ;;  %v4665_v21 = vpack.c.bf16 %v5458_v10, %v5457_v29  ;;  %v5467_v40 = vand.u32 4294901760, %v5377_v11  ;;  %v5470_v25 = vand.u32 4294901760, %v5469_v58  ;;  %v5472_v35 = vand.u32 4294901760, %v5471_v6 }
  0xff   :  { %5452 = vst [vmem:[#allocation71_spill] sm:$0xff] %v4653_v5  ;;  %5456 = vst [vmem:[#allocation72_spill] sm:$0xff] %v4659_v18  ;;  %v4671_v55 = vpack.c.bf16 %v5463_v19, %v5461_v32  ;;  %v5474_v45 = vand.u32 4294901760, %v5383_v57  ;;  %v5476_v13 = vand.u32 4294901760, %v5475_v50  ;;  %v5478_v0 = vand.u32 4294901760, %v5385_v12  ;;  %v5481_v32 = vld [vmem:[#allocation97_spill] sm:$0xff]  ;;  %3054 = vmatpush1.bf16.msra.mxu1 %v3053_v31  ;;  %3246 = vmatpush1.bf16.msra.mxu0 %v3245_v34 }
 0x100   :  { %5459 = vst [vmem:[#allocation77_spill] sm:$0xff] %v4665_v21  ;;  %v4677_v3 = vpack.c.bf16 %v5467_v40, %v5466_v56  ;;  %v4683_v26 = vpack.c.bf16 %v5472_v35, %v5470_v25  ;;  %v5479_v29 = vand.u32 4294901760, %v5386_v61  ;;  %v5482_v19 = vand.u32 4294901760, %v5481_v32  ;;  %3056 = vmatprep.subr.bf16.mxu1 %v3055_v51  ;;  %3248 = vmatprep.subr.bf16.mxu0 %v3247_v60  ;;  %v5520_v51 = vld [vmem:[#allocation45_spill] sm:$0xff] }
 0x101   :  { %5464 = vst [vmem:[#allocation78_spill] sm:$0xff] %v4671_v55  ;;  %v4689_v8 = vpack.c.bf16 %v5476_v13, %v5474_v45  ;;  %v5483_v56 = vand.u32 4294901760, %v5388_v23  ;;  %v5485_v62 = vand.u32 4294901760, %v5389_v53  ;;  %v5487_v25 = vand.u32 4294901760, %v5486_v9  ;;  %v5490_v13 = vld [vmem:[#allocation101_spill] sm:$0xff] }
 0x102   :  { %5468 = vst [vmem:[#allocation82_spill] sm:$0xff] %v4677_v3  ;;  %5473 = vst [vmem:[#allocation84_spill] sm:$0xff] %v4683_v26  ;;  %v4695_v10 = vpack.c.bf16 %v5479_v29, %v5478_v0  ;;  %v5489_v45 = vand.u32 4294901760, %v4128_v16  ;;  %v5491_v52 = vand.u32 4294901760, %v5490_v13  ;;  %v5493_v29 = vld [vmem:[#allocation103_spill] sm:$0xff]  ;;  %v5499_v48 = vand.u32 4294901760, %v5498_v54 }
 0x103   :  { %5477 = vst [vmem:[#allocation88_spill] sm:$0xff] %v4689_v8  ;;  %v4701_v40 = vpack.c.bf16 %v5483_v56, %v5482_v19  ;;  %v4707_v35 = vpack.c.bf16 %v5487_v25, %v5485_v62  ;;  %v5495_v8 = vld [vmem:[#allocation104_spill] sm:$0xff]  ;;  %v5500_v56 = vld [vmem:[#allocation106_spill] sm:$0xff]  ;;  %v5503_v62 = vld [vmem:[#allocation35_spill] sm:$0xff]  ;;  %v3061_v31 = vpack.c.bf16 %v5462_v22, %v5460_v46  ;;  %v3253_v34 = vpack.c.bf16 %v5377_v11, %v5465_v17 }
 0x104   :  { %5480 = vst [vmem:[#allocation42_spill] sm:$0xff] %v4695_v10  ;;  %v4713_v0 = vpack.c.bf16 %v5491_v52, %v5489_v45  ;;  %v5494_v10 = vand.u32 4294901760, %v5493_v29  ;;  %v5496_v26 = vand.u32 4294901760, %v5495_v8  ;;  %v5504_v25 = vand.u32 4294901760, %v5503_v62  ;;  %v5507_v52 = vld [vmem:[#allocation108_spill] sm:$0xff]  ;;  %v5525_v46 = vld [vmem:[#allocation55_spill] sm:$0xff] }
 0x105   :  { %5484 = vst [vmem:[#allocation29_spill] sm:$0xff] %v4701_v40  ;;  %5488 = vst [vmem:[#allocation94_spill] sm:$0xff] %v4707_v35  ;;  %v5501_v40 = vand.u32 4294901760, %v5500_v56  ;;  %v5505_v35 = vld [vmem:[#allocation34_spill] sm:$0xff]  ;;  %v5508_v45 = vand.u32 4294901760, %v5507_v52  ;;  %v3255_v60 = vpack.c.bf16 %v5475_v50, %v5383_v57  ;;  %v3067_v11 = vpack.c.bf16 %v5486_v9, %v5389_v53  ;;  %v5519_v53 = vld [vmem:[#allocation43_spill] sm:$0xff] }
 0x106   :  { %5492 = vst [vmem:[#allocation95_spill] sm:$0xff] %v4713_v0  ;;  %v4719_v19 = vpack.c.bf16 %v5496_v26, %v5494_v10  ;;  %v5506_v55 = vand.u32 4294901760, %v5505_v35  ;;  %v5509_v0 = vld [vmem:[#allocation109_spill] sm:$0xff]  ;;  %v5511_v26 = vld [vmem:[#allocation38_spill] sm:$0xff]  ;;  %v3261_v57 = vpack.c.bf16 %v5500_v56, %v5498_v54  ;;  %v5527_v17 = vld [vmem:[#allocation60_spill] sm:$0xff] }
 0x107   :  { %v4725_v3 = vpack.c.bf16 %v5501_v40, %v5499_v48  ;;  %v5510_v18 = vand.u32 4294901760, %v5509_v0  ;;  %v5512_v10 = vand.u32 4294901760, %v5511_v26  ;;  %v5515_v40 = vld [vmem:[#allocation53_spill] sm:$0xff]  ;;  %v5531_v50 = vld [vmem:[#allocation22_spill] sm:$0xff]  ;;  %v5534_v9 = vld [vmem:[#allocation76_spill] sm:$0xff] }
 0x108   :  { %5497 = vst [vmem:[#allocation98_spill] sm:$0xff] %v4719_v19  ;;  %v4731_v21 = vpack.c.bf16 %v5506_v55, %v5504_v25  ;;  %v5513_v19 = vld [vmem:[#allocation37_spill] sm:$0xff]  ;;  %v5516_v48 = vand.u32 4294901760, %v5515_v40  ;;  %v3057_v55 = vpack.c.bf16 %v5446_v47, %v5367_v7  ;;  %v3251_v25 = vpack.c.bf16 %v4066_v63, %v5373_v15  ;;  %v5522_v47 = vld [vmem:[#allocation48_spill] sm:$0xff] }
 0x109   :  { %5502 = vst [vmem:[#allocation99_spill] sm:$0xff] %v4725_v3  ;;  %v4737_v5 = vpack.c.bf16 %v5510_v18, %v5508_v45  ;;  %v5514_v49 = vand.u32 4294901760, %v5513_v19  ;;  %v5517_v3 = vld [vmem:[#allocation111_spill] sm:$0xff]  ;;  %v3249_v18 = vpack.c.bf16 %v5450_v20, %v5368_v30  ;;  %v3063_v7 = vpack.c.bf16 %v5471_v6, %v5469_v58  ;;  %v5523_v20 = vld [vmem:[#allocation50_spill] sm:$0xff]  ;;  %v5526_v22 = vld [vmem:[#allocation57_spill] sm:$0xff] }
 0x10a   :  { %v5518_v41 = vand.u32 4294901760, %v5517_v3  ;;  %3058 = vmatpush1.bf16.msra.mxu1 %v3057_v55  ;;  %v3065_v63 = vpack.c.bf16 %v5386_v61, %v5385_v12  ;;  %v3257_v30 = vpack.c.bf16 %v5388_v23, %v5481_v32  ;;  %v3069_v15 = vpack.c.bf16 %v5495_v8, %v5493_v29  ;;  %v5529_v58 = vld [vmem:[#allocation63_spill] sm:$0xff]  ;;  %v5530_v6 = vld [vmem:[#allocation66_spill] sm:$0xff]  ;;  %v5533_v32 = vld [vmem:[#allocation73_spill] sm:$0xff] }
 0x10b   :  { %v4743_v1 = vpack.c.bf16 %v5514_v49, %v5512_v10  ;;  %v3059_v49 = vpack.c.bf16 %v5372_v42, %v5453_v44  ;;  %3250 = vmatpush1.bf16.msra.mxu0 %v3249_v18  ;;  %v3259_v42 = vpack.c.bf16 %v5490_v13, %v4128_v16  ;;  %v3071_v12 = vpack.c.bf16 %v5505_v35, %v5503_v62  ;;  %v5524_v44 = vld [vmem:[#allocation52_spill] sm:$0xff]  ;;  %v5532_v8 = vld [vmem:[#allocation70_spill] sm:$0xff]  ;;  %v5535_v35 = vld [vmem:[#allocation25_spill] sm:$0xff] }
 0x10c   :  { %v4749_v36 = vpack.c.bf16 %v5518_v41, %v5516_v48  ;;  %3252 = vmatprep.subr.bf16.mxu0 %v3251_v25  ;;  %v3263_v61 = vpack.c.bf16 %v5509_v0, %v5507_v52  ;;  %v3073_v16 = vpack.c.bf16 %v5513_v19, %v5511_v26  ;;  %v3265_v23 = vpack.c.bf16 %v5517_v3, %v5515_v40  ;;  %v5521_v41 = vld [vmem:[#allocation40_spill] sm:$0xff]  ;;  %v5537_v0 = vld [vmem:[#allocation83_spill] sm:$0xff]  ;;  %v5539_v19 = vld [vmem:[#allocation86_spill] sm:$0xff] }
 0x10d   :  { %3060 = vmatprep.subr.bf16.mxu1 %v3059_v49  ;;  %v5528_v3 = vld [vmem:[#allocation20_spill] sm:$0xff]  ;;  %v5538_v29 = vld [vmem:[#allocation27_spill] sm:$0xff]  ;;  %v5540_v54 = vld [vmem:[#allocation89_spill] sm:$0xff] }
 0x10e   :  { %3062 = vmatpush1.bf16.msra.mxu1 %v3061_v31  ;;  %v5536_v13 = vld [vmem:[#allocation80_spill] sm:$0xff]  ;;  %v5542_v62 = vld [vmem:[#allocation93_spill] sm:$0xff]  ;;  %v5544_v45 = vld [vmem:[#allocation30_spill] sm:$0xff] }
 0x10f   :  { %3254 = vmatpush1.bf16.msra.mxu0 %v3253_v34  ;;  %3064 = vmatprep.subr.bf16.mxu1 %v3063_v7  ;;  %v5541_v56 = vld [vmem:[#allocation28_spill] sm:$0xff]  ;;  %v5546_v10 = vld [vmem:[#allocation102_spill] sm:$0xff]  ;;  %v5549_v55 = vld [vmem:[#allocation107_spill] sm:$0xff] }
 0x110   :  { %3256 = vmatprep.subr.bf16.mxu0 %v3255_v60  ;;  %v5543_v52 = vld [vmem:[#allocation96_spill] sm:$0xff]  ;;  %v5550_v18 = vld [vmem:[#allocation39_spill] sm:$0xff]  ;;  %v5551_v49 = vld [vmem:[#allocation110_spill] sm:$0xff] }
 0x111   :  { %v5545_v26 = vld [vmem:[#allocation100_spill] sm:$0xff]  ;;  %v5552_v25 = vld [vmem:[#allocation41_spill] sm:$0xff]  ;;  %v5564_v31 = vld [vmem:[#allocation42_spill] sm:$0xff] }
 0x112   :  { %3066 = vmatpush1.bf16.msra.mxu1 %v3065_v63  ;;  %v5547_v40 = vld [vmem:[#allocation32_spill] sm:$0xff]  ;;  %v5565_v34 = vld [vmem:[#allocation29_spill] sm:$0xff]  ;;  %v5566_v7 = vld [vmem:[#allocation94_spill] sm:$0xff] }
 0x113   :  { %3258 = vmatpush1.bf16.msra.mxu0 %v3257_v30  ;;  %3068 = vmatprep.subr.bf16.mxu1 %v3067_v11  ;;  %v5548_v48 = vld [vmem:[#allocation36_spill] sm:$0xff]  ;;  %v5567_v60 = vld [vmem:[#allocation95_spill] sm:$0xff]  ;;  %v5568_v63 = vld [vmem:[#allocation98_spill] sm:$0xff] }
 0x114   :  { %3260 = vmatprep.subr.bf16.mxu0 %v3259_v42  ;;  %v5569_v30 = vld [vmem:[#allocation99_spill] sm:$0xff]  ;;  %v5570_v11 = vld [vmem:[#allocation33_spill] sm:$0xff] }
 0x116   :  { %3070 = vmatpush1.bf16.msra.mxu1 %v3069_v15 }
 0x117   :  { %3262 = vmatpush1.bf16.msra.mxu0 %v3261_v57  ;;  %3072 = vmatprep.subr.bf16.mxu1 %v3071_v12 }
 0x118   :  { %3264 = vmatprep.subr.bf16.mxu0 %v3263_v61 }
 0x11a   :  { %3074 = vmatpush1.bf16.msra.mxu1 %v3073_v16 }
 0x11b   :  { %3266 = vmatpush1.bf16.msra.mxu0 %v3265_v23  ;;  %3076 = vmatprep.subr.bf16.mxu1 %v5519_v53 }
 0x11c   :  { %3268 = vmatprep.subr.bf16.mxu0 %v5520_v51 }
 0x11d   :  { %1468 = vmatmul.mubr.f32.vlgmr.msra.gmra.mrb[2].mxu1 %v5521_v41 }
 0x11e   :  { %2357 = vmatmul.mubr.f32.vlgmr.msra.gmra.mrb[2].mxu0 %v5521_v41  ;;  %3078 = vmatpush1.bf16.msra.mxu1 %v5522_v47 }
 0x11f   :  { %3270 = vmatpush1.bf16.msra.mxu0 %v5523_v20  ;;  %3080 = vmatprep.subr.bf16.mxu1 %v5524_v44 }
 0x120   :  { %3272 = vmatprep.subr.bf16.mxu0 %v5525_v46  ;;  %1570 = vmatprep.mubr.f32.mxu1 %v5204_v14 }
 0x121   :  { %2459 = vmatprep.mubr.f32.mxu0 %v5204_v14 }
 0x122   :  { %3082 = vmatpush1.bf16.msra.mxu1 %v5526_v22 }
 0x123   :  { %3274 = vmatpush1.bf16.msra.mxu0 %v5527_v17  ;;  %3084 = vmatprep.subr.bf16.mxu1 %v5528_v3 }
 0x124   :  { %3276 = vmatprep.subr.bf16.mxu0 %v5529_v58 }
 0x126   :  { %3086 = vmatpush1.bf16.msra.mxu1 %v5530_v6 }
 0x127   :  { %3278 = vmatpush1.bf16.msra.mxu0 %v5531_v50  ;;  %3088 = vmatprep.subr.bf16.mxu1 %v5532_v8 }
 0x128   :  { %3280 = vmatprep.subr.bf16.mxu0 %v5533_v32 }
 0x12a   :  { %3090 = vmatpush1.bf16.msra.mxu1 %v5534_v9 }
 0x12b   :  { %3282 = vmatpush1.bf16.msra.mxu0 %v5535_v35  ;;  %3092 = vmatprep.subr.bf16.mxu1 %v5536_v13 }
 0x12c   :  { %3284 = vmatprep.subr.bf16.mxu0 %v5537_v0 }
 0x12e   :  { %3094 = vmatpush1.bf16.msra.mxu1 %v5538_v29 }
 0x12f   :  { %3286 = vmatpush1.bf16.msra.mxu0 %v5539_v19  ;;  %3096 = vmatprep.subr.bf16.mxu1 %v5540_v54 }
 0x130   :  { %3288 = vmatprep.subr.bf16.mxu0 %v5541_v56 }
 0x132   :  { %3098 = vmatpush1.bf16.msra.mxu1 %v5542_v62 }
 0x133   :  { %3290 = vmatpush1.bf16.msra.mxu0 %v5543_v52  ;;  %3100 = vmatprep.subr.bf16.mxu1 %v5544_v45 }
 0x134   :  { %3292 = vmatprep.subr.bf16.mxu0 %v5545_v26 }
 0x136   :  { %3102 = vmatpush1.bf16.msra.mxu1 %v5546_v10 }
 0x137   :  { %3294 = vmatpush1.bf16.msra.mxu0 %v5547_v40  ;;  %3104 = vmatprep.subr.bf16.mxu1 %v5548_v48 }
 0x138   :  { %3296 = vmatprep.subr.bf16.mxu0 %v5549_v55 }
 0x13a   :  { %3106 = vmatpush1.bf16.msra.mxu1 %v5550_v18 }
 0x13b   :  { %3298 = vmatpush1.bf16.msra.mxu0 %v5551_v49  ;;  %3108 = vmatprep.subr.bf16.mxu1 %v4559_v43  ;;  %v5553_v43 = vld [vmem:[#allocation58_spill] sm:$0xff] }
 0x13c   :  { %3300 = vmatprep.subr.bf16.mxu0 %v4565_v39  ;;  %v5555_v39 = vld [vmem:[#allocation67_spill] sm:$0xff] }
 0x13d   :  { %1574 = vmatmul.mubr.f32.vlgmr.msra.gmra.mrb[2].mxu1 %v5552_v25 }
 0x13e   :  { %2463 = vmatmul.mubr.f32.vlgmr.msra.gmra.mrb[2].mxu0 %v5552_v25  ;;  %3110 = vmatpush1.bf16.msra.mxu1 %v4571_v33  ;;  %v5554_v33 = vld [vmem:[#allocation64_spill] sm:$0xff] }
 0x13f   :  { %3302 = vmatpush1.bf16.msra.mxu0 %v4577_v24  ;;  %3112 = vmatprep.subr.bf16.mxu1 %v4583_v38  ;;  %v5556_v24 = vld [vmem:[#allocation69_spill] sm:$0xff]  ;;  %v5557_v38 = vld [vmem:[#allocation71_spill] sm:$0xff] }
 0x140   :  { %3304 = vmatprep.subr.bf16.mxu0 %v4591_v28  ;;  %1740 = vmatprep.mubr.f32.mxu1 %v5204_v14  ;;  %v5558_v28 = vld [vmem:[#allocation72_spill] sm:$0xff] }
 0x141   :  { %2629 = vmatprep.mubr.f32.mxu0 %v5204_v14 }
 0x142   :  { %3114 = vmatpush1.bf16.msra.mxu1 %v4597_v37  ;;  %v5559_v37 = vld [vmem:[#allocation77_spill] sm:$0xff] }
 0x143   :  { %3306 = vmatpush1.bf16.msra.mxu0 %v4603_v59  ;;  %3116 = vmatprep.subr.bf16.mxu1 %v4609_v4  ;;  %v5560_v59 = vld [vmem:[#allocation78_spill] sm:$0xff] }
 0x144   :  { %3308 = vmatprep.subr.bf16.mxu0 %v4615_v2  ;;  %v5561_v4 = vld [vmem:[#allocation82_spill] sm:$0xff]  ;;  %v5562_v2 = vld [vmem:[#allocation84_spill] sm:$0xff] }
 0x146   :  { %3118 = vmatpush1.bf16.msra.mxu1 %v4621_v27  ;;  %v5563_v27 = vld [vmem:[#allocation88_spill] sm:$0xff] }
 0x147   :  { %3310 = vmatpush1.bf16.msra.mxu0 %v5553_v43  ;;  %3120 = vmatprep.subr.bf16.mxu1 %v5554_v33 }
 0x148   :  { %3312 = vmatprep.subr.bf16.mxu0 %v5555_v39 }
 0x14a   :  { %3122 = vmatpush1.bf16.msra.mxu1 %v5556_v24 }
 0x14b   :  { %3314 = vmatpush1.bf16.msra.mxu0 %v5557_v38  ;;  %3124 = vmatprep.subr.bf16.mxu1 %v5558_v28 }
 0x14c   :  { %3316 = vmatprep.subr.bf16.mxu0 %v5559_v37 }
 0x14e   :  { %3126 = vmatpush1.bf16.msra.mxu1 %v5560_v59 }
 0x14f   :  { %3318 = vmatpush1.bf16.msra.mxu0 %v5561_v4  ;;  %3128 = vmatprep.subr.bf16.mxu1 %v5562_v2 }
 0x150   :  { %3320 = vmatprep.subr.bf16.mxu0 %v5563_v27 }
 0x152   :  { %3130 = vmatpush1.bf16.msra.mxu1 %v5564_v31 }
 0x153   :  { %3322 = vmatpush1.bf16.msra.mxu0 %v5565_v34  ;;  %3132 = vmatprep.subr.bf16.mxu1 %v5566_v7 }
 0x154   :  { %3324 = vmatprep.subr.bf16.mxu0 %v5567_v60 }
 0x156   :  { %3134 = vmatpush1.bf16.msra.mxu1 %v5568_v63 }
 0x157   :  { %3326 = vmatpush1.bf16.msra.mxu0 %v5569_v30  ;;  %3136 = vmatprep.subr.bf16.mxu1 %v4731_v21 }
 0x158   :  { %3328 = vmatprep.subr.bf16.mxu0 %v4737_v5 }
 0x15a   :  { %3138 = vmatpush1.bf16.msra.mxu1 %v4743_v1 }
 0x15b   :  { %3330 = vmatpush1.bf16.msra.mxu0 %v4749_v36  ;;  %3140 = vmatprep.subr.bf16.mxu1 %v5519_v53 }
 0x15c   :  { %3332 = vmatprep.subr.bf16.mxu0 %v5520_v51 }
 0x15d   :  { %1742 = vmatmul.mubr.f32.vlgmr.msra.gmra.mrb[2].mxu1 %v5570_v11 }
 0x15e   :  { %2631 = vmatmul.mubr.f32.vlgmr.msra.gmra.mrb[2].mxu0 %v5570_v11  ;;  %3142 = vmatpush1.bf16.msra.mxu1 %v5522_v47 }
 0x15f   :  { %3334 = vmatpush1.bf16.msra.mxu0 %v5523_v20  ;;  %3144 = vmatprep.subr.bf16.mxu1 %v5524_v44 }
 0x160   :  { %3336 = vmatprep.subr.bf16.mxu0 %v5525_v46  ;;  %1844 = vmatprep.mubr.f32.mxu1 %v5204_v14 }
 0x161   :  { %2733 = vmatprep.mubr.f32.mxu0 %v5204_v14 }
 0x162   :  { %3146 = vmatpush1.bf16.msra.mxu1 %v5526_v22 }
 0x163   :  { %3338 = vmatpush1.bf16.msra.mxu0 %v5527_v17  ;;  %3148 = vmatprep.subr.bf16.mxu1 %v5528_v3 }
 0x164   :  { %3340 = vmatprep.subr.bf16.mxu0 %v5529_v58 }
 0x166   :  { %3150 = vmatpush1.bf16.msra.mxu1 %v5530_v6 }
 0x167   :  { %3342 = vmatpush1.bf16.msra.mxu0 %v5531_v50  ;;  %3152 = vmatprep.subr.bf16.mxu1 %v5532_v8 }
 0x168   :  { %3344 = vmatprep.subr.bf16.mxu0 %v5533_v32 }
 0x16a   :  { %3154 = vmatpush1.bf16.msra.mxu1 %v5534_v9 }
 0x16b   :  { %3346 = vmatpush1.bf16.msra.mxu0 %v5535_v35  ;;  %3156 = vmatprep.subr.bf16.mxu1 %v5536_v13 }
 0x16c   :  { %3348 = vmatprep.subr.bf16.mxu0 %v5537_v0 }
 0x16e   :  { %3158 = vmatpush1.bf16.msra.mxu1 %v5538_v29 }
 0x16f   :  { %3350 = vmatpush1.bf16.msra.mxu0 %v5539_v19  ;;  %3160 = vmatprep.subr.bf16.mxu1 %v5540_v54 }
 0x170   :  { %3352 = vmatprep.subr.bf16.mxu0 %v5541_v56 }
 0x172   :  { %3162 = vmatpush1.bf16.msra.mxu1 %v5542_v62 }
 0x173   :  { %3354 = vmatpush1.bf16.msra.mxu0 %v5543_v52  ;;  %3164 = vmatprep.subr.bf16.mxu1 %v5544_v45 }
 0x174   :  { %3356 = vmatprep.subr.bf16.mxu0 %v5545_v26 }
 0x176   :  { %3166 = vmatpush1.bf16.msra.mxu1 %v5546_v10 }
 0x177   :  { %3358 = vmatpush1.bf16.msra.mxu0 %v5547_v40  ;;  %3168 = vmatprep.subr.bf16.mxu1 %v5548_v48 }
 0x178   :  { %3360 = vmatprep.subr.bf16.mxu0 %v5549_v55 }
 0x17a   :  { %3170 = vmatpush1.bf16.msra.mxu1 %v5550_v18 }
 0x17b   :  { %3362 = vmatpush1.bf16.msra.mxu0 %v5551_v49 }
 0x17d   :  { %1846 = vmatmul.mubr.f32.vlgmr.msra.gmra.mrb[2].mxu1 %v5570_v11 }
 0x17e   :  { %2735 = vmatmul.mubr.f32.vlgmr.msra.gmra.mrb[2].mxu0 %v5570_v11 }
 0x187   :  { %v958_v36 = vpop.f32.mrb[0].mxu0 }
 0x188   :  { %v960_v21 = vpop.f32.mrb[1].mxu0 }
 0x189   :  { %v580_v14 = vpop.f32.mrb[0].mxu1 }
 0x18a   :  { %v3363_v1 = vadd.f32 %v958_v36, %v580_v14  ;;  %v582_v5 = vpop.f32.mrb[1].mxu1 }
 0x18b   :  { %v3364_v42 = vadd.f32 %v960_v21, %v582_v5 }
 0x18c   :  { %963 = vst [vmem:[#allocation10] sm:$0xff] %v3363_v1 }
 0x18d   :  { %964 = vst [vmem:[#allocation10 + $0x8] sm:$0xff] %v3364_v42 }
 0x18e   :  { %3502 = shalt.err (!%p3499_p8)
}
 0x18f   :  { %s3503_s23 = scalar_lea.hbm %s4937_s4, 256 }
 0x190   :  { %p3504_p9 = scmp.ne.s32.totalorder %s4937_s4, %s3503_s23  ;;  %p3507_p10 = scmp.lt.u32.totalorder %s3503_s23, %s4937_s4 }
 0x192   :  { %p3509_p11 = pnand %p3507_p10, %p3504_p9 }
 0x194   :  { %3512 = shalt.err (!%p3509_p11)
}
 0x195   :  { %2752 = dma.vmem_to_hbm [thread:$0]  %s2750_s7, 256, %s4937_s4, [#allocation4]  }
 0x196   :  { %s3575_s30 = smov [#allocation11]   ;;  %s3576_s0 = smov [#allocation13]  }
 0x197   :  { %s2759_s9 = sshll.u32 %s3575_s30, 4  ;;  %s2769_s10 = sshll.u32 %s3576_s0, 4  ;;  %s2760_s9 = int_to_ptr.vmem [resolvable:$true] %s2759_s9  ;;  %s2770_s10 = int_to_ptr.vmem [resolvable:$true] %s2769_s10 }
 0x198   :  { %s3513_s11 = scalar_lea.vmem %s2760_s9, 256  ;;  %p3518_p13 = scmp.lt.s32.totalorder %s2760_s9, %s2760_s9 }
 0x199   :  { %p3514_p12 = scmp.ne.s32.totalorder %s2760_s9, %s3513_s11  ;;  %p3519_p0 = scmp.lt.s32.totalorder %s3513_s11, %s3513_s11 }
 0x19b   :  { %p3520_p1 = por %p3519_p0, %p3518_p13 }
 0x19d   :  { %p3521_p2 = pnand %p3520_p1, %p3514_p12 }
 0x250   :  { %v1847_v15 = vpop.f32.mrb[2].mxu1 }
 0x251   :  { %v2736_v57 = vpop.f32.mrb[2].mxu0  ;;  %1852 = vst [vmem:[#allocation11] sm:$0xff] %v1847_v15  ;;  %v1849_v12 = vpop.f32.mrb[3].mxu1 }
 0x252   :  { %2741 = vst [vmem:[#allocation13] sm:$0xff] %v2736_v57  ;;  %v2738_v61 = vpop.f32.mrb[3].mxu0  ;;  %1853 = vst [vmem:[#allocation11 + $0x8] sm:$0xff] %v1849_v12 }
 0x253   :  { %2742 = vst [vmem:[#allocation13 + $0x8] sm:$0xff] %v2738_v61 }
 0x254   :  { %3524 = shalt.err (!%p3521_p2)
}
 0x255   :  { %s3525_s13 = scalar_lea.hbm %s4938_s5, 256 }
 0x256   :  { %p3526_p3 = scmp.ne.s32.totalorder %s4938_s5, %s3525_s13  ;;  %p3529_p4 = scmp.lt.u32.totalorder %s3525_s13, %s4938_s5 }
 0x258   :  { %p3531_p5 = pnand %p3529_p4, %p3526_p3 }
 0x25a   :  { %3534 = shalt.err (!%p3531_p5)
}
 0x25b   :  { %2762 = dma.vmem_to_hbm [thread:$0]  %s2760_s9, 256, %s4938_s5, [#allocation12]  }
 0x25c   :  { %s3535_s21 = scalar_lea.vmem %s2770_s10, 256  ;;  %p3540_p7 = scmp.lt.s32.totalorder %s2770_s10, %s2770_s10 }
 0x25d   :  { %p3536_p6 = scmp.ne.s32.totalorder %s2770_s10, %s3535_s21  ;;  %p3541_p8 = scmp.lt.s32.totalorder %s3535_s21, %s3535_s21 }
 0x25f   :  { %p3542_p9 = por %p3541_p8, %p3540_p7 }
 0x261   :  { %p3543_p10 = pnand %p3542_p9, %p3536_p6 }
 0x263   :  { %3546 = shalt.err (!%p3543_p10)
}
 0x264   :  { %s3547_s3 = scalar_lea.hbm %s4939_s6, 256 }
 0x265   :  { %p3548_p11 = scmp.ne.s32.totalorder %s4939_s6, %s3547_s3  ;;  %p3551_p12 = scmp.lt.u32.totalorder %s3547_s3, %s4939_s6 }
 0x267   :  { %p3553_p13 = pnand %p3551_p12, %p3548_p11 }
 0x269   :  { %3556 = shalt.err (!%p3553_p13)
}
 0x26a   :  { %2772 = dma.vmem_to_hbm [thread:$0]  %s2770_s10, 256, %s4939_s6, [#allocation12]  }
 0x26b   :  { %3563 = dma.done.wait [#allocation4], 256  }
 0x26c   :  { %3564 = vsyncadd [#allocation4], 4294967040 }
 0x26d   :  { %3565 = dma.done.wait [#allocation12], 512  }
 0x26e   :  { %3566 = vsyncadd [#allocation12], 4294966784 }
 0x26f   :  { %2782 = vsyncpa [#allocation3], 1 }
 0x270   :  { %2783 = vsyncpa [#allocation6], 1 }
 0x271   :  { %2784 = vsyncpa [#allocation9], 1 }
 0x272   :  { %2785 = vsyncpa [#allocation4], 1 }
 0x273   :  { %2786 = vsyncpa [#allocation12], 1 }

</bundles_post_ra>
